<compile_context>
chip_gen: v7x
topology: tpu7x:2x2x1
jax: 0.10.0
libtpu: 0.0.40
codegen_flags: <defaults>
</compile_context>

<pallas_src>
import math
from functools import partial

import jax
import jax.numpy as jnp
from jax.experimental import pallas as pl
from jax.experimental.pallas import tpu as pltpu


def _round_up(x, m):
    return ((x + m - 1) // m) * m


# ----------------------------------------------------------------------------
# Kernel 1: tiled MXU matmul with fused bias + optional ReLU.
#   bf16 operands, fp32 accumulation in a VMEM scratch tile, k-innermost
#   reduction, lane-dense (128-wide) output tiles.
# ----------------------------------------------------------------------------
def _make_matmul_kernel(apply_relu):
    def kernel(a_ref, b_ref, bias_ref, o_ref, acc_ref):
        @pl.when(pl.program_id(2) == 0)
        def _():
            acc_ref[...] = jnp.zeros_like(acc_ref)

        acc_ref[...] += jnp.dot(a_ref[...], b_ref[...],
                                preferred_element_type=jnp.float32)

        @pl.when(pl.program_id(2) == pl.num_programs(2) - 1)
        def _():
            out = acc_ref[...] + bias_ref[...]          # (TM,TN) + (1,TN) bcast
            if apply_relu:
                out = jnp.maximum(out, 0.0)
            o_ref[...] = out.astype(o_ref.dtype)

    return kernel


def matmul_bias(a, w, bias, relu=False, out_dtype=jnp.float32):
    """out = relu?(a @ w + bias).  a:[M,K], w:[K,N] (bf16), bias:[N] (f32)."""
    M, K = a.shape
    N = w.shape[1]

    # Degenerate problems (tiny M or tiny K*N) are faster as a plain XLA dot:
    # padding them up to 128-wide MXU tiles is >90% zero work plus per-call
    # launch overhead.
    if M < 128 or K * N < 1024:
        out = jnp.dot(a.astype(jnp.bfloat16), w.astype(jnp.bfloat16),
                      preferred_element_type=jnp.float32) + bias[None, :]
        if relu:
            out = jnp.maximum(out, 0.0)
        return out.astype(out_dtype)

    a = a.astype(jnp.bfloat16)
    w = w.astype(jnp.bfloat16)

    # M tiling: biggest tile (up to 512) that divides the 128-rounded M, so the
    # common large-M convs get big bandwidth-friendly tiles with no A pad copy.
    Mp = _round_up(M, 128)
    tm = next(t for t in (512, 384, 256, 128) if Mp % t == 0)
    if Mp != M:
        a = jnp.pad(a, ((0, Mp - M), (0, 0)))

    # K tiling: small K (all convs here) stays a single full-extent block, so
    # the big im2col A matrix is never pad-copied along K.
    if K <= 512:
        tk, Kp = K, K
    else:
        Kp = _round_up(K, 128)
        tk = 256 if Kp % 256 == 0 else 128
        a = jnp.pad(a, ((0, 0), (0, Kp - K)))
        w = jnp.pad(w, ((0, Kp - K), (0, 0)))

    tn = 128                      # 128-wide N tiles: valid on v5e/v6e/v7x MXUs
    Np = _round_up(N, tn)
    if Np != N:
        w = jnp.pad(w, ((0, 0), (0, Np - N)))
    bias_p = jnp.pad(bias.astype(jnp.float32).reshape(1, N),
                     ((0, 0), (0, Np - N)))

    grid = (Mp // tm, Np // tn, Kp // tk)
    out = pl.pallas_call(
        _make_matmul_kernel(relu),
        out_shape=jax.ShapeDtypeStruct((Mp, Np), out_dtype),
        grid_spec=pltpu.PrefetchScalarGridSpec(
            num_scalar_prefetch=0,
            grid=grid,
            in_specs=[
                pl.BlockSpec((tm, tk), lambda i, j, k: (i, k)),
                pl.BlockSpec((tk, tn), lambda i, j, k: (k, j)),
                pl.BlockSpec((1, tn), lambda i, j, k: (0, j)),
            ],
            out_specs=pl.BlockSpec((tm, tn), lambda i, j, k: (i, j)),
            scratch_shapes=[pltpu.VMEM((tm, tn), jnp.float32)],
        ),
        compiler_params=pltpu.CompilerParams(
            dimension_semantics=("parallel", "parallel", "arbitrary")),
    )(a, w, bias_p)
    return out[:M, :N]


# ----------------------------------------------------------------------------
# Kernel 2: direct 3x3 / stride-1 / pad-1 conv (no im2col materialization).
#   The zero-padded feature map is flattened over (H,W); for output position
#   r0 = y*Wp + x, tap (i,j) reads row r0 + i*Wp + j, so every tap is a
#   contiguous shifted window of the SAME VMEM-resident image.  The 9 taps are
#   accumulated in-kernel in fp32; only the feature map (not 9x patches) ever
#   touches HBM.  The 2 pad columns per row are computed as throwaway work
#   (2/Wp of the matmul) and sliced off afterwards.
# ----------------------------------------------------------------------------
def _make_direct_conv_kernel(offsets, r_out, apply_relu):
    def kernel(x_ref, w_ref, b_ref, o_ref):
        cout = w_ref.shape[2]
        acc = jnp.zeros((r_out, cout), jnp.float32)
        for t, off in enumerate(offsets):           # 9 static taps, unrolled
            acc = acc + jnp.dot(x_ref[0, pl.ds(off, r_out), :], w_ref[t],
                                preferred_element_type=jnp.float32)
        out = acc + b_ref[...]
        if apply_relu:
            out = jnp.maximum(out, 0.0)
        o_ref[0] = out.astype(o_ref.dtype)

    return kernel


def conv3x3_s1_direct(x, wm, bias, relu=False, out_dtype=jnp.bfloat16):
    # x: [N,H,W,C]; wm: [9*C, Cout] (bf16); bias: [Cout]
    n, h, w, c = x.shape
    cout = wm.shape[1]
    hp, wp = h + 2, w + 2
    xp = jnp.pad(x.astype(jnp.bfloat16), ((0, 0), (1, 1), (1, 1), (0, 0)))
    # flatten (H,W) row-major + a small zero tail so the last tap's window
    # never reads out of bounds (max read = r_out-1 + 2*wp + 2 <= hp*wp + 8).
    xf = jnp.pad(xp.reshape(n, hp * wp, c), ((0, 0), (0, 16), (0, 0)))
    rows = hp * wp + 16
    r_out = _round_up(h * wp, 8)
    offsets = tuple(i * wp + j for i in range(3) for j in range(3))
    wt = wm.astype(jnp.bfloat16).reshape(9, c, cout)
    bias_r = bias.astype(jnp.float32).reshape(1, cout)

    out = pl.pallas_call(
        _make_direct_conv_kernel(offsets, r_out, relu),
        out_shape=jax.ShapeDtypeStruct((n, r_out, cout), out_dtype),
        grid_spec=pltpu.PrefetchScalarGridSpec(
            num_scalar_prefetch=0,
            grid=(n,),
            in_specs=[
                pl.BlockSpec((1, rows, c), lambda b: (b, 0, 0)),
                pl.BlockSpec((9, c, cout), lambda b: (0, 0, 0)),
                pl.BlockSpec((1, cout), lambda b: (0, 0)),
            ],
            out_specs=pl.BlockSpec((1, r_out, cout), lambda b: (b, 0, 0)),
        ),
        compiler_params=pltpu.CompilerParams(
            dimension_semantics=("parallel",)),
    )(xf, wt, bias_r)
    # keep only the valid columns (x < W)
    return out[:, :h * wp, :].reshape(n, h, wp, cout)[:, :, :w, :]


# ----------------------------------------------------------------------------
# Convolution wrappers
# ----------------------------------------------------------------------------
def _im2col(x, kh, kw, stride, pad):
    # x: [N,H,W,C] -> patches [N*Ho*Wo, kh*kw*C]
    n, h, w, c = x.shape
    if pad:
        x = jnp.pad(x, ((0, 0), (pad, pad), (pad, pad), (0, 0)))
    hp, wp = h + 2 * pad, w + 2 * pad
    ho = (hp - kh) // stride + 1
    wo = (wp - kw) // stride + 1
    cols = []
    for i in range(kh):
        for j in range(kw):
            cols.append(x[:, i:i + stride * ho:stride,
                             j:j + stride * wo:stride, :])
    patches = jnp.concatenate(cols, axis=-1) if len(cols) > 1 else cols[0]
    return patches.reshape(n * ho * wo, kh * kw * c), (n, ho, wo)


def conv2d(x, p, kh, kw, stride=1, padding=0, relu=False,
           out_dtype=jnp.bfloat16):
    wm, bias = p["wm"], p["b"]
    if kh == 3 and kw == 3 and stride == 1 and padding == 1:
        return conv3x3_s1_direct(x, wm, bias, relu=relu, out_dtype=out_dtype)
    # stride-2 / 1x1 convs: im2col (or plain reshape) + matmul.
    patches, (n, ho, wo) = _im2col(x.astype(jnp.bfloat16), kh, kw, stride,
                                   padding)
    out = matmul_bias(patches, wm, bias, relu=relu, out_dtype=out_dtype)
    return out.reshape(n, ho, wo, wm.shape[1])


def upsample2_nearest(x):
    return jnp.repeat(jnp.repeat(x, 2, axis=1), 2, axis=2)


# ----------------------------------------------------------------------------
# Shared heads, batched across all pyramid levels: the tower weights are
# identical for P3..P7, so the per-level patch matrices are concatenated along
# M and each tower layer runs as ONE matmul (instead of 5 tiny launches).
# ----------------------------------------------------------------------------
def _im2col_levels(feats):
    patches, metas = [], []
    for f in feats:
        p, meta = _im2col(f.astype(jnp.bfloat16), 3, 3, 1, 1)
        patches.append(p)
        metas.append(meta)
    return jnp.concatenate(patches, axis=0), metas


def fused_head(feats, tower, pred, num_anchors, out_per_anchor):
    cur = list(feats)
    for layer in tower:
        a, metas = _im2col_levels(cur)
        out = matmul_bias(a, layer["wm"], layer["b"], relu=True,
                          out_dtype=jnp.bfloat16)
        cout = layer["wm"].shape[1]
        cur, off = [], 0
        for (n, ho, wo) in metas:
            m = n * ho * wo
            cur.append(out[off:off + m].reshape(n, ho, wo, cout))
            off += m
    a, metas = _im2col_levels(cur)
    out = matmul_bias(a, pred["wm"], pred["b"], relu=False,
                      out_dtype=jnp.float32)
    res, off = [], 0
    for (n, ho, wo) in metas:
        m = n * ho * wo
        res.append(out[off:off + m].reshape(n, ho * wo * num_anchors,
                                            out_per_anchor))
        off += m
    return jnp.concatenate(res, axis=1)


# ----------------------------------------------------------------------------
# Parameter init (deterministic, synthetic; no checkpoint load).  Weights are
# pre-reshaped to the [K, N] matmul operand and pre-cast to bf16 once here.
# ----------------------------------------------------------------------------
def _conv_init(key, kh, kw, cin, cout, bias_init=0.0):
    fan_in = kh * kw * cin
    w = jax.random.normal(key, (kh, kw, cin, cout), jnp.float32) / math.sqrt(fan_in)
    return {"wm": w.reshape(kh * kw * cin, cout).astype(jnp.bfloat16),
            "b": jnp.full((cout,), bias_init, jnp.float32)}


def init_retinanet_params(key, num_classes, num_anchors=9, base=8, fpn=16):
    keys = iter(jax.random.split(key, 32))
    p = {}
    # backbone (stand-in for resnet50 stages producing C3/C4/C5)
    p["stem"] = _conv_init(next(keys), 3, 3, 3, base)
    p["c3"] = _conv_init(next(keys), 3, 3, base, 2 * base)
    p["c4"] = _conv_init(next(keys), 3, 3, 2 * base, 4 * base)
    p["c5"] = _conv_init(next(keys), 3, 3, 4 * base, 8 * base)
    # FPN
    p["lat3"] = _conv_init(next(keys), 1, 1, 2 * base, fpn)
    p["lat4"] = _conv_init(next(keys), 1, 1, 4 * base, fpn)
    p["lat5"] = _conv_init(next(keys), 1, 1, 8 * base, fpn)
    p["out3"] = _conv_init(next(keys), 3, 3, fpn, fpn)
    p["out4"] = _conv_init(next(keys), 3, 3, fpn, fpn)
    p["out5"] = _conv_init(next(keys), 3, 3, fpn, fpn)
    p["p6"] = _conv_init(next(keys), 3, 3, fpn, fpn)     # LastLevelP6P7
    p["p7"] = _conv_init(next(keys), 3, 3, fpn, fpn)
    # shared heads
    p["cls_tower"] = [_conv_init(next(keys), 3, 3, fpn, fpn) for _ in range(4)]
    p["reg_tower"] = [_conv_init(next(keys), 3, 3, fpn, fpn) for _ in range(4)]
    prior = -math.log((1.0 - 0.01) / 0.01)
    p["cls_pred"] = _conv_init(next(keys), 3, 3, fpn, num_anchors * num_classes,
                               bias_init=prior)
    p["reg_pred"] = _conv_init(next(keys), 3, 3, fpn, num_anchors * 4)
    return p


# ----------------------------------------------------------------------------
# RetinaNet forward
# ----------------------------------------------------------------------------
def retinanet_forward(params, imgs_nchw, num_classes, num_anchors=9,
                      mode="infer"):
    x = jnp.transpose(imgs_nchw, (0, 2, 3, 1)).astype(jnp.bfloat16)  # NCHW->NHWC

    # backbone
    s = conv2d(x, params["stem"], 3, 3, stride=2, padding=1, relu=True)
    c3 = conv2d(s, params["c3"], 3, 3, stride=2, padding=1, relu=True)
    c4 = conv2d(c3, params["c4"], 3, 3, stride=2, padding=1, relu=True)
    c5 = conv2d(c4, params["c5"], 3, 3, stride=2, padding=1, relu=True)

    # FPN top-down
    p5 = conv2d(c5, params["lat5"], 1, 1, stride=1, padding=0)
    p4 = conv2d(c4, params["lat4"], 1, 1, stride=1, padding=0) \
        + upsample2_nearest(p5)
    p3 = conv2d(c3, params["lat3"], 1, 1, stride=1, padding=0) \
        + upsample2_nearest(p4)
    p3 = conv2d(p3, params["out3"], 3, 3, stride=1, padding=1)  # direct-conv kernel
    p4 = conv2d(p4, params["out4"], 3, 3, stride=1, padding=1)
    p5 = conv2d(p5, params["out5"], 3, 3, stride=1, padding=1)
    p6 = conv2d(p5, params["p6"], 3, 3, stride=2, padding=1)
    # torchvision LastLevelP6P7: the p6 feature itself is NOT rectified, only
    # p7's input is, so this ReLU cannot be folded into the p6 conv epilogue
    # without changing semantics.
    p7 = conv2d(jnp.maximum(p6, 0.0), params["p7"], 3, 3, stride=2, padding=1)
    feats = [p3, p4, p5, p6, p7]

    # shared classification / regression heads (batched across levels)
    cls_logits = fused_head(feats, params["cls_tower"], params["cls_pred"],
                            num_anchors, num_classes)
    bbox_reg = fused_head(feats, params["reg_tower"], params["reg_pred"],
                          num_anchors, 4)
    outputs = {"cls_logits": cls_logits, "bbox_regression": bbox_reg}

    if mode == "infer":
        # TODO(synk): torchvision post-processing (anchor decode, score
        # thresholding, per-class NMS) has no clean Pallas equivalent; raw
        # head outputs are returned instead.
        return outputs
    elif mode == "val":
        losses = {"loss": jnp.float32(0.0)}
        return losses, outputs
    else:
        # TODO(synk): training losses (focal + smooth-L1) need anchor-target
        # matching against `targets`; not implemented here.
        raise NotImplementedError("train mode not implemented")


# ----------------------------------------------------------------------------
if __name__ == "__main__":
    # Mimic the PyTorch module's dictionary handling.
    dictionary = [{"person": 1.0}, {"car": 1.0}, {"bicycle": 1.0}]
    num_classes = len(dictionary)
    category = [v for d in dictionary for v in d.keys()]
    weight = [d[v] for d in dictionary for v in d.keys() if v in category]
    num_anchors = 9

    key = jax.random.PRNGKey(0)
    pkey, xkey = jax.random.split(key)
    params = init_retinanet_params(pkey, num_classes, num_anchors=num_anchors)

    # Small input consistent with the module's NCHW convention (module uses
    # 512x512; we use 64x64 so P3..P7 are 16,8,4,2,1).
    imgs = jax.random.normal(xkey, (2, 3, 64, 64), dtype=jnp.float32)

    fwd = jax.jit(partial(retinanet_forward, num_classes=num_classes,
                          num_anchors=num_anchors, mode="infer"))
    out = fwd(params, imgs)
    jax.block_until_ready(out)

    expected_anchors = (16 * 16 + 8 * 8 + 4 * 4 + 2 * 2 + 1 * 1) * num_anchors
    assert out["cls_logits"].shape == (2, expected_anchors, num_classes)
    assert out["bbox_regression"].shape == (2, expected_anchors, 4)
    assert out["cls_logits"].dtype == jnp.float32
    assert bool(jnp.all(jnp.isfinite(out["cls_logits"])))
    assert bool(jnp.all(jnp.isfinite(out["bbox_regression"])))

    # exercise the 'val' branch as well
    val_fwd = jax.jit(partial(retinanet_forward, num_classes=num_classes,
                              num_anchors=num_anchors, mode="val"))
    losses, _ = val_fwd(params, imgs)
    jax.block_until_ready(losses)

    print("KERNEL_OK")
</pallas_src>

<mosaic_0001>
module attributes {stable_mosaic.version = 11 : i64} {
  func.func @kernel(%arg0: i32, %arg1: i32, %arg2: i32, %arg3: memref<512x72xbf16, #tpu.memory_space<vmem>>, %arg4: memref<72x128xbf16, #tpu.memory_space<vmem>>, %arg5: memref<1x128xf32, #tpu.memory_space<vmem>>, %arg6: memref<512x128xbf16, #tpu.memory_space<vmem>>, %arg7: memref<512x128xf32, #tpu.memory_space<vmem>>) attributes {dimension_semantics = [#tpu.dimension_semantics<parallel>, #tpu.dimension_semantics<parallel>, #tpu.dimension_semantics<arbitrary>], iteration_bounds = array<i64: 1, 1, 1>, scalar_prefetch = 0 : i64, scratch_operands = 1 : i64, tpu.core_type = #tpu.core_type<tc>, window_params = [{transform_indices = @transform_0, window_bounds = array<i64: 512, 72>}, {transform_indices = @transform_1, window_bounds = array<i64: 72, 128>}, {transform_indices = @transform_2, window_bounds = array<i64: 1, 128>}, {transform_indices = @transform_3, window_bounds = array<i64: 512, 128>}]} {
    %c0_i32 = arith.constant 0 : i32
    %0 = arith.cmpi eq, %arg2, %c0_i32 : i32
    %1 = arith.extui %0 : i1 to i32
    %c0_i32_0 = arith.constant 0 : i32
    %2 = arith.cmpi ne, %1, %c0_i32_0 : i32
    scf.if %2 {
      %cst_10 = arith.constant 0.000000e+00 : f32
      %12 = vector.broadcast %cst_10 : f32 to vector<512x128xf32>
      %c0_11 = arith.constant 0 : index
      %c0_12 = arith.constant 0 : index
      %13 = vector.load %arg7[%c0_11, %c0_12] : memref<512x128xf32, #tpu.memory_space<vmem>>, vector<512x128xf32>
      tpu.vector_store %arg7[%c0_11, %c0_12], %12 {strides = array<i32>} : memref<512x128xf32, #tpu.memory_space<vmem>>, vector<512x128xf32>,
    } else {
    }
    %c0 = arith.constant 0 : index
    %c0_1 = arith.constant 0 : index
    %3 = vector.load %arg7[%c0, %c0_1] : memref<512x128xf32, #tpu.memory_space<vmem>>, vector<512x128xf32>
    %c0_2 = arith.constant 0 : index
    %c0_3 = arith.constant 0 : index
    %4 = vector.load %arg3[%c0_2, %c0_3] : memref<512x72xbf16, #tpu.memory_space<vmem>>, vector<512x72xbf16>
    %c0_4 = arith.constant 0 : index
    %c0_5 = arith.constant 0 : index
    %5 = vector.load %arg4[%c0_4, %c0_5] : memref<72x128xbf16, #tpu.memory_space<vmem>>, vector<72x128xbf16>
    %cst = arith.constant dense<0.000000e+00> : vector<512x128xf32>
    %6 = tpu.matmul %4, %5, %cst {dimension_numbers = #tpu.dot_dimension_numbers<[1], [0], [0], [1], [0, 0, 1, 1], [], []>} : vector<512x72xbf16>, vector<72x128xbf16>, vector<512x128xf32> -> vector<512x128xf32>
    %7 = arith.addf %3, %6 : vector<512x128xf32>
    %c0_6 = arith.constant 0 : index
    %c0_7 = arith.constant 0 : index
    %8 = vector.load %arg7[%c0_6, %c0_7] : memref<512x128xf32, #tpu.memory_space<vmem>>, vector<512x128xf32>
    tpu.vector_store %arg7[%c0_6, %c0_7], %7 {strides = array<i32>} : memref<512x128xf32, #tpu.memory_space<vmem>>, vector<512x128xf32>,
    %c0_i32_8 = arith.constant 0 : i32
    %9 = arith.cmpi eq, %arg2, %c0_i32_8 : i32
    %10 = arith.extui %9 : i1 to i32
    %c0_i32_9 = arith.constant 0 : i32
    %11 = arith.cmpi ne, %10, %c0_i32_9 : i32
    scf.if %11 {
      %c0_10 = arith.constant 0 : index
      %c0_11 = arith.constant 0 : index
      %12 = vector.load %arg7[%c0_10, %c0_11] : memref<512x128xf32, #tpu.memory_space<vmem>>, vector<512x128xf32>
      %c0_12 = arith.constant 0 : index
      %c0_13 = arith.constant 0 : index
      %13 = vector.load %arg5[%c0_12, %c0_13] : memref<1x128xf32, #tpu.memory_space<vmem>>, vector<1x128xf32>
      %14 = vector.broadcast %13 : vector<1x128xf32> to vector<512x128xf32>
      %15 = arith.addf %12, %14 : vector<512x128xf32>
      %cst_14 = arith.constant 0.000000e+00 : f32
      %16 = vector.broadcast %cst_14 : f32 to vector<512x128xf32>
      %17 = arith.maximumf %15, %16 : vector<512x128xf32>
      %18 = arith.truncf %17 : vector<512x128xf32> to vector<512x128xbf16>
      %c0_15 = arith.constant 0 : index
      %c0_16 = arith.constant 0 : index
      %19 = vector.load %arg6[%c0_15, %c0_16] : memref<512x128xbf16, #tpu.memory_space<vmem>>, vector<512x128xbf16>
      tpu.vector_store %arg6[%c0_15, %c0_16], %18 {strides = array<i32>} : memref<512x128xbf16, #tpu.memory_space<vmem>>, vector<512x128xbf16>,
    } else {
    }
    return
  }
  func.func @transform_0(%arg0: i32, %arg1: i32, %arg2: i32) -> (i32, i32) {
    %c0_i32 = arith.constant 0 : i32
    return %arg0, %arg2 : i32, i32
  }
  func.func @transform_1(%arg0: i32, %arg1: i32, %arg2: i32) -> (i32, i32) {
    %c0_i32 = arith.constant 0 : i32
    return %arg2, %arg1 : i32, i32
  }
  func.func @transform_2(%arg0: i32, %arg1: i32, %arg2: i32) -> (i32, i32) {
    %c0_i32 = arith.constant 0 : i32
    %c0_i32_0 = arith.constant 0 : i32
    return %c0_i32, %arg1 : i32, i32
  }
  func.func @transform_3(%arg0: i32, %arg1: i32, %arg2: i32) -> (i32, i32) {
    %c0_i32 = arith.constant 0 : i32
    return %arg0, %arg1 : i32, i32
  }
}

module attributes {stable_mosaic.version = 11 : i64} {
  func.func @kernel(%arg0: i32, %arg1: i32, %arg2: i32, %arg3: memref<128x144xbf16, #tpu.memory_space<vmem>>, %arg4: memref<144x128xbf16, #tpu.memory_space<vmem>>, %arg5: memref<1x128xf32, #tpu.memory_space<vmem>>, %arg6: memref<128x128xbf16, #tpu.memory_space<vmem>>, %arg7: memref<128x128xf32, #tpu.memory_space<vmem>>) attributes {dimension_semantics = [#tpu.dimension_semantics<parallel>, #tpu.dimension_semantics<parallel>, #tpu.dimension_semantics<arbitrary>], iteration_bounds = array<i64: 1, 1, 1>, scalar_prefetch = 0 : i64, scratch_operands = 1 : i64, tpu.core_type = #tpu.core_type<tc>, window_params = [{transform_indices = @transform_0, window_bounds = array<i64: 128, 144>}, {transform_indices = @transform_1, window_bounds = array<i64: 144, 128>}, {transform_indices = @transform_2, window_bounds = array<i64: 1, 128>}, {transform_indices = @transform_3, window_bounds = array<i64: 128, 128>}]} {
    %c0_i32 = arith.constant 0 : i32
    %0 = arith.cmpi eq, %arg2, %c0_i32 : i32
    %1 = arith.extui %0 : i1 to i32
    %c0_i32_0 = arith.constant 0 : i32
    %2 = arith.cmpi ne, %1, %c0_i32_0 : i32
    scf.if %2 {
      %cst_10 = arith.constant 0.000000e+00 : f32
      %12 = vector.broadcast %cst_10 : f32 to vector<128x128xf32>
      %c0_11 = arith.constant 0 : index
      %c0_12 = arith.constant 0 : index
      %13 = vector.load %arg7[%c0_11, %c0_12] : memref<128x128xf32, #tpu.memory_space<vmem>>, vector<128x128xf32>
      tpu.vector_store %arg7[%c0_11, %c0_12], %12 {strides = array<i32>} : memref<128x128xf32, #tpu.memory_space<vmem>>, vector<128x128xf32>,
    } else {
    }
    %c0 = arith.constant 0 : index
    %c0_1 = arith.constant 0 : index
    %3 = vector.load %arg7[%c0, %c0_1] : memref<128x128xf32, #tpu.memory_space<vmem>>, vector<128x128xf32>
    %c0_2 = arith.constant 0 : index
    %c0_3 = arith.constant 0 : index
    %4 = vector.load %arg3[%c0_2, %c0_3] : memref<128x144xbf16, #tpu.memory_space<vmem>>, vector<128x144xbf16>
    %c0_4 = arith.constant 0 : index
    %c0_5 = arith.constant 0 : index
    %5 = vector.load %arg4[%c0_4, %c0_5] : memref<144x128xbf16, #tpu.memory_space<vmem>>, vector<144x128xbf16>
    %cst = arith.constant dense<0.000000e+00> : vector<128x128xf32>
    %6 = tpu.matmul %4, %5, %cst {dimension_numbers = #tpu.dot_dimension_numbers<[1], [0], [0], [1], [0, 0, 1, 1], [], []>} : vector<128x144xbf16>, vector<144x128xbf16>, vector<128x128xf32> -> vector<128x128xf32>
    %7 = arith.addf %3, %6 : vector<128x128xf32>
    %c0_6 = arith.constant 0 : index
    %c0_7 = arith.constant 0 : index
    %8 = vector.load %arg7[%c0_6, %c0_7] : memref<128x128xf32, #tpu.memory_space<vmem>>, vector<128x128xf32>
    tpu.vector_store %arg7[%c0_6, %c0_7], %7 {strides = array<i32>} : memref<128x128xf32, #tpu.memory_space<vmem>>, vector<128x128xf32>,
    %c0_i32_8 = arith.constant 0 : i32
    %9 = arith.cmpi eq, %arg2, %c0_i32_8 : i32
    %10 = arith.extui %9 : i1 to i32
    %c0_i32_9 = arith.constant 0 : i32
    %11 = arith.cmpi ne, %10, %c0_i32_9 : i32
    scf.if %11 {
      %c0_10 = arith.constant 0 : index
      %c0_11 = arith.constant 0 : index
      %12 = vector.load %arg7[%c0_10, %c0_11] : memref<128x128xf32, #tpu.memory_space<vmem>>, vector<128x128xf32>
      %c0_12 = arith.constant 0 : index
      %c0_13 = arith.constant 0 : index
      %13 = vector.load %arg5[%c0_12, %c0_13] : memref<1x128xf32, #tpu.memory_space<vmem>>, vector<1x128xf32>
      %14 = vector.broadcast %13 : vector<1x128xf32> to vector<128x128xf32>
      %15 = arith.addf %12, %14 : vector<128x128xf32>
      %cst_14 = arith.constant 0.000000e+00 : f32
      %16 = vector.broadcast %cst_14 : f32 to vector<128x128xf32>
      %17 = arith.maximumf %15, %16 : vector<128x128xf32>
      %18 = arith.truncf %17 : vector<128x128xf32> to vector<128x128xbf16>
      %c0_15 = arith.constant 0 : index
      %c0_16 = arith.constant 0 : index
      %19 = vector.load %arg6[%c0_15, %c0_16] : memref<128x128xbf16, #tpu.memory_space<vmem>>, vector<128x128xbf16>
      tpu.vector_store %arg6[%c0_15, %c0_16], %18 {strides = array<i32>} : memref<128x128xbf16, #tpu.memory_space<vmem>>, vector<128x128xbf16>,
    } else {
    }
    return
  }
  func.func @transform_0(%arg0: i32, %arg1: i32, %arg2: i32) -> (i32, i32) {
    %c0_i32 = arith.constant 0 : i32
    return %arg0, %arg2 : i32, i32
  }
  func.func @transform_1(%arg0: i32, %arg1: i32, %arg2: i32) -> (i32, i32) {
    %c0_i32 = arith.constant 0 : i32
    return %arg2, %arg1 : i32, i32
  }
  func.func @transform_2(%arg0: i32, %arg1: i32, %arg2: i32) -> (i32, i32) {
    %c0_i32 = arith.constant 0 : i32
    %c0_i32_0 = arith.constant 0 : i32
    return %c0_i32, %arg1 : i32, i32
  }
  func.func @transform_3(%arg0: i32, %arg1: i32, %arg2: i32) -> (i32, i32) {
    %c0_i32 = arith.constant 0 : i32
    return %arg0, %arg1 : i32, i32
  }
}

module attributes {stable_mosaic.version = 11 : i64} {
  func.func @kernel(%arg0: i32, %arg1: memref<1x52x16xbf16, #tpu.memory_space<vmem>>, %arg2: memref<9x16x16xbf16, #tpu.memory_space<vmem>>, %arg3: memref<1x16xf32, #tpu.memory_space<vmem>>, %arg4: memref<1x24x16xbf16, #tpu.memory_space<vmem>>) attributes {dimension_semantics = [#tpu.dimension_semantics<parallel>], iteration_bounds = array<i64: 2>, scalar_prefetch = 0 : i64, scratch_operands = 0 : i64, tpu.core_type = #tpu.core_type<tc>, window_params = [{transform_indices = @transform_0, window_bounds = array<i64: 1, 52, 16>}, {pipeline_mode = #tpu.pipeline_mode<synchronous>, transform_indices = @transform_1, window_bounds = array<i64: 9, 16, 16>}, {pipeline_mode = #tpu.pipeline_mode<synchronous>, transform_indices = @transform_2, window_bounds = array<i64: 1, 16>}, {transform_indices = @transform_3, window_bounds = array<i64: 1, 24, 16>}]} {
    %cst = arith.constant 0.000000e+00 : f32
    %0 = vector.broadcast %cst : f32 to vector<24x16xf32>
    %c0 = arith.constant 0 : index
    %c0_0 = arith.constant 0 : index
    %c0_1 = arith.constant 0 : index
    %1 = vector.load %arg1[%c0, %c0_0, %c0_1] : memref<1x52x16xbf16, #tpu.memory_space<vmem>>, vector<1x24x16xbf16>
    %2 = vector.shape_cast %1 : vector<1x24x16xbf16> to vector<24x16xbf16>
    %c0_2 = arith.constant 0 : index
    %c0_3 = arith.constant 0 : index
    %c0_4 = arith.constant 0 : index
    %3 = vector.load %arg2[%c0_2, %c0_3, %c0_4] : memref<9x16x16xbf16, #tpu.memory_space<vmem>>, vector<1x16x16xbf16>
    %4 = vector.shape_cast %3 : vector<1x16x16xbf16> to vector<16x16xbf16>
    %cst_5 = arith.constant dense<0.000000e+00> : vector<24x16xf32>
    %5 = tpu.matmul %2, %4, %cst_5 {dimension_numbers = #tpu.dot_dimension_numbers<[1], [0], [0], [1], [0, 0, 1, 1], [], []>} : vector<24x16xbf16>, vector<16x16xbf16>, vector<24x16xf32> -> vector<24x16xf32>
    %6 = arith.addf %0, %5 : vector<24x16xf32>
    %c0_6 = arith.constant 0 : index
    %c1 = arith.constant 1 : index
    %c0_7 = arith.constant 0 : index
    %7 = vector.load %arg1[%c0_6, %c1, %c0_7] : memref<1x52x16xbf16, #tpu.memory_space<vmem>>, vector<1x24x16xbf16>
    %8 = vector.shape_cast %7 : vector<1x24x16xbf16> to vector<24x16xbf16>
    %c1_8 = arith.constant 1 : index
    %c0_9 = arith.constant 0 : index
    %c0_10 = arith.constant 0 : index
    %9 = vector.load %arg2[%c1_8, %c0_9, %c0_10] : memref<9x16x16xbf16, #tpu.memory_space<vmem>>, vector<1x16x16xbf16>
    %10 = vector.shape_cast %9 : vector<1x16x16xbf16> to vector<16x16xbf16>
    %cst_11 = arith.constant dense<0.000000e+00> : vector<24x16xf32>
    %11 = tpu.matmul %8, %10, %cst_11 {dimension_numbers = #tpu.dot_dimension_numbers<[1], [0], [0], [1], [0, 0, 1, 1], [], []>} : vector<24x16xbf16>, vector<16x16xbf16>, vector<24x16xf32> -> vector<24x16xf32>
    %12 = arith.addf %6, %11 : vector<24x16xf32>
    %c0_12 = arith.constant 0 : index
    %c2 = arith.constant 2 : index
    %c0_13 = arith.constant 0 : index
    %13 = vector.load %arg1[%c0_12, %c2, %c0_13] : memref<1x52x16xbf16, #tpu.memory_space<vmem>>, vector<1x24x16xbf16>
    %14 = vector.shape_cast %13 : vector<1x24x16xbf16> to vector<24x16xbf16>
    %c2_14 = arith.constant 2 : index
    %c0_15 = arith.constant 0 : index
    %c0_16 = arith.constant 0 : index
    %15 = vector.load %arg2[%c2_14, %c0_15, %c0_16] : memref<9x16x16xbf16, #tpu.memory_space<vmem>>, vector<1x16x16xbf16>
    %16 = vector.shape_cast %15 : vector<1x16x16xbf16> to vector<16x16xbf16>
    %cst_17 = arith.constant dense<0.000000e+00> : vector<24x16xf32>
    %17 = tpu.matmul %14, %16, %cst_17 {dimension_numbers = #tpu.dot_dimension_numbers<[1], [0], [0], [1], [0, 0, 1, 1], [], []>} : vector<24x16xbf16>, vector<16x16xbf16>, vector<24x16xf32> -> vector<24x16xf32>
    %18 = arith.addf %12, %17 : vector<24x16xf32>
    %c0_18 = arith.constant 0 : index
    %c6 = arith.constant 6 : index
    %c0_19 = arith.constant 0 : index
    %19 = vector.load %arg1[%c0_18, %c6, %c0_19] : memref<1x52x16xbf16, #tpu.memory_space<vmem>>, vector<1x24x16xbf16>
    %20 = vector.shape_cast %19 : vector<1x24x16xbf16> to vector<24x16xbf16>
    %c3 = arith.constant 3 : index
    %c0_20 = arith.constant 0 : index
    %c0_21 = arith.constant 0 : index
    %21 = vector.load %arg2[%c3, %c0_20, %c0_21] : memref<9x16x16xbf16, #tpu.memory_space<vmem>>, vector<1x16x16xbf16>
    %22 = vector.shape_cast %21 : vector<1x16x16xbf16> to vector<16x16xbf16>
    %cst_22 = arith.constant dense<0.000000e+00> : vector<24x16xf32>
    %23 = tpu.matmul %20, %22, %cst_22 {dimension_numbers = #tpu.dot_dimension_numbers<[1], [0], [0], [1], [0, 0, 1, 1], [], []>} : vector<24x16xbf16>, vector<16x16xbf16>, vector<24x16xf32> -> vector<24x16xf32>
    %24 = arith.addf %18, %23 : vector<24x16xf32>
    %c0_23 = arith.constant 0 : index
    %c7 = arith.constant 7 : index
    %c0_24 = arith.constant 0 : index
    %25 = vector.load %arg1[%c0_23, %c7, %c0_24] : memref<1x52x16xbf16, #tpu.memory_space<vmem>>, vector<1x24x16xbf16>
    %26 = vector.shape_cast %25 : vector<1x24x16xbf16> to vector<24x16xbf16>
    %c4 = arith.constant 4 : index
    %c0_25 = arith.constant 0 : index
    %c0_26 = arith.constant 0 : index
    %27 = vector.load %arg2[%c4, %c0_25, %c0_26] : memref<9x16x16xbf16, #tpu.memory_space<vmem>>, vector<1x16x16xbf16>
    %28 = vector.shape_cast %27 : vector<1x16x16xbf16> to vector<16x16xbf16>
    %cst_27 = arith.constant dense<0.000000e+00> : vector<24x16xf32>
    %29 = tpu.matmul %26, %28, %cst_27 {dimension_numbers = #tpu.dot_dimension_numbers<[1], [0], [0], [1], [0, 0, 1, 1], [], []>} : vector<24x16xbf16>, vector<16x16xbf16>, vector<24x16xf32> -> vector<24x16xf32>
    %30 = arith.addf %24, %29 : vector<24x16xf32>
    %c0_28 = arith.constant 0 : index
    %c8 = arith.constant 8 : index
    %c0_29 = arith.constant 0 : index
    %31 = vector.load %arg1[%c0_28, %c8, %c0_29] : memref<1x52x16xbf16, #tpu.memory_space<vmem>>, vector<1x24x16xbf16>
    %32 = vector.shape_cast %31 : vector<1x24x16xbf16> to vector<24x16xbf16>
    %c5 = arith.constant 5 : index
    %c0_30 = arith.constant 0 : index
    %c0_31 = arith.constant 0 : index
    %33 = vector.load %arg2[%c5, %c0_30, %c0_31] : memref<9x16x16xbf16, #tpu.memory_space<vmem>>, vector<1x16x16xbf16>
    %34 = vector.shape_cast %33 : vector<1x16x16xbf16> to vector<16x16xbf16>
    %cst_32 = arith.constant dense<0.000000e+00> : vector<24x16xf32>
    %35 = tpu.matmul %32, %34, %cst_32 {dimension_numbers = #tpu.dot_dimension_numbers<[1], [0], [0], [1], [0, 0, 1, 1], [], []>} : vector<24x16xbf16>, vector<16x16xbf16>, vector<24x16xf32> -> vector<24x16xf32>
    %36 = arith.addf %30, %35 : vector<24x16xf32>
    %c0_33 = arith.constant 0 : index
    %c12 = arith.constant 12 : index
    %c0_34 = arith.constant 0 : index
    %37 = vector.load %arg1[%c0_33, %c12, %c0_34] : memref<1x52x16xbf16, #tpu.memory_space<vmem>>, vector<1x24x16xbf16>
    %38 = vector.shape_cast %37 : vector<1x24x16xbf16> to vector<24x16xbf16>
    %c6_35 = arith.constant 6 : index
    %c0_36 = arith.constant 0 : index
    %c0_37 = arith.constant 0 : index
    %39 = vector.load %arg2[%c6_35, %c0_36, %c0_37] : memref<9x16x16xbf16, #tpu.memory_space<vmem>>, vector<1x16x16xbf16>
    %40 = vector.shape_cast %39 : vector<1x16x16xbf16> to vector<16x16xbf16>
    %cst_38 = arith.constant dense<0.000000e+00> : vector<24x16xf32>
    %41 = tpu.matmul %38, %40, %cst_38 {dimension_numbers = #tpu.dot_dimension_numbers<[1], [0], [0], [1], [0, 0, 1, 1], [], []>} : vector<24x16xbf16>, vector<16x16xbf16>, vector<24x16xf32> -> vector<24x16xf32>
    %42 = arith.addf %36, %41 : vector<24x16xf32>
    %c0_39 = arith.constant 0 : index
    %c13 = arith.constant 13 : index
    %c0_40 = arith.constant 0 : index
    %43 = vector.load %arg1[%c0_39, %c13, %c0_40] : memref<1x52x16xbf16, #tpu.memory_space<vmem>>, vector<1x24x16xbf16>
    %44 = vector.shape_cast %43 : vector<1x24x16xbf16> to vector<24x16xbf16>
    %c7_41 = arith.constant 7 : index
    %c0_42 = arith.constant 0 : index
    %c0_43 = arith.constant 0 : index
    %45 = vector.load %arg2[%c7_41, %c0_42, %c0_43] : memref<9x16x16xbf16, #tpu.memory_space<vmem>>, vector<1x16x16xbf16>
    %46 = vector.shape_cast %45 : vector<1x16x16xbf16> to vector<16x16xbf16>
    %cst_44 = arith.constant dense<0.000000e+00> : vector<24x16xf32>
    %47 = tpu.matmul %44, %46, %cst_44 {dimension_numbers = #tpu.dot_dimension_numbers<[1], [0], [0], [1], [0, 0, 1, 1], [], []>} : vector<24x16xbf16>, vector<16x16xbf16>, vector<24x16xf32> -> vector<24x16xf32>
    %48 = arith.addf %42, %47 : vector<24x16xf32>
    %c0_45 = arith.constant 0 : index
    %c14 = arith.constant 14 : index
    %c0_46 = arith.constant 0 : index
    %49 = vector.load %arg1[%c0_45, %c14, %c0_46] : memref<1x52x16xbf16, #tpu.memory_space<vmem>>, vector<1x24x16xbf16>
    %50 = vector.shape_cast %49 : vector<1x24x16xbf16> to vector<24x16xbf16>
    %c8_47 = arith.constant 8 : index
    %c0_48 = arith.constant 0 : index
    %c0_49 = arith.constant 0 : index
    %51 = vector.load %arg2[%c8_47, %c0_48, %c0_49] : memref<9x16x16xbf16, #tpu.memory_space<vmem>>, vector<1x16x16xbf16>
    %52 = vector.shape_cast %51 : vector<1x16x16xbf16> to vector<16x16xbf16>
    %cst_50 = arith.constant dense<0.000000e+00> : vector<24x16xf32>
    %53 = tpu.matmul %50, %52, %cst_50 {dimension_numbers = #tpu.dot_dimension_numbers<[1], [0], [0], [1], [0, 0, 1, 1], [], []>} : vector<24x16xbf16>, vector<16x16xbf16>, vector<24x16xf32> -> vector<24x16xf32>
    %54 = arith.addf %48, %53 : vector<24x16xf32>
    %c0_51 = arith.constant 0 : index
    %c0_52 = arith.constant 0 : index
    %55 = vector.load %arg3[%c0_51, %c0_52] : memref<1x16xf32, #tpu.memory_space<vmem>>, vector<1x16xf32>
    %56 = vector.broadcast %55 : vector<1x16xf32> to vector<24x16xf32>
    %57 = arith.addf %54, %56 : vector<24x16xf32>
    %58 = arith.truncf %57 : vector<24x16xf32> to vector<24x16xbf16>
    %c0_53 = arith.constant 0 : index
    %c0_54 = arith.constant 0 : index
    %c0_55 = arith.constant 0 : index
    %59 = vector.load %arg4[%c0_53, %c0_54, %c0_55] : memref<1x24x16xbf16, #tpu.memory_space<vmem>>, vector<1x24x16xbf16>
    %60 = vector.shape_cast %59 : vector<1x24x16xbf16> to vector<24x16xbf16>
    %61 = vector.shape_cast %58 : vector<24x16xbf16> to vector<1x24x16xbf16>
    tpu.vector_store %arg4[%c0_53, %c0_54, %c0_55], %61 {strides = array<i32>} : memref<1x24x16xbf16, #tpu.memory_space<vmem>>, vector<1x24x16xbf16>,
    return
  }
  func.func @transform_0(%arg0: i32) -> (i32, i32, i32) {
    %c0_i32 = arith.constant 0 : i32
    %c0_i32_0 = arith.constant 0 : i32
    %c0_i32_1 = arith.constant 0 : i32
    return %arg0, %c0_i32, %c0_i32_0 : i32, i32, i32
  }
  func.func @transform_1(%arg0: i32) -> (i32, i32, i32) {
    %c0_i32 = arith.constant 0 : i32
    %c0_i32_0 = arith.constant 0 : i32
    %c0_i32_1 = arith.constant 0 : i32
    %c0_i32_2 = arith.constant 0 : i32
    return %c0_i32, %c0_i32_0, %c0_i32_1 : i32, i32, i32
  }
  func.func @transform_2(%arg0: i32) -> (i32, i32) {
    %c0_i32 = arith.constant 0 : i32
    %c0_i32_0 = arith.constant 0 : i32
    %c0_i32_1 = arith.constant 0 : i32
    return %c0_i32, %c0_i32_0 : i32, i32
  }
  func.func @transform_3(%arg0: i32) -> (i32, i32, i32) {
    %c0_i32 = arith.constant 0 : i32
    %c0_i32_0 = arith.constant 0 : i32
    %c0_i32_1 = arith.constant 0 : i32
    return %arg0, %c0_i32, %c0_i32_0 : i32, i32, i32
  }
}

module attributes {stable_mosaic.version = 11 : i64} {
  func.func @kernel(%arg0: i32, %arg1: memref<1x116x16xbf16, #tpu.memory_space<vmem>>, %arg2: memref<9x16x16xbf16, #tpu.memory_space<vmem>>, %arg3: memref<1x16xf32, #tpu.memory_space<vmem>>, %arg4: memref<1x80x16xbf16, #tpu.memory_space<vmem>>) attributes {dimension_semantics = [#tpu.dimension_semantics<parallel>], iteration_bounds = array<i64: 2>, scalar_prefetch = 0 : i64, scratch_operands = 0 : i64, tpu.core_type = #tpu.core_type<tc>, window_params = [{transform_indices = @transform_0, window_bounds = array<i64: 1, 116, 16>}, {pipeline_mode = #tpu.pipeline_mode<synchronous>, transform_indices = @transform_1, window_bounds = array<i64: 9, 16, 16>}, {pipeline_mode = #tpu.pipeline_mode<synchronous>, transform_indices = @transform_2, window_bounds = array<i64: 1, 16>}, {transform_indices = @transform_3, window_bounds = array<i64: 1, 80, 16>}]} {
    %cst = arith.constant 0.000000e+00 : f32
    %0 = vector.broadcast %cst : f32 to vector<80x16xf32>
    %c0 = arith.constant 0 : index
    %c0_0 = arith.constant 0 : index
    %c0_1 = arith.constant 0 : index
    %1 = vector.load %arg1[%c0, %c0_0, %c0_1] : memref<1x116x16xbf16, #tpu.memory_space<vmem>>, vector<1x80x16xbf16>
    %2 = vector.shape_cast %1 : vector<1x80x16xbf16> to vector<80x16xbf16>
    %c0_2 = arith.constant 0 : index
    %c0_3 = arith.constant 0 : index
    %c0_4 = arith.constant 0 : index
    %3 = vector.load %arg2[%c0_2, %c0_3, %c0_4] : memref<9x16x16xbf16, #tpu.memory_space<vmem>>, vector<1x16x16xbf16>
    %4 = vector.shape_cast %3 : vector<1x16x16xbf16> to vector<16x16xbf16>
    %cst_5 = arith.constant dense<0.000000e+00> : vector<80x16xf32>
    %5 = tpu.matmul %2, %4, %cst_5 {dimension_numbers = #tpu.dot_dimension_numbers<[1], [0], [0], [1], [0, 0, 1, 1], [], []>} : vector<80x16xbf16>, vector<16x16xbf16>, vector<80x16xf32> -> vector<80x16xf32>
    %6 = arith.addf %0, %5 : vector<80x16xf32>
    %c0_6 = arith.constant 0 : index
    %c1 = arith.constant 1 : index
    %c0_7 = arith.constant 0 : index
    %7 = vector.load %arg1[%c0_6, %c1, %c0_7] : memref<1x116x16xbf16, #tpu.memory_space<vmem>>, vector<1x80x16xbf16>
    %8 = vector.shape_cast %7 : vector<1x80x16xbf16> to vector<80x16xbf16>
    %c1_8 = arith.constant 1 : index
    %c0_9 = arith.constant 0 : index
    %c0_10 = arith.constant 0 : index
    %9 = vector.load %arg2[%c1_8, %c0_9, %c0_10] : memref<9x16x16xbf16, #tpu.memory_space<vmem>>, vector<1x16x16xbf16>
    %10 = vector.shape_cast %9 : vector<1x16x16xbf16> to vector<16x16xbf16>
    %cst_11 = arith.constant dense<0.000000e+00> : vector<80x16xf32>
    %11 = tpu.matmul %8, %10, %cst_11 {dimension_numbers = #tpu.dot_dimension_numbers<[1], [0], [0], [1], [0, 0, 1, 1], [], []>} : vector<80x16xbf16>, vector<16x16xbf16>, vector<80x16xf32> -> vector<80x16xf32>
    %12 = arith.addf %6, %11 : vector<80x16xf32>
    %c0_12 = arith.constant 0 : index
    %c2 = arith.constant 2 : index
    %c0_13 = arith.constant 0 : index
    %13 = vector.load %arg1[%c0_12, %c2, %c0_13] : memref<1x116x16xbf16, #tpu.memory_space<vmem>>, vector<1x80x16xbf16>
    %14 = vector.shape_cast %13 : vector<1x80x16xbf16> to vector<80x16xbf16>
    %c2_14 = arith.constant 2 : index
    %c0_15 = arith.constant 0 : index
    %c0_16 = arith.constant 0 : index
    %15 = vector.load %arg2[%c2_14, %c0_15, %c0_16] : memref<9x16x16xbf16, #tpu.memory_space<vmem>>, vector<1x16x16xbf16>
    %16 = vector.shape_cast %15 : vector<1x16x16xbf16> to vector<16x16xbf16>
    %cst_17 = arith.constant dense<0.000000e+00> : vector<80x16xf32>
    %17 = tpu.matmul %14, %16, %cst_17 {dimension_numbers = #tpu.dot_dimension_numbers<[1], [0], [0], [1], [0, 0, 1, 1], [], []>} : vector<80x16xbf16>, vector<16x16xbf16>, vector<80x16xf32> -> vector<80x16xf32>
    %18 = arith.addf %12, %17 : vector<80x16xf32>
    %c0_18 = arith.constant 0 : index
    %c10 = arith.constant 10 : index
    %c0_19 = arith.constant 0 : index
    %19 = vector.load %arg1[%c0_18, %c10, %c0_19] : memref<1x116x16xbf16, #tpu.memory_space<vmem>>, vector<1x80x16xbf16>
    %20 = vector.shape_cast %19 : vector<1x80x16xbf16> to vector<80x16xbf16>
    %c3 = arith.constant 3 : index
    %c0_20 = arith.constant 0 : index
    %c0_21 = arith.constant 0 : index
    %21 = vector.load %arg2[%c3, %c0_20, %c0_21] : memref<9x16x16xbf16, #tpu.memory_space<vmem>>, vector<1x16x16xbf16>
    %22 = vector.shape_cast %21 : vector<1x16x16xbf16> to vector<16x16xbf16>
    %cst_22 = arith.constant dense<0.000000e+00> : vector<80x16xf32>
    %23 = tpu.matmul %20, %22, %cst_22 {dimension_numbers = #tpu.dot_dimension_numbers<[1], [0], [0], [1], [0, 0, 1, 1], [], []>} : vector<80x16xbf16>, vector<16x16xbf16>, vector<80x16xf32> -> vector<80x16xf32>
    %24 = arith.addf %18, %23 : vector<80x16xf32>
    %c0_23 = arith.constant 0 : index
    %c11 = arith.constant 11 : index
    %c0_24 = arith.constant 0 : index
    %25 = vector.load %arg1[%c0_23, %c11, %c0_24] : memref<1x116x16xbf16, #tpu.memory_space<vmem>>, vector<1x80x16xbf16>
    %26 = vector.shape_cast %25 : vector<1x80x16xbf16> to vector<80x16xbf16>
    %c4 = arith.constant 4 : index
    %c0_25 = arith.constant 0 : index
    %c0_26 = arith.constant 0 : index
    %27 = vector.load %arg2[%c4, %c0_25, %c0_26] : memref<9x16x16xbf16, #tpu.memory_space<vmem>>, vector<1x16x16xbf16>
    %28 = vector.shape_cast %27 : vector<1x16x16xbf16> to vector<16x16xbf16>
    %cst_27 = arith.constant dense<0.000000e+00> : vector<80x16xf32>
    %29 = tpu.matmul %26, %28, %cst_27 {dimension_numbers = #tpu.dot_dimension_numbers<[1], [0], [0], [1], [0, 0, 1, 1], [], []>} : vector<80x16xbf16>, vector<16x16xbf16>, vector<80x16xf32> -> vector<80x16xf32>
    %30 = arith.addf %24, %29 : vector<80x16xf32>
    %c0_28 = arith.constant 0 : index
    %c12 = arith.constant 12 : index
    %c0_29 = arith.constant 0 : index
    %31 = vector.load %arg1[%c0_28, %c12, %c0_29] : memref<1x116x16xbf16, #tpu.memory_space<vmem>>, vector<1x80x16xbf16>
    %32 = vector.shape_cast %31 : vector<1x80x16xbf16> to vector<80x16xbf16>
    %c5 = arith.constant 5 : index
    %c0_30 = arith.constant 0 : index
    %c0_31 = arith.constant 0 : index
    %33 = vector.load %arg2[%c5, %c0_30, %c0_31] : memref<9x16x16xbf16, #tpu.memory_space<vmem>>, vector<1x16x16xbf16>
    %34 = vector.shape_cast %33 : vector<1x16x16xbf16> to vector<16x16xbf16>
    %cst_32 = arith.constant dense<0.000000e+00> : vector<80x16xf32>
    %35 = tpu.matmul %32, %34, %cst_32 {dimension_numbers = #tpu.dot_dimension_numbers<[1], [0], [0], [1], [0, 0, 1, 1], [], []>} : vector<80x16xbf16>, vector<16x16xbf16>, vector<80x16xf32> -> vector<80x16xf32>
    %36 = arith.addf %30, %35 : vector<80x16xf32>
    %c0_33 = arith.constant 0 : index
    %c20 = arith.constant 20 : index
    %c0_34 = arith.constant 0 : index
    %37 = vector.load %arg1[%c0_33, %c20, %c0_34] : memref<1x116x16xbf16, #tpu.memory_space<vmem>>, vector<1x80x16xbf16>
    %38 = vector.shape_cast %37 : vector<1x80x16xbf16> to vector<80x16xbf16>
    %c6 = arith.constant 6 : index
    %c0_35 = arith.constant 0 : index
    %c0_36 = arith.constant 0 : index
    %39 = vector.load %arg2[%c6, %c0_35, %c0_36] : memref<9x16x16xbf16, #tpu.memory_space<vmem>>, vector<1x16x16xbf16>
    %40 = vector.shape_cast %39 : vector<1x16x16xbf16> to vector<16x16xbf16>
    %cst_37 = arith.constant dense<0.000000e+00> : vector<80x16xf32>
    %41 = tpu.matmul %38, %40, %cst_37 {dimension_numbers = #tpu.dot_dimension_numbers<[1], [0], [0], [1], [0, 0, 1, 1], [], []>} : vector<80x16xbf16>, vector<16x16xbf16>, vector<80x16xf32> -> vector<80x16xf32>
    %42 = arith.addf %36, %41 : vector<80x16xf32>
    %c0_38 = arith.constant 0 : index
    %c21 = arith.constant 21 : index
    %c0_39 = arith.constant 0 : index
    %43 = vector.load %arg1[%c0_38, %c21, %c0_39] : memref<1x116x16xbf16, #tpu.memory_space<vmem>>, vector<1x80x16xbf16>
    %44 = vector.shape_cast %43 : vector<1x80x16xbf16> to vector<80x16xbf16>
    %c7 = arith.constant 7 : index
    %c0_40 = arith.constant 0 : index
    %c0_41 = arith.constant 0 : index
    %45 = vector.load %arg2[%c7, %c0_40, %c0_41] : memref<9x16x16xbf16, #tpu.memory_space<vmem>>, vector<1x16x16xbf16>
    %46 = vector.shape_cast %45 : vector<1x16x16xbf16> to vector<16x16xbf16>
    %cst_42 = arith.constant dense<0.000000e+00> : vector<80x16xf32>
    %47 = tpu.matmul %44, %46, %cst_42 {dimension_numbers = #tpu.dot_dimension_numbers<[1], [0], [0], [1], [0, 0, 1, 1], [], []>} : vector<80x16xbf16>, vector<16x16xbf16>, vector<80x16xf32> -> vector<80x16xf32>
    %48 = arith.addf %42, %47 : vector<80x16xf32>
    %c0_43 = arith.constant 0 : index
    %c22 = arith.constant 22 : index
    %c0_44 = arith.constant 0 : index
    %49 = vector.load %arg1[%c0_43, %c22, %c0_44] : memref<1x116x16xbf16, #tpu.memory_space<vmem>>, vector<1x80x16xbf16>
    %50 = vector.shape_cast %49 : vector<1x80x16xbf16> to vector<80x16xbf16>
    %c8 = arith.constant 8 : index
    %c0_45 = arith.constant 0 : index
    %c0_46 = arith.constant 0 : index
    %51 = vector.load %arg2[%c8, %c0_45, %c0_46] : memref<9x16x16xbf16, #tpu.memory_space<vmem>>, vector<1x16x16xbf16>
    %52 = vector.shape_cast %51 : vector<1x16x16xbf16> to vector<16x16xbf16>
    %cst_47 = arith.constant dense<0.000000e+00> : vector<80x16xf32>
    %53 = tpu.matmul %50, %52, %cst_47 {dimension_numbers = #tpu.dot_dimension_numbers<[1], [0], [0], [1], [0, 0, 1, 1], [], []>} : vector<80x16xbf16>, vector<16x16xbf16>, vector<80x16xf32> -> vector<80x16xf32>
    %54 = arith.addf %48, %53 : vector<80x16xf32>
    %c0_48 = arith.constant 0 : index
    %c0_49 = arith.constant 0 : index
    %55 = vector.load %arg3[%c0_48, %c0_49] : memref<1x16xf32, #tpu.memory_space<vmem>>, vector<1x16xf32>
    %56 = vector.broadcast %55 : vector<1x16xf32> to vector<80x16xf32>
    %57 = arith.addf %54, %56 : vector<80x16xf32>
    %58 = arith.truncf %57 : vector<80x16xf32> to vector<80x16xbf16>
    %c0_50 = arith.constant 0 : index
    %c0_51 = arith.constant 0 : index
    %c0_52 = arith.constant 0 : index
    %59 = vector.load %arg4[%c0_50, %c0_51, %c0_52] : memref<1x80x16xbf16, #tpu.memory_space<vmem>>, vector<1x80x16xbf16>
    %60 = vector.shape_cast %59 : vector<1x80x16xbf16> to vector<80x16xbf16>
    %61 = vector.shape_cast %58 : vector<80x16xbf16> to vector<1x80x16xbf16>
    tpu.vector_store %arg4[%c0_50, %c0_51, %c0_52], %61 {strides = array<i32>} : memref<1x80x16xbf16, #tpu.memory_space<vmem>>, vector<1x80x16xbf16>,
    return
  }
  func.func @transform_0(%arg0: i32) -> (i32, i32, i32) {
    %c0_i32 = arith.constant 0 : i32
    %c0_i32_0 = arith.constant 0 : i32
    %c0_i32_1 = arith.constant 0 : i32
    return %arg0, %c0_i32, %c0_i32_0 : i32, i32, i32
  }
  func.func @transform_1(%arg0: i32) -> (i32, i32, i32) {
    %c0_i32 = arith.constant 0 : i32
    %c0_i32_0 = arith.constant 0 : i32
    %c0_i32_1 = arith.constant 0 : i32
    %c0_i32_2 = arith.constant 0 : i32
    return %c0_i32, %c0_i32_0, %c0_i32_1 : i32, i32, i32
  }
  func.func @transform_2(%arg0: i32) -> (i32, i32) {
    %c0_i32 = arith.constant 0 : i32
    %c0_i32_0 = arith.constant 0 : i32
    %c0_i32_1 = arith.constant 0 : i32
    return %c0_i32, %c0_i32_0 : i32, i32
  }
  func.func @transform_3(%arg0: i32) -> (i32, i32, i32) {
    %c0_i32 = arith.constant 0 : i32
    %c0_i32_0 = arith.constant 0 : i32
    %c0_i32_1 = arith.constant 0 : i32
    return %arg0, %c0_i32, %c0_i32_0 : i32, i32, i32
  }
}

module attributes {stable_mosaic.version = 11 : i64} {
  func.func @kernel(%arg0: i32, %arg1: memref<1x340x16xbf16, #tpu.memory_space<vmem>>, %arg2: memref<9x16x16xbf16, #tpu.memory_space<vmem>>, %arg3: memref<1x16xf32, #tpu.memory_space<vmem>>, %arg4: memref<1x288x16xbf16, #tpu.memory_space<vmem>>) attributes {dimension_semantics = [#tpu.dimension_semantics<parallel>], iteration_bounds = array<i64: 2>, scalar_prefetch = 0 : i64, scratch_operands = 0 : i64, tpu.core_type = #tpu.core_type<tc>, window_params = [{transform_indices = @transform_0, window_bounds = array<i64: 1, 340, 16>}, {pipeline_mode = #tpu.pipeline_mode<synchronous>, transform_indices = @transform_1, window_bounds = array<i64: 9, 16, 16>}, {pipeline_mode = #tpu.pipeline_mode<synchronous>, transform_indices = @transform_2, window_bounds = array<i64: 1, 16>}, {transform_indices = @transform_3, window_bounds = array<i64: 1, 288, 16>}]} {
    %cst = arith.constant 0.000000e+00 : f32
    %0 = vector.broadcast %cst : f32 to vector<288x16xf32>
    %c0 = arith.constant 0 : index
    %c0_0 = arith.constant 0 : index
    %c0_1 = arith.constant 0 : index
    %1 = vector.load %arg1[%c0, %c0_0, %c0_1] : memref<1x340x16xbf16, #tpu.memory_space<vmem>>, vector<1x288x16xbf16>
    %2 = vector.shape_cast %1 : vector<1x288x16xbf16> to vector<288x16xbf16>
    %c0_2 = arith.constant 0 : index
    %c0_3 = arith.constant 0 : index
    %c0_4 = arith.constant 0 : index
    %3 = vector.load %arg2[%c0_2, %c0_3, %c0_4] : memref<9x16x16xbf16, #tpu.memory_space<vmem>>, vector<1x16x16xbf16>
    %4 = vector.shape_cast %3 : vector<1x16x16xbf16> to vector<16x16xbf16>
    %cst_5 = arith.constant dense<0.000000e+00> : vector<288x16xf32>
    %5 = tpu.matmul %2, %4, %cst_5 {dimension_numbers = #tpu.dot_dimension_numbers<[1], [0], [0], [1], [0, 0, 1, 1], [], []>} : vector<288x16xbf16>, vector<16x16xbf16>, vector<288x16xf32> -> vector<288x16xf32>
    %6 = arith.addf %0, %5 : vector<288x16xf32>
    %c0_6 = arith.constant 0 : index
    %c1 = arith.constant 1 : index
    %c0_7 = arith.constant 0 : index
    %7 = vector.load %arg1[%c0_6, %c1, %c0_7] : memref<1x340x16xbf16, #tpu.memory_space<vmem>>, vector<1x288x16xbf16>
    %8 = vector.shape_cast %7 : vector<1x288x16xbf16> to vector<288x16xbf16>
    %c1_8 = arith.constant 1 : index
    %c0_9 = arith.constant 0 : index
    %c0_10 = arith.constant 0 : index
    %9 = vector.load %arg2[%c1_8, %c0_9, %c0_10] : memref<9x16x16xbf16, #tpu.memory_space<vmem>>, vector<1x16x16xbf16>
    %10 = vector.shape_cast %9 : vector<1x16x16xbf16> to vector<16x16xbf16>
    %cst_11 = arith.constant dense<0.000000e+00> : vector<288x16xf32>
    %11 = tpu.matmul %8, %10, %cst_11 {dimension_numbers = #tpu.dot_dimension_numbers<[1], [0], [0], [1], [0, 0, 1, 1], [], []>} : vector<288x16xbf16>, vector<16x16xbf16>, vector<288x16xf32> -> vector<288x16xf32>
    %12 = arith.addf %6, %11 : vector<288x16xf32>
    %c0_12 = arith.constant 0 : index
    %c2 = arith.constant 2 : index
    %c0_13 = arith.constant 0 : index
    %13 = vector.load %arg1[%c0_12, %c2, %c0_13] : memref<1x340x16xbf16, #tpu.memory_space<vmem>>, vector<1x288x16xbf16>
    %14 = vector.shape_cast %13 : vector<1x288x16xbf16> to vector<288x16xbf16>
    %c2_14 = arith.constant 2 : index
    %c0_15 = arith.constant 0 : index
    %c0_16 = arith.constant 0 : index
    %15 = vector.load %arg2[%c2_14, %c0_15, %c0_16] : memref<9x16x16xbf16, #tpu.memory_space<vmem>>, vector<1x16x16xbf16>
    %16 = vector.shape_cast %15 : vector<1x16x16xbf16> to vector<16x16xbf16>
    %cst_17 = arith.constant dense<0.000000e+00> : vector<288x16xf32>
    %17 = tpu.matmul %14, %16, %cst_17 {dimension_numbers = #tpu.dot_dimension_numbers<[1], [0], [0], [1], [0, 0, 1, 1], [], []>} : vector<288x16xbf16>, vector<16x16xbf16>, vector<288x16xf32> -> vector<288x16xf32>
    %18 = arith.addf %12, %17 : vector<288x16xf32>
    %c0_18 = arith.constant 0 : index
    %c18 = arith.constant 18 : index
    %c0_19 = arith.constant 0 : index
    %19 = vector.load %arg1[%c0_18, %c18, %c0_19] : memref<1x340x16xbf16, #tpu.memory_space<vmem>>, vector<1x288x16xbf16>
    %20 = vector.shape_cast %19 : vector<1x288x16xbf16> to vector<288x16xbf16>
    %c3 = arith.constant 3 : index
    %c0_20 = arith.constant 0 : index
    %c0_21 = arith.constant 0 : index
    %21 = vector.load %arg2[%c3, %c0_20, %c0_21] : memref<9x16x16xbf16, #tpu.memory_space<vmem>>, vector<1x16x16xbf16>
    %22 = vector.shape_cast %21 : vector<1x16x16xbf16> to vector<16x16xbf16>
    %cst_22 = arith.constant dense<0.000000e+00> : vector<288x16xf32>
    %23 = tpu.matmul %20, %22, %cst_22 {dimension_numbers = #tpu.dot_dimension_numbers<[1], [0], [0], [1], [0, 0, 1, 1], [], []>} : vector<288x16xbf16>, vector<16x16xbf16>, vector<288x16xf32> -> vector<288x16xf32>
    %24 = arith.addf %18, %23 : vector<288x16xf32>
    %c0_23 = arith.constant 0 : index
    %c19 = arith.constant 19 : index
    %c0_24 = arith.constant 0 : index
    %25 = vector.load %arg1[%c0_23, %c19, %c0_24] : memref<1x340x16xbf16, #tpu.memory_space<vmem>>, vector<1x288x16xbf16>
    %26 = vector.shape_cast %25 : vector<1x288x16xbf16> to vector<288x16xbf16>
    %c4 = arith.constant 4 : index
    %c0_25 = arith.constant 0 : index
    %c0_26 = arith.constant 0 : index
    %27 = vector.load %arg2[%c4, %c0_25, %c0_26] : memref<9x16x16xbf16, #tpu.memory_space<vmem>>, vector<1x16x16xbf16>
    %28 = vector.shape_cast %27 : vector<1x16x16xbf16> to vector<16x16xbf16>
    %cst_27 = arith.constant dense<0.000000e+00> : vector<288x16xf32>
    %29 = tpu.matmul %26, %28, %cst_27 {dimension_numbers = #tpu.dot_dimension_numbers<[1], [0], [0], [1], [0, 0, 1, 1], [], []>} : vector<288x16xbf16>, vector<16x16xbf16>, vector<288x16xf32> -> vector<288x16xf32>
    %30 = arith.addf %24, %29 : vector<288x16xf32>
    %c0_28 = arith.constant 0 : index
    %c20 = arith.constant 20 : index
    %c0_29 = arith.constant 0 : index
    %31 = vector.load %arg1[%c0_28, %c20, %c0_29] : memref<1x340x16xbf16, #tpu.memory_space<vmem>>, vector<1x288x16xbf16>
    %32 = vector.shape_cast %31 : vector<1x288x16xbf16> to vector<288x16xbf16>
    %c5 = arith.constant 5 : index
    %c0_30 = arith.constant 0 : index
    %c0_31 = arith.constant 0 : index
    %33 = vector.load %arg2[%c5, %c0_30, %c0_31] : memref<9x16x16xbf16, #tpu.memory_space<vmem>>, vector<1x16x16xbf16>
    %34 = vector.shape_cast %33 : vector<1x16x16xbf16> to vector<16x16xbf16>
    %cst_32 = arith.constant dense<0.000000e+00> : vector<288x16xf32>
    %35 = tpu.matmul %32, %34, %cst_32 {dimension_numbers = #tpu.dot_dimension_numbers<[1], [0], [0], [1], [0, 0, 1, 1], [], []>} : vector<288x16xbf16>, vector<16x16xbf16>, vector<288x16xf32> -> vector<288x16xf32>
    %36 = arith.addf %30, %35 : vector<288x16xf32>
    %c0_33 = arith.constant 0 : index
    %c36 = arith.constant 36 : index
    %c0_34 = arith.constant 0 : index
    %37 = vector.load %arg1[%c0_33, %c36, %c0_34] : memref<1x340x16xbf16, #tpu.memory_space<vmem>>, vector<1x288x16xbf16>
    %38 = vector.shape_cast %37 : vector<1x288x16xbf16> to vector<288x16xbf16>
    %c6 = arith.constant 6 : index
    %c0_35 = arith.constant 0 : index
    %c0_36 = arith.constant 0 : index
    %39 = vector.load %arg2[%c6, %c0_35, %c0_36] : memref<9x16x16xbf16, #tpu.memory_space<vmem>>, vector<1x16x16xbf16>
    %40 = vector.shape_cast %39 : vector<1x16x16xbf16> to vector<16x16xbf16>
    %cst_37 = arith.constant dense<0.000000e+00> : vector<288x16xf32>
    %41 = tpu.matmul %38, %40, %cst_37 {dimension_numbers = #tpu.dot_dimension_numbers<[1], [0], [0], [1], [0, 0, 1, 1], [], []>} : vector<288x16xbf16>, vector<16x16xbf16>, vector<288x16xf32> -> vector<288x16xf32>
    %42 = arith.addf %36, %41 : vector<288x16xf32>
    %c0_38 = arith.constant 0 : index
    %c37 = arith.constant 37 : index
    %c0_39 = arith.constant 0 : index
    %43 = vector.load %arg1[%c0_38, %c37, %c0_39] : memref<1x340x16xbf16, #tpu.memory_space<vmem>>, vector<1x288x16xbf16>
    %44 = vector.shape_cast %43 : vector<1x288x16xbf16> to vector<288x16xbf16>
    %c7 = arith.constant 7 : index
    %c0_40 = arith.constant 0 : index
    %c0_41 = arith.constant 0 : index
    %45 = vector.load %arg2[%c7, %c0_40, %c0_41] : memref<9x16x16xbf16, #tpu.memory_space<vmem>>, vector<1x16x16xbf16>
    %46 = vector.shape_cast %45 : vector<1x16x16xbf16> to vector<16x16xbf16>
    %cst_42 = arith.constant dense<0.000000e+00> : vector<288x16xf32>
    %47 = tpu.matmul %44, %46, %cst_42 {dimension_numbers = #tpu.dot_dimension_numbers<[1], [0], [0], [1], [0, 0, 1, 1], [], []>} : vector<288x16xbf16>, vector<16x16xbf16>, vector<288x16xf32> -> vector<288x16xf32>
    %48 = arith.addf %42, %47 : vector<288x16xf32>
    %c0_43 = arith.constant 0 : index
    %c38 = arith.constant 38 : index
    %c0_44 = arith.constant 0 : index
    %49 = vector.load %arg1[%c0_43, %c38, %c0_44] : memref<1x340x16xbf16, #tpu.memory_space<vmem>>, vector<1x288x16xbf16>
    %50 = vector.shape_cast %49 : vector<1x288x16xbf16> to vector<288x16xbf16>
    %c8 = arith.constant 8 : index
    %c0_45 = arith.constant 0 : index
    %c0_46 = arith.constant 0 : index
    %51 = vector.load %arg2[%c8, %c0_45, %c0_46] : memref<9x16x16xbf16, #tpu.memory_space<vmem>>, vector<1x16x16xbf16>
    %52 = vector.shape_cast %51 : vector<1x16x16xbf16> to vector<16x16xbf16>
    %cst_47 = arith.constant dense<0.000000e+00> : vector<288x16xf32>
    %53 = tpu.matmul %50, %52, %cst_47 {dimension_numbers = #tpu.dot_dimension_numbers<[1], [0], [0], [1], [0, 0, 1, 1], [], []>} : vector<288x16xbf16>, vector<16x16xbf16>, vector<288x16xf32> -> vector<288x16xf32>
    %54 = arith.addf %48, %53 : vector<288x16xf32>
    %c0_48 = arith.constant 0 : index
    %c0_49 = arith.constant 0 : index
    %55 = vector.load %arg3[%c0_48, %c0_49] : memref<1x16xf32, #tpu.memory_space<vmem>>, vector<1x16xf32>
    %56 = vector.broadcast %55 : vector<1x16xf32> to vector<288x16xf32>
    %57 = arith.addf %54, %56 : vector<288x16xf32>
    %58 = arith.truncf %57 : vector<288x16xf32> to vector<288x16xbf16>
    %c0_50 = arith.constant 0 : index
    %c0_51 = arith.constant 0 : index
    %c0_52 = arith.constant 0 : index
    %59 = vector.load %arg4[%c0_50, %c0_51, %c0_52] : memref<1x288x16xbf16, #tpu.memory_space<vmem>>, vector<1x288x16xbf16>
    %60 = vector.shape_cast %59 : vector<1x288x16xbf16> to vector<288x16xbf16>
    %61 = vector.shape_cast %58 : vector<288x16xbf16> to vector<1x288x16xbf16>
    tpu.vector_store %arg4[%c0_50, %c0_51, %c0_52], %61 {strides = array<i32>} : memref<1x288x16xbf16, #tpu.memory_space<vmem>>, vector<1x288x16xbf16>,
    return
  }
  func.func @transform_0(%arg0: i32) -> (i32, i32, i32) {
    %c0_i32 = arith.constant 0 : i32
    %c0_i32_0 = arith.constant 0 : i32
    %c0_i32_1 = arith.constant 0 : i32
    return %arg0, %c0_i32, %c0_i32_0 : i32, i32, i32
  }
  func.func @transform_1(%arg0: i32) -> (i32, i32, i32) {
    %c0_i32 = arith.constant 0 : i32
    %c0_i32_0 = arith.constant 0 : i32
    %c0_i32_1 = arith.constant 0 : i32
    %c0_i32_2 = arith.constant 0 : i32
    return %c0_i32, %c0_i32_0, %c0_i32_1 : i32, i32, i32
  }
  func.func @transform_2(%arg0: i32) -> (i32, i32) {
    %c0_i32 = arith.constant 0 : i32
    %c0_i32_0 = arith.constant 0 : i32
    %c0_i32_1 = arith.constant 0 : i32
    return %c0_i32, %c0_i32_0 : i32, i32
  }
  func.func @transform_3(%arg0: i32) -> (i32, i32, i32) {
    %c0_i32 = arith.constant 0 : i32
    %c0_i32_0 = arith.constant 0 : i32
    %c0_i32_1 = arith.constant 0 : i32
    return %arg0, %c0_i32, %c0_i32_0 : i32, i32, i32
  }
}

module attributes {stable_mosaic.version = 11 : i64} {
  func.func @kernel(%arg0: i32, %arg1: i32, %arg2: i32, %arg3: memref<384x144xbf16, #tpu.memory_space<vmem>>, %arg4: memref<144x128xbf16, #tpu.memory_space<vmem>>, %arg5: memref<1x128xf32, #tpu.memory_space<vmem>>, %arg6: memref<384x128xbf16, #tpu.memory_space<vmem>>, %arg7: memref<384x128xf32, #tpu.memory_space<vmem>>) attributes {dimension_semantics = [#tpu.dimension_semantics<parallel>, #tpu.dimension_semantics<parallel>, #tpu.dimension_semantics<arbitrary>], iteration_bounds = array<i64: 2, 1, 1>, scalar_prefetch = 0 : i64, scratch_operands = 1 : i64, tpu.core_type = #tpu.core_type<tc>, window_params = [{transform_indices = @transform_0, window_bounds = array<i64: 384, 144>}, {transform_indices = @transform_1, window_bounds = array<i64: 144, 128>}, {transform_indices = @transform_2, window_bounds = array<i64: 1, 128>}, {transform_indices = @transform_3, window_bounds = array<i64: 384, 128>}]} {
    %c0_i32 = arith.constant 0 : i32
    %0 = arith.cmpi eq, %arg2, %c0_i32 : i32
    %1 = arith.extui %0 : i1 to i32
    %c0_i32_0 = arith.constant 0 : i32
    %2 = arith.cmpi ne, %1, %c0_i32_0 : i32
    scf.if %2 {
      %cst_10 = arith.constant 0.000000e+00 : f32
      %12 = vector.broadcast %cst_10 : f32 to vector<384x128xf32>
      %c0_11 = arith.constant 0 : index
      %c0_12 = arith.constant 0 : index
      %13 = vector.load %arg7[%c0_11, %c0_12] : memref<384x128xf32, #tpu.memory_space<vmem>>, vector<384x128xf32>
      tpu.vector_store %arg7[%c0_11, %c0_12], %12 {strides = array<i32>} : memref<384x128xf32, #tpu.memory_space<vmem>>, vector<384x128xf32>,
    } else {
    }
    %c0 = arith.constant 0 : index
    %c0_1 = arith.constant 0 : index
    %3 = vector.load %arg7[%c0, %c0_1] : memref<384x128xf32, #tpu.memory_space<vmem>>, vector<384x128xf32>
    %c0_2 = arith.constant 0 : index
    %c0_3 = arith.constant 0 : index
    %4 = vector.load %arg3[%c0_2, %c0_3] : memref<384x144xbf16, #tpu.memory_space<vmem>>, vector<384x144xbf16>
    %c0_4 = arith.constant 0 : index
    %c0_5 = arith.constant 0 : index
    %5 = vector.load %arg4[%c0_4, %c0_5] : memref<144x128xbf16, #tpu.memory_space<vmem>>, vector<144x128xbf16>
    %cst = arith.constant dense<0.000000e+00> : vector<384x128xf32>
    %6 = tpu.matmul %4, %5, %cst {dimension_numbers = #tpu.dot_dimension_numbers<[1], [0], [0], [1], [0, 0, 1, 1], [], []>} : vector<384x144xbf16>, vector<144x128xbf16>, vector<384x128xf32> -> vector<384x128xf32>
    %7 = arith.addf %3, %6 : vector<384x128xf32>
    %c0_6 = arith.constant 0 : index
    %c0_7 = arith.constant 0 : index
    %8 = vector.load %arg7[%c0_6, %c0_7] : memref<384x128xf32, #tpu.memory_space<vmem>>, vector<384x128xf32>
    tpu.vector_store %arg7[%c0_6, %c0_7], %7 {strides = array<i32>} : memref<384x128xf32, #tpu.memory_space<vmem>>, vector<384x128xf32>,
    %c0_i32_8 = arith.constant 0 : i32
    %9 = arith.cmpi eq, %arg2, %c0_i32_8 : i32
    %10 = arith.extui %9 : i1 to i32
    %c0_i32_9 = arith.constant 0 : i32
    %11 = arith.cmpi ne, %10, %c0_i32_9 : i32
    scf.if %11 {
      %c0_10 = arith.constant 0 : index
      %c0_11 = arith.constant 0 : index
      %12 = vector.load %arg7[%c0_10, %c0_11] : memref<384x128xf32, #tpu.memory_space<vmem>>, vector<384x128xf32>
      %c0_12 = arith.constant 0 : index
      %c0_13 = arith.constant 0 : index
      %13 = vector.load %arg5[%c0_12, %c0_13] : memref<1x128xf32, #tpu.memory_space<vmem>>, vector<1x128xf32>
      %14 = vector.broadcast %13 : vector<1x128xf32> to vector<384x128xf32>
      %15 = arith.addf %12, %14 : vector<384x128xf32>
      %cst_14 = arith.constant 0.000000e+00 : f32
      %16 = vector.broadcast %cst_14 : f32 to vector<384x128xf32>
      %17 = arith.maximumf %15, %16 : vector<384x128xf32>
      %18 = arith.truncf %17 : vector<384x128xf32> to vector<384x128xbf16>
      %c0_15 = arith.constant 0 : index
      %c0_16 = arith.constant 0 : index
      %19 = vector.load %arg6[%c0_15, %c0_16] : memref<384x128xbf16, #tpu.memory_space<vmem>>, vector<384x128xbf16>
      tpu.vector_store %arg6[%c0_15, %c0_16], %18 {strides = array<i32>} : memref<384x128xbf16, #tpu.memory_space<vmem>>, vector<384x128xbf16>,
    } else {
    }
    return
  }
  func.func @transform_0(%arg0: i32, %arg1: i32, %arg2: i32) -> (i32, i32) {
    %c0_i32 = arith.constant 0 : i32
    return %arg0, %arg2 : i32, i32
  }
  func.func @transform_1(%arg0: i32, %arg1: i32, %arg2: i32) -> (i32, i32) {
    %c0_i32 = arith.constant 0 : i32
    return %arg2, %arg1 : i32, i32
  }
  func.func @transform_2(%arg0: i32, %arg1: i32, %arg2: i32) -> (i32, i32) {
    %c0_i32 = arith.constant 0 : i32
    %c0_i32_0 = arith.constant 0 : i32
    return %c0_i32, %arg1 : i32, i32
  }
  func.func @transform_3(%arg0: i32, %arg1: i32, %arg2: i32) -> (i32, i32) {
    %c0_i32 = arith.constant 0 : i32
    return %arg0, %arg1 : i32, i32
  }
}

module attributes {stable_mosaic.version = 11 : i64} {
  func.func @kernel(%arg0: i32, %arg1: i32, %arg2: i32, %arg3: memref<384x144xbf16, #tpu.memory_space<vmem>>, %arg4: memref<144x128xbf16, #tpu.memory_space<vmem>>, %arg5: memref<1x128xf32, #tpu.memory_space<vmem>>, %arg6: memref<384x128xf32, #tpu.memory_space<vmem>>, %arg7: memref<384x128xf32, #tpu.memory_space<vmem>>) attributes {dimension_semantics = [#tpu.dimension_semantics<parallel>, #tpu.dimension_semantics<parallel>, #tpu.dimension_semantics<arbitrary>], iteration_bounds = array<i64: 2, 1, 1>, scalar_prefetch = 0 : i64, scratch_operands = 1 : i64, tpu.core_type = #tpu.core_type<tc>, window_params = [{transform_indices = @transform_0, window_bounds = array<i64: 384, 144>}, {transform_indices = @transform_1, window_bounds = array<i64: 144, 128>}, {transform_indices = @transform_2, window_bounds = array<i64: 1, 128>}, {transform_indices = @transform_3, window_bounds = array<i64: 384, 128>}]} {
    %c0_i32 = arith.constant 0 : i32
    %0 = arith.cmpi eq, %arg2, %c0_i32 : i32
    %1 = arith.extui %0 : i1 to i32
    %c0_i32_0 = arith.constant 0 : i32
    %2 = arith.cmpi ne, %1, %c0_i32_0 : i32
    scf.if %2 {
      %cst_10 = arith.constant 0.000000e+00 : f32
      %12 = vector.broadcast %cst_10 : f32 to vector<384x128xf32>
      %c0_11 = arith.constant 0 : index
      %c0_12 = arith.constant 0 : index
      %13 = vector.load %arg7[%c0_11, %c0_12] : memref<384x128xf32, #tpu.memory_space<vmem>>, vector<384x128xf32>
      tpu.vector_store %arg7[%c0_11, %c0_12], %12 {strides = array<i32>} : memref<384x128xf32, #tpu.memory_space<vmem>>, vector<384x128xf32>,
    } else {
    }
    %c0 = arith.constant 0 : index
    %c0_1 = arith.constant 0 : index
    %3 = vector.load %arg7[%c0, %c0_1] : memref<384x128xf32, #tpu.memory_space<vmem>>, vector<384x128xf32>
    %c0_2 = arith.constant 0 : index
    %c0_3 = arith.constant 0 : index
    %4 = vector.load %arg3[%c0_2, %c0_3] : memref<384x144xbf16, #tpu.memory_space<vmem>>, vector<384x144xbf16>
    %c0_4 = arith.constant 0 : index
    %c0_5 = arith.constant 0 : index
    %5 = vector.load %arg4[%c0_4, %c0_5] : memref<144x128xbf16, #tpu.memory_space<vmem>>, vector<144x128xbf16>
    %cst = arith.constant dense<0.000000e+00> : vector<384x128xf32>
    %6 = tpu.matmul %4, %5, %cst {dimension_numbers = #tpu.dot_dimension_numbers<[1], [0], [0], [1], [0, 0, 1, 1], [], []>} : vector<384x144xbf16>, vector<144x128xbf16>, vector<384x128xf32> -> vector<384x128xf32>
    %7 = arith.addf %3, %6 : vector<384x128xf32>
    %c0_6 = arith.constant 0 : index
    %c0_7 = arith.constant 0 : index
    %8 = vector.load %arg7[%c0_6, %c0_7] : memref<384x128xf32, #tpu.memory_space<vmem>>, vector<384x128xf32>
    tpu.vector_store %arg7[%c0_6, %c0_7], %7 {strides = array<i32>} : memref<384x128xf32, #tpu.memory_space<vmem>>, vector<384x128xf32>,
    %c0_i32_8 = arith.constant 0 : i32
    %9 = arith.cmpi eq, %arg2, %c0_i32_8 : i32
    %10 = arith.extui %9 : i1 to i32
    %c0_i32_9 = arith.constant 0 : i32
    %11 = arith.cmpi ne, %10, %c0_i32_9 : i32
    scf.if %11 {
      %c0_10 = arith.constant 0 : index
      %c0_11 = arith.constant 0 : index
      %12 = vector.load %arg7[%c0_10, %c0_11] : memref<384x128xf32, #tpu.memory_space<vmem>>, vector<384x128xf32>
      %c0_12 = arith.constant 0 : index
      %c0_13 = arith.constant 0 : index
      %13 = vector.load %arg5[%c0_12, %c0_13] : memref<1x128xf32, #tpu.memory_space<vmem>>, vector<1x128xf32>
      %14 = vector.broadcast %13 : vector<1x128xf32> to vector<384x128xf32>
      %15 = arith.addf %12, %14 : vector<384x128xf32>
      %c0_14 = arith.constant 0 : index
      %c0_15 = arith.constant 0 : index
      %16 = vector.load %arg6[%c0_14, %c0_15] : memref<384x128xf32, #tpu.memory_space<vmem>>, vector<384x128xf32>
      tpu.vector_store %arg6[%c0_14, %c0_15], %15 {strides = array<i32>} : memref<384x128xf32, #tpu.memory_space<vmem>>, vector<384x128xf32>,
    } else {
    }
    return
  }
  func.func @transform_0(%arg0: i32, %arg1: i32, %arg2: i32) -> (i32, i32) {
    %c0_i32 = arith.constant 0 : i32
    return %arg0, %arg2 : i32, i32
  }
  func.func @transform_1(%arg0: i32, %arg1: i32, %arg2: i32) -> (i32, i32) {
    %c0_i32 = arith.constant 0 : i32
    return %arg2, %arg1 : i32, i32
  }
  func.func @transform_2(%arg0: i32, %arg1: i32, %arg2: i32) -> (i32, i32) {
    %c0_i32 = arith.constant 0 : i32
    %c0_i32_0 = arith.constant 0 : i32
    return %c0_i32, %arg1 : i32, i32
  }
  func.func @transform_3(%arg0: i32, %arg1: i32, %arg2: i32) -> (i32, i32) {
    %c0_i32 = arith.constant 0 : i32
    return %arg0, %arg1 : i32, i32
  }
}

</mosaic_0001>

<bundles_post_ra>
// kernel: retinanet_forward.15
= control target key start
LH: loop header
LB: loop body
LE: loop exit
PB: predicated region body
PF: predicated region fallthrough
CT: control target
= control target key end

     0   :  { %vm407_vm0 = vcmask 588800   ;;  %vm504_vm1 = vcmask 1043456   ;;  %s1753_s1 = inlined_call_operand.vmem [shape: bf16[72,128], index: 1, kind: input, shape index: {}]   ;;  %s1754_s0 = inlined_call_operand.vmem [shape: bf16[512,72], index: 0, kind: input, shape index: {}]   ;;  %s1755_s2 = inlined_call_operand.vmem [shape: f32[1,128], index: 2, kind: input, shape index: {}]   ;;  %s1756_s3 = inlined_call_operand.vmem [shape: bf16[512,128], index: 3, kind: output, shape index: {}]  }
   0x1   :  { %v1388_v0 = vld [vmem:[%s1753_s1] sm:$0xff]   ;;  %v1389_v1 = vld [vmem:[%s1753_s1 + $0x8] sm:$0xff]   ;;  %v1390_v2 = vld [vmem:[%s1753_s1 + $0x10] sm:$0xff]  }
   0x2   :  { %1302 = vmatprep.subr.bf16.mxu0 %v1388_v0  ;;  %1376 = vmatprep.subr.bf16.mxu1 %v1388_v0  ;;  %v1393_v3 = vld [vmem:[%s1754_s0] sm:$0xff]   ;;  %v1391_v5 = vld [vmem:[%s1753_s1 + $0x18] sm:$0xff]   ;;  %v1395_v8 = vld [vmem:[%s1754_s0 + $0x8] sm:$0xff]  }
   0x3   :  { %1303 = vmatpush3.bf16.msra.mxu0 %v1388_v0  ;;  %1381 = vmatpush3.bf16.msra.mxu1 %v1388_v0  ;;  %v1394_v4 = vld [vmem:[%s1754_s0 + $0x80] sm:$0xff]   ;;  %v1396_v9 = vld [vmem:[%s1754_s0 + $0x88] sm:$0xff]   ;;  %v1397_v10 = vld [vmem:[%s1754_s0 + $0x10] sm:$0xff]  }
   0x4   :  { %1304 = vmatprep.subr.bf16.mxu0 %v1389_v1  ;;  %1377 = vmatprep.subr.bf16.mxu1 %v1389_v1  ;;  %v1392_v6 = vld [vmem:[%s1753_s1 + $0x20] ss:$0 sps:$4 sm:$0xff]   ;;  %v1398_v11 = vld [vmem:[%s1754_s0 + $0x90] sm:$0xff]   ;;  %v1399_v12 = vld [vmem:[%s1754_s0 + $0x18] sm:$0xff]  }
   0x5   :  { %1312 = vmatprep.mubr.msk.bf16.mxu0 %vm407_vm0, %v1393_v3  ;;  %1344 = vmatprep.mubr.msk.bf16.mxu1 %vm407_vm0, %v1394_v4  ;;  %v506_v7 = vsel %vm504_vm1, %v1392_v6, 0  ;;  %v1400_v13 = vld [vmem:[%s1754_s0 + $0x98] sm:$0xff]   ;;  %v1401_v14 = vld [vmem:[%s1754_s0 + $0x20] sm:$0xff]   ;;  %v1403_v16 = vld [vmem:[%s1754_s0 + $0x28] sm:$0xff]  }
   0x6   :  { %v1402_v15 = vld [vmem:[%s1754_s0 + $0xa0] sm:$0xff]   ;;  %v1404_v17 = vld [vmem:[%s1754_s0 + $0xa8] sm:$0xff]   ;;  %v1405_v18 = vld [vmem:[%s1754_s0 + $0x30] sm:$0xff]  }
   0x7   :  { %1305 = vmatpush3.bf16.msra.mxu0 %v1389_v1  ;;  %1382 = vmatpush3.bf16.msra.mxu1 %v1389_v1  ;;  %v1406_v19 = vld [vmem:[%s1754_s0 + $0xb0] sm:$0xff]   ;;  %v1407_v20 = vld [vmem:[%s1754_s0 + $0x38] sm:$0xff]   ;;  %v1409_v22 = vld [vmem:[%s1754_s0 + $0x40] sm:$0xff]  }
   0x8   :  { %1306 = vmatprep.subr.bf16.mxu0 %v1390_v2  ;;  %1378 = vmatprep.subr.bf16.mxu1 %v1390_v2  ;;  %v1408_v21 = vld [vmem:[%s1754_s0 + $0xb8] sm:$0xff]   ;;  %v1410_v23 = vld [vmem:[%s1754_s0 + $0xc0] sm:$0xff]   ;;  %v1411_v24 = vld [vmem:[%s1754_s0 + $0x48] sm:$0xff]  }
   0x9   :  { %v1412_v25 = vld [vmem:[%s1754_s0 + $0xc8] sm:$0xff]   ;;  %v1413_v26 = vld [vmem:[%s1754_s0 + $0x50] sm:$0xff]   ;;  %v1415_v28 = vld [vmem:[%s1754_s0 + $0x58] sm:$0xff]  }
   0xa   :  { %v1414_v27 = vld [vmem:[%s1754_s0 + $0xd0] sm:$0xff]   ;;  %v1416_v29 = vld [vmem:[%s1754_s0 + $0xd8] sm:$0xff]   ;;  %v1417_v30 = vld [vmem:[%s1754_s0 + $0x60] sm:$0xff]  }
   0xb   :  { %1307 = vmatpush3.bf16.msra.mxu0 %v1390_v2  ;;  %1383 = vmatpush3.bf16.msra.mxu1 %v1390_v2  ;;  %v1418_v31 = vld [vmem:[%s1754_s0 + $0xe0] sm:$0xff]   ;;  %v1419_v32 = vld [vmem:[%s1754_s0 + $0x68] sm:$0xff]   ;;  %v1421_v34 = vld [vmem:[%s1754_s0 + $0x70] sm:$0xff]  }
   0xc   :  { %1308 = vmatprep.subr.bf16.mxu0 %v1391_v5  ;;  %1379 = vmatprep.subr.bf16.mxu1 %v1391_v5  ;;  %v1420_v33 = vld [vmem:[%s1754_s0 + $0xe8] sm:$0xff]   ;;  %v1422_v35 = vld [vmem:[%s1754_s0 + $0xf0] sm:$0xff]   ;;  %v1423_v36 = vld [vmem:[%s1754_s0 + $0x78] sm:$0xff]  }
   0xd   :  { %v1424_v37 = vld [vmem:[%s1754_s0 + $0xf8] sm:$0xff]   ;;  %v1591_v38 = vld [vmem:[%s1755_s2] ss:$0 sm:$0xff] }
   0xf   :  { %1309 = vmatpush3.bf16.msra.mxu0 %v1391_v5  ;;  %1384 = vmatpush3.bf16.msra.mxu1 %v1391_v5 }
  0x10   :  { %1386 = vmatprep.subr.msk.bf16.mxu0 %vm504_vm1, %v1392_v6  ;;  %1387 = vmatprep.subr.msk.bf16.mxu1 %vm504_vm1, %v1392_v6 }
  0x13   :  { %1311 = vmatpush3.bf16.msra.mxu0 %v506_v7  ;;  %1385 = vmatpush3.bf16.msra.mxu1 %v506_v7 }
  0x16   :  { %1313 = vmatmul.mubr.msk.bf16.vlgmr.msra.gmra.mrb[0].mxu0 %vm407_vm0, %v1395_v8  ;;  %1345 = vmatmul.mubr.msk.bf16.vlgmr.msra.gmra.mrb[0].mxu1 %vm407_vm0, %v1396_v9 }
  0x17   :  { %1316 = vmatprep.mubr.msk.bf16.mxu0 %vm407_vm0, %v1397_v10  ;;  %1348 = vmatprep.mubr.msk.bf16.mxu1 %vm407_vm0, %v1398_v11 }
  0x1e   :  { %1317 = vmatmul.mubr.msk.bf16.gmra.mrb[4].mxu0 %vm407_vm0, %v1399_v12  ;;  %1349 = vmatmul.mubr.msk.bf16.gmra.mrb[4].mxu1 %vm407_vm0, %v1400_v13 }
  0x1f   :  { %1320 = vmatprep.mubr.msk.bf16.mxu0 %vm407_vm0, %v1401_v14  ;;  %1352 = vmatprep.mubr.msk.bf16.mxu1 %vm407_vm0, %v1402_v15 }
  0x26   :  { %1321 = vmatmul.mubr.msk.bf16.gmra.mrb[8].mxu0 %vm407_vm0, %v1403_v16  ;;  %1353 = vmatmul.mubr.msk.bf16.gmra.mrb[8].mxu1 %vm407_vm0, %v1404_v17 }
  0x27   :  { %1324 = vmatprep.mubr.msk.bf16.mxu0 %vm407_vm0, %v1405_v18  ;;  %1356 = vmatprep.mubr.msk.bf16.mxu1 %vm407_vm0, %v1406_v19 }
  0x2e   :  { %1325 = vmatmul.mubr.msk.bf16.gmra.mrb[12].mxu0 %vm407_vm0, %v1407_v20  ;;  %1357 = vmatmul.mubr.msk.bf16.gmra.mrb[12].mxu1 %vm407_vm0, %v1408_v21 }
  0x2f   :  { %1328 = vmatprep.mubr.msk.bf16.mxu0 %vm407_vm0, %v1409_v22  ;;  %1360 = vmatprep.mubr.msk.bf16.mxu1 %vm407_vm0, %v1410_v23 }
  0x36   :  { %1329 = vmatmul.mubr.msk.bf16.gmra.mrb[16].mxu0 %vm407_vm0, %v1411_v24  ;;  %1361 = vmatmul.mubr.msk.bf16.gmra.mrb[16].mxu1 %vm407_vm0, %v1412_v25 }
  0x37   :  { %1332 = vmatprep.mubr.msk.bf16.mxu0 %vm407_vm0, %v1413_v26  ;;  %1364 = vmatprep.mubr.msk.bf16.mxu1 %vm407_vm0, %v1414_v27 }
  0x3e   :  { %1333 = vmatmul.mubr.msk.bf16.gmra.mrb[20].mxu0 %vm407_vm0, %v1415_v28  ;;  %1365 = vmatmul.mubr.msk.bf16.gmra.mrb[20].mxu1 %vm407_vm0, %v1416_v29 }
  0x3f   :  { %1336 = vmatprep.mubr.msk.bf16.mxu0 %vm407_vm0, %v1417_v30  ;;  %1368 = vmatprep.mubr.msk.bf16.mxu1 %vm407_vm0, %v1418_v31 }
  0x46   :  { %1337 = vmatmul.mubr.msk.bf16.gmra.mrb[24].mxu0 %vm407_vm0, %v1419_v32  ;;  %1369 = vmatmul.mubr.msk.bf16.gmra.mrb[24].mxu1 %vm407_vm0, %v1420_v33 }
  0x47   :  { %1340 = vmatprep.mubr.msk.bf16.mxu0 %vm407_vm0, %v1421_v34  ;;  %1372 = vmatprep.mubr.msk.bf16.mxu1 %vm407_vm0, %v1422_v35 }
  0x4e   :  { %1341 = vmatmul.mubr.msk.bf16.gmra.mrb[28].mxu0 %vm407_vm0, %v1423_v36  ;;  %1373 = vmatmul.mubr.msk.bf16.gmra.mrb[28].mxu1 %vm407_vm0, %v1424_v37 }
  0xe9   :  { %v1314_v39 = vpop.f32.mrb[0].mxu0  ;;  %v1346_v40 = vpop.f32.mrb[0].mxu1 }
  0xea   :  { %v1001_v41 = vadd.f32 %v1314_v39, %v1591_v38  ;;  %v1033_v42 = vadd.f32 %v1346_v40, %v1591_v38  ;;  %v542_v43 = vpop.f32.mrb[1].mxu0  ;;  %v670_v44 = vpop.f32.mrb[1].mxu1 }
  0xeb   :  { %v999_v45 = vadd.f32 %v1591_v38, %v542_v43  ;;  %v1031_v46 = vadd.f32 %v1591_v38, %v670_v44  ;;  %v1315_v47 = vpop.f32.mrb[2].mxu0  ;;  %v1347_v48 = vpop.f32.mrb[2].mxu1 }
  0xec   :  { %v1002_v49 = vadd.f32 %v1315_v47, %v1591_v38  ;;  %v1034_v50 = vadd.f32 %v1347_v48, %v1591_v38  ;;  %v545_v51 = vpop.f32.mrb[3].mxu0  ;;  %v673_v52 = vpop.f32.mrb[3].mxu1  ;;  %v1065_v55 = vmax.f32 %v1001_v41, 0.0  ;;  %v1097_v56 = vmax.f32 %v1033_v42, 0.0 }
  0xed   :  { %v1000_v53 = vadd.f32 %v1591_v38, %v545_v51  ;;  %v1032_v54 = vadd.f32 %v1591_v38, %v673_v52  ;;  %v1063_v59 = vmax.f32 %v999_v45, 0.0  ;;  %v1095_v60 = vmax.f32 %v1031_v46, 0.0 }
  0xee   :  { %v1066_v57 = vmax.f32 %v1002_v49, 0.0  ;;  %v1098_v58 = vmax.f32 %v1034_v50, 0.0 }
  0xef   :  { %v1064_v61 = vmax.f32 %v1000_v53, 0.0  ;;  %v1096_v62 = vmax.f32 %v1032_v54, 0.0 }
  0xf0   :  { %v1128_v63 = vpack.c.bf16 %v1066_v57, %v1065_v55  ;;  %v1144_v0 = vpack.c.bf16 %v1098_v58, %v1097_v56 }
  0xf1   :  { %v1127_v1 = vpack.c.bf16 %v1064_v61, %v1063_v59  ;;  %v1143_v2 = vpack.c.bf16 %v1096_v62, %v1095_v60  ;;  %v1318_v3 = vpop.f32.mrb[4].mxu0  ;;  %v1350_v4 = vpop.f32.mrb[4].mxu1 }
  0xf2   :  { %1160 = vst [vmem:[%s1756_s3 + $0x8] sm:$0xff] %v1128_v63  ;;  %1176 = vst [vmem:[%s1756_s3 + $0x88] sm:$0xff] %v1144_v0  ;;  %v1005_v5 = vadd.f32 %v1318_v3, %v1591_v38  ;;  %v1037_v6 = vadd.f32 %v1350_v4, %v1591_v38  ;;  %v558_v7 = vpop.f32.mrb[5].mxu0  ;;  %v686_v8 = vpop.f32.mrb[5].mxu1 }
  0xf3   :  { %1159 = vst [vmem:[%s1756_s3] sm:$0xff] %v1127_v1  ;;  %1175 = vst [vmem:[%s1756_s3 + $0x80] sm:$0xff] %v1143_v2  ;;  %v1003_v9 = vadd.f32 %v1591_v38, %v558_v7  ;;  %v1035_v10 = vadd.f32 %v1591_v38, %v686_v8  ;;  %v1319_v11 = vpop.f32.mrb[6].mxu0  ;;  %v1351_v12 = vpop.f32.mrb[6].mxu1 }
  0xf4   :  { %v1006_v13 = vadd.f32 %v1319_v11, %v1591_v38  ;;  %v1038_v14 = vadd.f32 %v1351_v12, %v1591_v38  ;;  %v561_v15 = vpop.f32.mrb[7].mxu0  ;;  %v689_v16 = vpop.f32.mrb[7].mxu1  ;;  %v1069_v19 = vmax.f32 %v1005_v5, 0.0  ;;  %v1101_v20 = vmax.f32 %v1037_v6, 0.0 }
  0xf5   :  { %v1004_v17 = vadd.f32 %v1591_v38, %v561_v15  ;;  %v1036_v18 = vadd.f32 %v1591_v38, %v689_v16  ;;  %v1067_v23 = vmax.f32 %v1003_v9, 0.0  ;;  %v1099_v24 = vmax.f32 %v1035_v10, 0.0 }
  0xf6   :  { %v1070_v21 = vmax.f32 %v1006_v13, 0.0  ;;  %v1102_v22 = vmax.f32 %v1038_v14, 0.0 }
  0xf7   :  { %v1068_v25 = vmax.f32 %v1004_v17, 0.0  ;;  %v1100_v26 = vmax.f32 %v1036_v18, 0.0 }
  0xf8   :  { %v1130_v27 = vpack.c.bf16 %v1070_v21, %v1069_v19  ;;  %v1146_v28 = vpack.c.bf16 %v1102_v22, %v1101_v20 }
  0xf9   :  { %v1129_v29 = vpack.c.bf16 %v1068_v25, %v1067_v23  ;;  %v1145_v30 = vpack.c.bf16 %v1100_v26, %v1099_v24  ;;  %v1322_v31 = vpop.f32.mrb[8].mxu0  ;;  %v1354_v32 = vpop.f32.mrb[8].mxu1 }
  0xfa   :  { %1162 = vst [vmem:[%s1756_s3 + $0x18] sm:$0xff] %v1130_v27  ;;  %1178 = vst [vmem:[%s1756_s3 + $0x98] sm:$0xff] %v1146_v28  ;;  %v1009_v33 = vadd.f32 %v1322_v31, %v1591_v38  ;;  %v1041_v34 = vadd.f32 %v1354_v32, %v1591_v38  ;;  %v574_v35 = vpop.f32.mrb[9].mxu0  ;;  %v702_v36 = vpop.f32.mrb[9].mxu1 }
  0xfb   :  { %1161 = vst [vmem:[%s1756_s3 + $0x10] sm:$0xff] %v1129_v29  ;;  %1177 = vst [vmem:[%s1756_s3 + $0x90] sm:$0xff] %v1145_v30  ;;  %v1007_v37 = vadd.f32 %v1591_v38, %v574_v35  ;;  %v1039_v39 = vadd.f32 %v1591_v38, %v702_v36  ;;  %v1323_v40 = vpop.f32.mrb[10].mxu0  ;;  %v1355_v41 = vpop.f32.mrb[10].mxu1 }
  0xfc   :  { %v1010_v42 = vadd.f32 %v1323_v40, %v1591_v38  ;;  %v1042_v43 = vadd.f32 %v1355_v41, %v1591_v38  ;;  %v577_v44 = vpop.f32.mrb[11].mxu0  ;;  %v705_v45 = vpop.f32.mrb[11].mxu1  ;;  %v1073_v48 = vmax.f32 %v1009_v33, 0.0  ;;  %v1105_v49 = vmax.f32 %v1041_v34, 0.0 }
  0xfd   :  { %v1008_v46 = vadd.f32 %v1591_v38, %v577_v44  ;;  %v1040_v47 = vadd.f32 %v1591_v38, %v705_v45  ;;  %v1071_v52 = vmax.f32 %v1007_v37, 0.0  ;;  %v1103_v53 = vmax.f32 %v1039_v39, 0.0 }
  0xfe   :  { %v1074_v50 = vmax.f32 %v1010_v42, 0.0  ;;  %v1106_v51 = vmax.f32 %v1042_v43, 0.0 }
  0xff   :  { %v1072_v54 = vmax.f32 %v1008_v46, 0.0  ;;  %v1104_v55 = vmax.f32 %v1040_v47, 0.0 }
 0x100   :  { %v1132_v56 = vpack.c.bf16 %v1074_v50, %v1073_v48  ;;  %v1148_v57 = vpack.c.bf16 %v1106_v51, %v1105_v49 }
 0x101   :  { %v1131_v58 = vpack.c.bf16 %v1072_v54, %v1071_v52  ;;  %v1147_v59 = vpack.c.bf16 %v1104_v55, %v1103_v53  ;;  %v1326_v60 = vpop.f32.mrb[12].mxu0  ;;  %v1358_v61 = vpop.f32.mrb[12].mxu1 }
 0x102   :  { %1164 = vst [vmem:[%s1756_s3 + $0x28] sm:$0xff] %v1132_v56  ;;  %1180 = vst [vmem:[%s1756_s3 + $0xa8] sm:$0xff] %v1148_v57  ;;  %v1013_v62 = vadd.f32 %v1326_v60, %v1591_v38  ;;  %v1045_v63 = vadd.f32 %v1358_v61, %v1591_v38  ;;  %v590_v0 = vpop.f32.mrb[13].mxu0  ;;  %v718_v1 = vpop.f32.mrb[13].mxu1 }
 0x103   :  { %1163 = vst [vmem:[%s1756_s3 + $0x20] sm:$0xff] %v1131_v58  ;;  %1179 = vst [vmem:[%s1756_s3 + $0xa0] sm:$0xff] %v1147_v59  ;;  %v1011_v2 = vadd.f32 %v1591_v38, %v590_v0  ;;  %v1043_v3 = vadd.f32 %v1591_v38, %v718_v1  ;;  %v1327_v4 = vpop.f32.mrb[14].mxu0  ;;  %v1359_v5 = vpop.f32.mrb[14].mxu1 }
 0x104   :  { %v1014_v6 = vadd.f32 %v1327_v4, %v1591_v38  ;;  %v1046_v7 = vadd.f32 %v1359_v5, %v1591_v38  ;;  %v593_v8 = vpop.f32.mrb[15].mxu0  ;;  %v721_v9 = vpop.f32.mrb[15].mxu1  ;;  %v1077_v12 = vmax.f32 %v1013_v62, 0.0  ;;  %v1109_v13 = vmax.f32 %v1045_v63, 0.0 }
 0x105   :  { %v1012_v10 = vadd.f32 %v1591_v38, %v593_v8  ;;  %v1044_v11 = vadd.f32 %v1591_v38, %v721_v9  ;;  %v1075_v16 = vmax.f32 %v1011_v2, 0.0  ;;  %v1107_v17 = vmax.f32 %v1043_v3, 0.0 }
 0x106   :  { %v1078_v14 = vmax.f32 %v1014_v6, 0.0  ;;  %v1110_v15 = vmax.f32 %v1046_v7, 0.0 }
 0x107   :  { %v1076_v18 = vmax.f32 %v1012_v10, 0.0  ;;  %v1108_v19 = vmax.f32 %v1044_v11, 0.0 }
 0x108   :  { %v1134_v20 = vpack.c.bf16 %v1078_v14, %v1077_v12  ;;  %v1150_v21 = vpack.c.bf16 %v1110_v15, %v1109_v13 }
 0x109   :  { %v1133_v22 = vpack.c.bf16 %v1076_v18, %v1075_v16  ;;  %v1149_v23 = vpack.c.bf16 %v1108_v19, %v1107_v17  ;;  %v1330_v24 = vpop.f32.mrb[16].mxu0  ;;  %v1362_v25 = vpop.f32.mrb[16].mxu1 }
 0x10a   :  { %1166 = vst [vmem:[%s1756_s3 + $0x38] sm:$0xff] %v1134_v20  ;;  %1182 = vst [vmem:[%s1756_s3 + $0xb8] sm:$0xff] %v1150_v21  ;;  %v1017_v26 = vadd.f32 %v1330_v24, %v1591_v38  ;;  %v1049_v27 = vadd.f32 %v1362_v25, %v1591_v38  ;;  %v606_v28 = vpop.f32.mrb[17].mxu0  ;;  %v734_v29 = vpop.f32.mrb[17].mxu1 }
 0x10b   :  { %1165 = vst [vmem:[%s1756_s3 + $0x30] sm:$0xff] %v1133_v22  ;;  %1181 = vst [vmem:[%s1756_s3 + $0xb0] sm:$0xff] %v1149_v23  ;;  %v1015_v30 = vadd.f32 %v1591_v38, %v606_v28  ;;  %v1047_v31 = vadd.f32 %v1591_v38, %v734_v29  ;;  %v1331_v32 = vpop.f32.mrb[18].mxu0  ;;  %v1363_v33 = vpop.f32.mrb[18].mxu1 }
 0x10c   :  { %v1018_v34 = vadd.f32 %v1331_v32, %v1591_v38  ;;  %v1050_v35 = vadd.f32 %v1363_v33, %v1591_v38  ;;  %v609_v36 = vpop.f32.mrb[19].mxu0  ;;  %v737_v37 = vpop.f32.mrb[19].mxu1  ;;  %v1081_v41 = vmax.f32 %v1017_v26, 0.0  ;;  %v1113_v42 = vmax.f32 %v1049_v27, 0.0 }
 0x10d   :  { %v1016_v39 = vadd.f32 %v1591_v38, %v609_v36  ;;  %v1048_v40 = vadd.f32 %v1591_v38, %v737_v37  ;;  %v1079_v45 = vmax.f32 %v1015_v30, 0.0  ;;  %v1111_v46 = vmax.f32 %v1047_v31, 0.0 }
 0x10e   :  { %v1082_v43 = vmax.f32 %v1018_v34, 0.0  ;;  %v1114_v44 = vmax.f32 %v1050_v35, 0.0 }
 0x10f   :  { %v1080_v47 = vmax.f32 %v1016_v39, 0.0  ;;  %v1112_v48 = vmax.f32 %v1048_v40, 0.0 }
 0x110   :  { %v1136_v49 = vpack.c.bf16 %v1082_v43, %v1081_v41  ;;  %v1152_v50 = vpack.c.bf16 %v1114_v44, %v1113_v42 }
 0x111   :  { %v1135_v51 = vpack.c.bf16 %v1080_v47, %v1079_v45  ;;  %v1151_v52 = vpack.c.bf16 %v1112_v48, %v1111_v46  ;;  %v1334_v53 = vpop.f32.mrb[20].mxu0  ;;  %v1366_v54 = vpop.f32.mrb[20].mxu1 }
 0x112   :  { %1168 = vst [vmem:[%s1756_s3 + $0x48] sm:$0xff] %v1136_v49  ;;  %1184 = vst [vmem:[%s1756_s3 + $0xc8] sm:$0xff] %v1152_v50  ;;  %v1021_v55 = vadd.f32 %v1334_v53, %v1591_v38  ;;  %v1053_v56 = vadd.f32 %v1366_v54, %v1591_v38  ;;  %v622_v57 = vpop.f32.mrb[21].mxu0  ;;  %v750_v58 = vpop.f32.mrb[21].mxu1 }
 0x113   :  { %1167 = vst [vmem:[%s1756_s3 + $0x40] sm:$0xff] %v1135_v51  ;;  %1183 = vst [vmem:[%s1756_s3 + $0xc0] sm:$0xff] %v1151_v52  ;;  %v1019_v59 = vadd.f32 %v1591_v38, %v622_v57  ;;  %v1051_v60 = vadd.f32 %v1591_v38, %v750_v58  ;;  %v1335_v61 = vpop.f32.mrb[22].mxu0  ;;  %v1367_v62 = vpop.f32.mrb[22].mxu1 }
 0x114   :  { %v1022_v63 = vadd.f32 %v1335_v61, %v1591_v38  ;;  %v1054_v0 = vadd.f32 %v1367_v62, %v1591_v38  ;;  %v625_v1 = vpop.f32.mrb[23].mxu0  ;;  %v753_v2 = vpop.f32.mrb[23].mxu1  ;;  %v1085_v5 = vmax.f32 %v1021_v55, 0.0  ;;  %v1117_v6 = vmax.f32 %v1053_v56, 0.0 }
 0x115   :  { %v1020_v3 = vadd.f32 %v1591_v38, %v625_v1  ;;  %v1052_v4 = vadd.f32 %v1591_v38, %v753_v2  ;;  %v1083_v9 = vmax.f32 %v1019_v59, 0.0  ;;  %v1115_v10 = vmax.f32 %v1051_v60, 0.0 }
 0x116   :  { %v1086_v7 = vmax.f32 %v1022_v63, 0.0  ;;  %v1118_v8 = vmax.f32 %v1054_v0, 0.0 }
 0x117   :  { %v1084_v11 = vmax.f32 %v1020_v3, 0.0  ;;  %v1116_v12 = vmax.f32 %v1052_v4, 0.0 }
 0x118   :  { %v1138_v13 = vpack.c.bf16 %v1086_v7, %v1085_v5  ;;  %v1154_v14 = vpack.c.bf16 %v1118_v8, %v1117_v6 }
 0x119   :  { %v1137_v15 = vpack.c.bf16 %v1084_v11, %v1083_v9  ;;  %v1153_v16 = vpack.c.bf16 %v1116_v12, %v1115_v10  ;;  %v1338_v17 = vpop.f32.mrb[24].mxu0  ;;  %v1370_v18 = vpop.f32.mrb[24].mxu1 }
 0x11a   :  { %1170 = vst [vmem:[%s1756_s3 + $0x58] sm:$0xff] %v1138_v13  ;;  %1186 = vst [vmem:[%s1756_s3 + $0xd8] sm:$0xff] %v1154_v14  ;;  %v1025_v19 = vadd.f32 %v1338_v17, %v1591_v38  ;;  %v1057_v20 = vadd.f32 %v1370_v18, %v1591_v38  ;;  %v638_v21 = vpop.f32.mrb[25].mxu0  ;;  %v766_v22 = vpop.f32.mrb[25].mxu1 }
 0x11b   :  { %1169 = vst [vmem:[%s1756_s3 + $0x50] sm:$0xff] %v1137_v15  ;;  %1185 = vst [vmem:[%s1756_s3 + $0xd0] sm:$0xff] %v1153_v16  ;;  %v1023_v23 = vadd.f32 %v1591_v38, %v638_v21  ;;  %v1055_v24 = vadd.f32 %v1591_v38, %v766_v22  ;;  %v1339_v25 = vpop.f32.mrb[26].mxu0  ;;  %v1371_v26 = vpop.f32.mrb[26].mxu1 }
 0x11c   :  { %v1026_v27 = vadd.f32 %v1339_v25, %v1591_v38  ;;  %v1058_v28 = vadd.f32 %v1371_v26, %v1591_v38  ;;  %v641_v29 = vpop.f32.mrb[27].mxu0  ;;  %v769_v30 = vpop.f32.mrb[27].mxu1  ;;  %v1089_v33 = vmax.f32 %v1025_v19, 0.0  ;;  %v1121_v34 = vmax.f32 %v1057_v20, 0.0 }
 0x11d   :  { %v1024_v31 = vadd.f32 %v1591_v38, %v641_v29  ;;  %v1056_v32 = vadd.f32 %v1591_v38, %v769_v30  ;;  %v1087_v37 = vmax.f32 %v1023_v23, 0.0  ;;  %v1119_v39 = vmax.f32 %v1055_v24, 0.0 }
 0x11e   :  { %v1090_v35 = vmax.f32 %v1026_v27, 0.0  ;;  %v1122_v36 = vmax.f32 %v1058_v28, 0.0 }
 0x11f   :  { %v1088_v40 = vmax.f32 %v1024_v31, 0.0  ;;  %v1120_v41 = vmax.f32 %v1056_v32, 0.0 }
 0x120   :  { %v1140_v42 = vpack.c.bf16 %v1090_v35, %v1089_v33  ;;  %v1156_v43 = vpack.c.bf16 %v1122_v36, %v1121_v34 }
 0x121   :  { %v1139_v44 = vpack.c.bf16 %v1088_v40, %v1087_v37  ;;  %v1155_v45 = vpack.c.bf16 %v1120_v41, %v1119_v39  ;;  %v1342_v46 = vpop.f32.mrb[28].mxu0  ;;  %v1374_v47 = vpop.f32.mrb[28].mxu1 }
 0x122   :  { %1172 = vst [vmem:[%s1756_s3 + $0x68] sm:$0xff] %v1140_v42  ;;  %1188 = vst [vmem:[%s1756_s3 + $0xe8] sm:$0xff] %v1156_v43  ;;  %v1029_v48 = vadd.f32 %v1342_v46, %v1591_v38  ;;  %v1061_v49 = vadd.f32 %v1374_v47, %v1591_v38  ;;  %v654_v50 = vpop.f32.mrb[29].mxu0  ;;  %v782_v51 = vpop.f32.mrb[29].mxu1 }
 0x123   :  { %1171 = vst [vmem:[%s1756_s3 + $0x60] sm:$0xff] %v1139_v44  ;;  %1187 = vst [vmem:[%s1756_s3 + $0xe0] sm:$0xff] %v1155_v45  ;;  %v1027_v52 = vadd.f32 %v1591_v38, %v654_v50  ;;  %v1059_v53 = vadd.f32 %v1591_v38, %v782_v51  ;;  %v1343_v54 = vpop.f32.mrb[30].mxu0  ;;  %v1375_v55 = vpop.f32.mrb[30].mxu1 }
 0x124   :  { %v1030_v56 = vadd.f32 %v1343_v54, %v1591_v38  ;;  %v1062_v57 = vadd.f32 %v1375_v55, %v1591_v38  ;;  %v657_v58 = vpop.f32.mrb[31].mxu0  ;;  %v785_v59 = vpop.f32.mrb[31].mxu1  ;;  %v1093_v62 = vmax.f32 %v1029_v48, 0.0  ;;  %v1125_v63 = vmax.f32 %v1061_v49, 0.0 }
 0x125   :  { %v1028_v60 = vadd.f32 %v1591_v38, %v657_v58  ;;  %v1060_v61 = vadd.f32 %v1591_v38, %v785_v59  ;;  %v1091_v2 = vmax.f32 %v1027_v52, 0.0  ;;  %v1123_v3 = vmax.f32 %v1059_v53, 0.0 }
 0x126   :  { %v1094_v0 = vmax.f32 %v1030_v56, 0.0  ;;  %v1126_v1 = vmax.f32 %v1062_v57, 0.0 }
 0x127   :  { %v1092_v4 = vmax.f32 %v1028_v60, 0.0  ;;  %v1124_v5 = vmax.f32 %v1060_v61, 0.0 }
 0x128   :  { %v1142_v6 = vpack.c.bf16 %v1094_v0, %v1093_v62  ;;  %v1158_v7 = vpack.c.bf16 %v1126_v1, %v1125_v63 }
 0x129   :  { %v1141_v8 = vpack.c.bf16 %v1092_v4, %v1091_v2  ;;  %v1157_v9 = vpack.c.bf16 %v1124_v5, %v1123_v3 }
 0x12a   :  { %1174 = vst [vmem:[%s1756_s3 + $0x78] sm:$0xff] %v1142_v6  ;;  %1190 = vst [vmem:[%s1756_s3 + $0xf8] sm:$0xff] %v1158_v7 }
 0x12b   :  { %1173 = vst [vmem:[%s1756_s3 + $0x70] sm:$0xff] %v1141_v8  ;;  %1189 = vst [vmem:[%s1756_s3 + $0xf0] sm:$0xff] %v1157_v9 }

// kernel: retinanet_forward.16
= control target key start
LH: loop header
LB: loop body
LE: loop exit
PB: predicated region body
PF: predicated region fallthrough
CT: control target
= control target key end

     0   :  { %v529_v0 = vmov 0   ;;  %vm211_vm0 = vcmask 130048   ;;  %s678_s1 = inlined_call_operand.vmem [shape: bf16[144,128], index: 1, kind: input, shape index: {}]   ;;  %s679_s0 = inlined_call_operand.vmem [shape: bf16[128,144], index: 0, kind: input, shape index: {}]   ;;  %s680_s2 = inlined_call_operand.vmem [shape: f32[1,128], index: 2, kind: input, shape index: {}]   ;;  %s681_s3 = inlined_call_operand.vmem [shape: bf16[128,128], index: 3, kind: output, shape index: {}]  }
   0x1   :  { %236 = vmatprep.subr.bf16.mxu0 %v529_v0  ;;  %477 = vmatprep.subr.bf16.mxu1 %v529_v0  ;;  %v496_v1 = vld [vmem:[%s678_s1] sm:$0xff]   ;;  %v497_v2 = vld [vmem:[%s678_s1 + $0x8] sm:$0xff]   ;;  %v498_v3 = vld [vmem:[%s678_s1 + $0x10] sm:$0xff]  }
   0x2   :  { %237 = vmatpush1.bf16.msra.mxu0 %v496_v1  ;;  %486 = vmatpush1.bf16.msra.mxu1 %v496_v1  ;;  %v499_v4 = vld [vmem:[%s678_s1 + $0x18] sm:$0xff]   ;;  %v507_v5 = vld [vmem:[%s679_s0 + $0x4] ss:$8 sps:$4 sm:$0xff]   ;;  %v502_v9 = vld [vmem:[%s678_s1 + $0x30] sm:$0xff]  }
   0x3   :  { %238 = vmatprep.subr.bf16.mxu0 %v529_v0  ;;  %478 = vmatprep.subr.bf16.mxu1 %v529_v0  ;;  %v510_v6 = vld [vmem:[%s679_s0 + $0x44] ss:$8 sps:$4 sm:$0xff]   ;;  %v503_v10 = vld [vmem:[%s678_s1 + $0x38] sm:$0xff]   ;;  %v505_v12 = vld [vmem:[%s679_s0] ss:$8 sps:$4 sm:$0xff]  }
   0x4   :  { %468 = vmatprep.mubr.msk.bf16.mxu0 %vm211_vm0, %v507_v5  ;;  %472 = vmatprep.mubr.msk.bf16.mxu1 %vm211_vm0, %v510_v6  ;;  %v500_v7 = vld [vmem:[%s678_s1 + $0x20] sm:$0xff]   ;;  %v501_v8 = vld [vmem:[%s678_s1 + $0x28] sm:$0xff]   ;;  %v511_v14 = vld [vmem:[%s679_s0 + $0x14] ss:$8 sps:$4 sm:$0xff]  }
   0x5   :  { %v504_v11 = vld [vmem:[%s678_s1 + $0x40] sm:$0xff]   ;;  %v513_v15 = vld [vmem:[%s679_s0 + $0x54] ss:$8 sps:$4 sm:$0xff]   ;;  %v515_v16 = vld [vmem:[%s679_s0 + $0x10] ss:$8 sps:$4 sm:$0xff]  }
   0x6   :  { %239 = vmatpush1.bf16.msra.mxu0 %v497_v2  ;;  %487 = vmatpush1.bf16.msra.mxu1 %v497_v2  ;;  %v508_v13 = vld [vmem:[%s679_s0 + $0x40] ss:$8 sps:$4 sm:$0xff]   ;;  %v516_v17 = vld [vmem:[%s679_s0 + $0x50] ss:$8 sps:$4 sm:$0xff]   ;;  %v517_v18 = vld [vmem:[%s679_s0 + $0x24] ss:$8 sps:$4 sm:$0xff]  }
   0x7   :  { %240 = vmatprep.subr.bf16.mxu0 %v529_v0  ;;  %479 = vmatprep.subr.bf16.mxu1 %v529_v0  ;;  %v519_v19 = vld [vmem:[%s679_s0 + $0x64] ss:$8 sps:$4 sm:$0xff]   ;;  %v521_v20 = vld [vmem:[%s679_s0 + $0x20] ss:$8 sps:$4 sm:$0xff]   ;;  %v523_v22 = vld [vmem:[%s679_s0 + $0x34] ss:$8 sps:$4 sm:$0xff]  }
   0x8   :  { %v522_v21 = vld [vmem:[%s679_s0 + $0x60] ss:$8 sps:$4 sm:$0xff]   ;;  %v525_v23 = vld [vmem:[%s679_s0 + $0x74] ss:$8 sps:$4 sm:$0xff]   ;;  %v527_v24 = vld [vmem:[%s679_s0 + $0x30] ss:$8 sps:$4 sm:$0xff]  }
   0x9   :  { %v528_v25 = vld [vmem:[%s679_s0 + $0x70] ss:$8 sps:$4 sm:$0xff]   ;;  %v636_v26 = vld [vmem:[%s680_s2] ss:$0 sm:$0xff] }
   0xa   :  { %241 = vmatpush1.bf16.msra.mxu0 %v498_v3  ;;  %488 = vmatpush1.bf16.msra.mxu1 %v498_v3 }
   0xb   :  { %242 = vmatprep.subr.bf16.mxu0 %v529_v0  ;;  %480 = vmatprep.subr.bf16.mxu1 %v529_v0 }
   0xe   :  { %243 = vmatpush1.bf16.msra.mxu0 %v499_v4  ;;  %489 = vmatpush1.bf16.msra.mxu1 %v499_v4 }
   0xf   :  { %244 = vmatprep.subr.bf16.mxu0 %v529_v0  ;;  %481 = vmatprep.subr.bf16.mxu1 %v529_v0 }
  0x12   :  { %245 = vmatpush1.bf16.msra.mxu0 %v500_v7  ;;  %490 = vmatpush1.bf16.msra.mxu1 %v500_v7 }
  0x13   :  { %246 = vmatprep.subr.bf16.mxu0 %v529_v0  ;;  %482 = vmatprep.subr.bf16.mxu1 %v529_v0 }
  0x16   :  { %247 = vmatpush1.bf16.msra.mxu0 %v501_v8  ;;  %491 = vmatpush1.bf16.msra.mxu1 %v501_v8 }
  0x17   :  { %248 = vmatprep.subr.bf16.mxu0 %v529_v0  ;;  %483 = vmatprep.subr.bf16.mxu1 %v529_v0 }
  0x1a   :  { %249 = vmatpush1.bf16.msra.mxu0 %v502_v9  ;;  %492 = vmatpush1.bf16.msra.mxu1 %v502_v9 }
  0x1b   :  { %250 = vmatprep.subr.bf16.mxu0 %v529_v0  ;;  %484 = vmatprep.subr.bf16.mxu1 %v529_v0 }
  0x1e   :  { %251 = vmatpush1.bf16.msra.mxu0 %v503_v10  ;;  %493 = vmatpush1.bf16.msra.mxu1 %v503_v10 }
  0x1f   :  { %252 = vmatprep.subr.bf16.mxu0 %v529_v0  ;;  %485 = vmatprep.subr.bf16.mxu1 %v529_v0 }
  0x22   :  { %253 = vmatpush1.bf16.msra.mxu0 %v504_v11  ;;  %494 = vmatpush1.bf16.msra.mxu1 %v504_v11 }
  0x25   :  { %269 = vmatmul.mubr.bf16.vlgmr.msra.gmra.mrb[0].mxu0 %v505_v12  ;;  %301 = vmatmul.mubr.bf16.vlgmr.msra.gmra.mrb[0].mxu1 %v508_v13 }
  0x26   :  { %469 = vmatprep.mubr.msk.bf16.mxu0 %vm211_vm0, %v511_v14  ;;  %473 = vmatprep.mubr.msk.bf16.mxu1 %vm211_vm0, %v513_v15 }
  0x2d   :  { %277 = vmatmul.mubr.bf16.gmra.mrb[4].mxu0 %v515_v16  ;;  %309 = vmatmul.mubr.bf16.gmra.mrb[4].mxu1 %v516_v17 }
  0x2e   :  { %470 = vmatprep.mubr.msk.bf16.mxu0 %vm211_vm0, %v517_v18  ;;  %474 = vmatprep.mubr.msk.bf16.mxu1 %vm211_vm0, %v519_v19 }
  0x35   :  { %285 = vmatmul.mubr.bf16.gmra.mrb[8].mxu0 %v521_v20  ;;  %317 = vmatmul.mubr.bf16.gmra.mrb[8].mxu1 %v522_v21 }
  0x36   :  { %471 = vmatprep.mubr.msk.bf16.mxu0 %vm211_vm0, %v523_v22  ;;  %475 = vmatprep.mubr.msk.bf16.mxu1 %vm211_vm0, %v525_v23 }
  0x3d   :  { %293 = vmatmul.mubr.bf16.gmra.mrb[12].mxu0 %v527_v24  ;;  %325 = vmatmul.mubr.bf16.gmra.mrb[12].mxu1 %v528_v25 }
  0xf8   :  { %v270_v27 = vpop.f32.mrb[0].mxu0  ;;  %v302_v28 = vpop.f32.mrb[0].mxu1 }
  0xf9   :  { %v391_v29 = vadd.f32 %v636_v26, %v270_v27  ;;  %v399_v30 = vadd.f32 %v636_v26, %v302_v28  ;;  %v272_v31 = vpop.f32.mrb[1].mxu0  ;;  %v304_v32 = vpop.f32.mrb[1].mxu1 }
  0xfa   :  { %v273_v33 = vpop.f32.mrb[2].mxu0  ;;  %v305_v34 = vpop.f32.mrb[2].mxu1 }
  0xfb   :  { %v392_v35 = vadd.f32 %v636_v26, %v273_v33  ;;  %v400_v36 = vadd.f32 %v636_v26, %v305_v34  ;;  %v275_v37 = vpop.f32.mrb[3].mxu0  ;;  %v307_v38 = vpop.f32.mrb[3].mxu1  ;;  %v407_v39 = vmax.f32 %v391_v29, 0.0  ;;  %v415_v40 = vmax.f32 %v399_v30, 0.0 }
  0xfd   :  { %v408_v41 = vmax.f32 %v392_v35, 0.0  ;;  %v416_v42 = vmax.f32 %v400_v36, 0.0 }
  0xff   :  { %v423_v43 = vpack.c.bf16 %v408_v41, %v407_v39  ;;  %v427_v44 = vpack.c.bf16 %v416_v42, %v415_v40 }
 0x100   :  { %v278_v45 = vpop.f32.mrb[4].mxu0  ;;  %v310_v46 = vpop.f32.mrb[4].mxu1 }
 0x101   :  { %431 = vst [vmem:[%s681_s3] sm:$0xff] %v423_v43  ;;  %435 = vst [vmem:[%s681_s3 + $0x20] sm:$0xff] %v427_v44  ;;  %v393_v47 = vadd.f32 %v636_v26, %v278_v45  ;;  %v401_v48 = vadd.f32 %v636_v26, %v310_v46  ;;  %v280_v49 = vpop.f32.mrb[5].mxu0  ;;  %v312_v50 = vpop.f32.mrb[5].mxu1 }
 0x102   :  { %v281_v51 = vpop.f32.mrb[6].mxu0  ;;  %v313_v52 = vpop.f32.mrb[6].mxu1 }
 0x103   :  { %v394_v53 = vadd.f32 %v636_v26, %v281_v51  ;;  %v402_v54 = vadd.f32 %v636_v26, %v313_v52  ;;  %v283_v55 = vpop.f32.mrb[7].mxu0  ;;  %v315_v56 = vpop.f32.mrb[7].mxu1  ;;  %v409_v57 = vmax.f32 %v393_v47, 0.0  ;;  %v417_v58 = vmax.f32 %v401_v48, 0.0 }
 0x105   :  { %v410_v59 = vmax.f32 %v394_v53, 0.0  ;;  %v418_v60 = vmax.f32 %v402_v54, 0.0 }
 0x107   :  { %v424_v61 = vpack.c.bf16 %v410_v59, %v409_v57  ;;  %v428_v62 = vpack.c.bf16 %v418_v60, %v417_v58 }
 0x108   :  { %v286_v63 = vpop.f32.mrb[8].mxu0  ;;  %v318_v0 = vpop.f32.mrb[8].mxu1 }
 0x109   :  { %432 = vst [vmem:[%s681_s3 + $0x8] sm:$0xff] %v424_v61  ;;  %436 = vst [vmem:[%s681_s3 + $0x28] sm:$0xff] %v428_v62  ;;  %v395_v1 = vadd.f32 %v636_v26, %v286_v63  ;;  %v403_v2 = vadd.f32 %v636_v26, %v318_v0  ;;  %v288_v3 = vpop.f32.mrb[9].mxu0  ;;  %v320_v4 = vpop.f32.mrb[9].mxu1 }
 0x10a   :  { %v289_v5 = vpop.f32.mrb[10].mxu0  ;;  %v321_v6 = vpop.f32.mrb[10].mxu1 }
 0x10b   :  { %v396_v7 = vadd.f32 %v636_v26, %v289_v5  ;;  %v404_v8 = vadd.f32 %v636_v26, %v321_v6  ;;  %v291_v9 = vpop.f32.mrb[11].mxu0  ;;  %v323_v10 = vpop.f32.mrb[11].mxu1  ;;  %v411_v11 = vmax.f32 %v395_v1, 0.0  ;;  %v419_v12 = vmax.f32 %v403_v2, 0.0 }
 0x10d   :  { %v412_v13 = vmax.f32 %v396_v7, 0.0  ;;  %v420_v14 = vmax.f32 %v404_v8, 0.0 }
 0x10f   :  { %v425_v15 = vpack.c.bf16 %v412_v13, %v411_v11  ;;  %v429_v16 = vpack.c.bf16 %v420_v14, %v419_v12 }
 0x110   :  { %v294_v17 = vpop.f32.mrb[12].mxu0  ;;  %v326_v18 = vpop.f32.mrb[12].mxu1 }
 0x111   :  { %433 = vst [vmem:[%s681_s3 + $0x10] sm:$0xff] %v425_v15  ;;  %437 = vst [vmem:[%s681_s3 + $0x30] sm:$0xff] %v429_v16  ;;  %v397_v19 = vadd.f32 %v636_v26, %v294_v17  ;;  %v405_v20 = vadd.f32 %v636_v26, %v326_v18  ;;  %v296_v21 = vpop.f32.mrb[13].mxu0  ;;  %v328_v22 = vpop.f32.mrb[13].mxu1 }
 0x112   :  { %v297_v23 = vpop.f32.mrb[14].mxu0  ;;  %v329_v24 = vpop.f32.mrb[14].mxu1 }
 0x113   :  { %v398_v25 = vadd.f32 %v636_v26, %v297_v23  ;;  %v406_v27 = vadd.f32 %v636_v26, %v329_v24  ;;  %v299_v28 = vpop.f32.mrb[15].mxu0  ;;  %v331_v29 = vpop.f32.mrb[15].mxu1  ;;  %v413_v30 = vmax.f32 %v397_v19, 0.0  ;;  %v421_v31 = vmax.f32 %v405_v20, 0.0 }
 0x115   :  { %v414_v32 = vmax.f32 %v398_v25, 0.0  ;;  %v422_v33 = vmax.f32 %v406_v27, 0.0 }
 0x117   :  { %v426_v34 = vpack.c.bf16 %v414_v32, %v413_v30  ;;  %v430_v35 = vpack.c.bf16 %v422_v33, %v421_v31 }
 0x119   :  { %434 = vst [vmem:[%s681_s3 + $0x18] sm:$0xff] %v426_v34  ;;  %438 = vst [vmem:[%s681_s3 + $0x38] sm:$0xff] %v430_v35 }

// kernel: retinanet_forward.19
= control target key start
LH: loop header
LB: loop body
LE: loop exit
PB: predicated region body
PF: predicated region fallthrough
CT: control target
= control target key end

     0   :  { %s1176_s12 = smov 0   ;;  %s1301_s0 = inlined_call_operand.vmem [shape: bf16[2,52,16], index: 0, kind: input, shape index: {}]   ;;  %s1302_s1 = inlined_call_operand.vmem [shape: bf16[9,16,16], index: 1, kind: input, shape index: {}]   ;;  %s1303_s2 = inlined_call_operand.vmem [shape: f32[1,16], index: 2, kind: input, shape index: {}]   ;;  %s1304_s3 = inlined_call_operand.vmem [shape: bf16[2,24,16], index: 3, kind: output, shape index: {}]  }
   0x1 LB: > { %s963_s13 = sadd.s32 4294967295, %s1154_s12   ;;  %p967_p0 = scmp.ge.s32.totalorder %s1154_s12, 1  ;;  %s1154_s12 = sphi %s1176_s12, %s13_s12  }
   0x2   : > { %p137_p1 = scmp.lt.s32.totalorder %s1154_s12, 3 }
   0x4   : > { %p138_p2 = pnand %p967_p0, %p137_p1 }
   0x5   : > { %v1126_v0 = vld [vmem:[%s1302_s1 + $0x8] sm:$0xff] (!%p138_p2)   ;;  %p161_p3 = scmp.lt.s32.totalorder (!%p138_p2), %s963_s13, 1  ;;  %v1127_v1 = vld [vmem:[%s1302_s1] sm:$0xff] (!%p138_p2)   ;;  %v1195_v2 = vld [vmem:[%s1302_s1 + $0x10] sm:$0xff] (!%p138_p2)   ;;  %vm213_vm0 = vcmask (!%p138_p2), 130048   ;;  %vm335_vm2 = vcmask (!%p138_p2), 1046528  }
   0x6   : > { %141 = sbr.rel (%p138_p2) target bundleno = 282 (0x11a), region = 32  ;;  %1062 = vmatprep.subr.bf16.mxu0 (!%p138_p2), %v1126_v0  ;;  %1068 = vmatprep.subr.bf16.mxu1 (!%p138_p2), %v1127_v1  ;;  %v1132_v3 = vld [vmem:[%s1302_s1 + $0x18] sm:$0xff] (!%p138_p2)   ;;  %vm191_vm1 = vsmask.f32 (!%p138_p2), 7424  ;;  %vm413_vm3 = vcmask (!%p138_p2), 1044480   ;;  %v1217_v7 = vld [vmem:[%s1302_s1 + $0x28] sm:$0xff] (!%p138_p2)  }
   0x7   : > { %1063 = vmatpush3.bf16.msra.mxu0 (!%p138_p2), %v1126_v0  ;;  %1069 = vmatpush3.bf16.msra.mxu1 (!%p138_p2), %v1127_v1  ;;  %v1134_v45 = vld [vmem:[%s1302_s1 + $0x20] sm:$0xff] (!%p138_p2)   ;;  %v1142_v51 = vld [vmem:[%s1302_s1 + $0x38] sm:$0xff] (!%p138_p2)   ;;  %vm487_vm4 = vsmask.f32 (!%p138_p2), 4352  ;;  %vm727_vm5 = vsmask.f32 (!%p138_p2), 5376 }
   0x8   : > { %1074 = vmatprep.subr.bf16.mxu0 (!%p138_p2), %v1195_v2  ;;  %1080 = vmatprep.subr.bf16.mxu1 (!%p138_p2), %v1132_v3  ;;  %vm653_vm6 = vcmask (!%p138_p2), 1045504   ;;  %vm904_vm7 = vcmask (!%p138_p2), 125952  }
   0xd   : > { %s1306_s13 = smov (!%p161_p3, %s963_s13), 1 }
   0xe   : > { %s1116_s20 = smul.u32 28, %s1306_s13 }
   0xf   : > { %s1117_s9 = smul.u32 12, %s1306_s13 }
  0x10   : > { %s1205_s25 = scalar_lea.vmem %s1301_s0, %s1116_s20 }
  0x11   : > { %v172_v4 = vld [vmem:[%s1205_s25] sm:$0xf]  ;;  %v1209_v5 = vld [vmem:[%s1205_s25 + $0x4] sm:$0xf]  ;;  %v1212_v6 = vld [vmem:[%s1205_s25 + $0x8] sm:$0xf]  ;;  %s170_s16 = scalar_lea.vmem %s1304_s3, %s1117_s9 }
  0x12   : > { %v177_v8 = vld [vmem:[%s1205_s25 + $0xc] sm:$0x1]  ;;  %v972_v9 = vcombine.low %v172_v4, %v1209_v5  ;;  %v977_v10 = vcombine.low %v1212_v6, %v1212_v6  ;;  %v328_v11 = vld [vmem:[%s1205_s25] sm:$0xe]  ;;  %v636_v30 = vld [vmem:[%s1205_s25 + $0x4] sm:$0xc]  ;;  %v1002_v49 = vcombine.low %v1209_v5, %v1212_v6 }
  0x13   : > { %v402_v12 = vld [vmem:[%s1205_s25] sm:$0x8]  ;;  %v1226_v13 = vcombine.low %v1212_v6, %v177_v8  ;;  %v983_v14 = vcombine.low %v328_v11, %v1209_v5  ;;  %v403_v15 = vld [vmem:[%s1205_s25 + $0xc] sm:$0x7]  ;;  %v1245_v34 = vld [vmem:[%s1205_s25 + $0x8] sm:$0xf] }
  0x14   : > { %v989_v16 = vcombine.low %v402_v12, %v1209_v5  ;;  %v1232_v17 = vld [vmem:[%s1205_s25 + $0xc] sm:$0xf]  ;;  %v193_v18 = vshrl.u32 %v972_v9, 16  ;;  %v195_v19 = vshll.u32 %v972_v9, 16  ;;  %1070 = vmatprep.mubr.msk.bf16.mxu1 %vm213_vm0, %v972_v9  ;;  %v990_v20 = vcombine.low %v1212_v6, %v403_v15  ;;  %v720_v43 = vld [vmem:[%s1205_s25 + $0x10] sm:$0x7] }
  0x15   : > { %v996_v21 = vcombine.low %v1212_v6, %v1232_v17  ;;  %v200_v22 = vshll.u32 %v1226_v13, 16  ;;  %v204_v23 = vshrl.u32 %v1226_v13, 16  ;;  %1071 = vmatmul.mubr.msk.bf16.vlgmr.msra.gmra.mrb[0].mxu1 %vm213_vm0, %v977_v10  ;;  %v336_v24 = vrot.slane %v983_v14, 1  ;;  %v638_v38 = vld [vmem:[%s1205_s25 + $0xc] sm:$0xf]  ;;  %v1146_v10 = vld [vmem:[%s1302_s1 + $0x40] sm:$0xff]  }
  0x16   : > { %v337_v25 = vrot.slane %v1226_v13, 1  ;;  %v197_v26 = vrot.slane %v195_v19, 1  ;;  %1081 = vmatpush3.bf16.msra.mxu1 %v1132_v3  ;;  %v414_v27 = vrot.slane %v989_v16, 3  ;;  %v415_v28 = vrot.slane %v990_v20, 3  ;;  %v639_v59 = vld [vmem:[%s1205_s25 + $0x10] sm:$0x3] }
  0x17   : > { %v489_v29 = vshrl.u32 %v989_v16, 16  ;;  %v202_v31 = vrot.slane %v200_v22, 1  ;;  %1092 = vmatprep.subr.bf16.mxu1 %v1217_v7  ;;  %v492_v32 = vshll.u32 %v989_v16, 16  ;;  %v497_v33 = vshrl.u32 %v996_v21, 16  ;;  %v808_v8 = vld [vmem:[%s1205_s25 + $0x4] sm:$0x8] }
  0x18   : > { %v198_v35 = vor.u32 %v197_v26, %v193_v18  ;;  %v416_v36 = vsel %vm413_vm3, %v414_v27, %v415_v28  ;;  %v500_v37 = vshll.u32 %v996_v21, 16  ;;  %v338_v40 = vsel %vm335_vm2, %v336_v24, %v337_v25 }
  0x19   : > { %v206_v39 = vor.u32 %v204_v23, %v202_v31  ;;  %1082 = vmatprep.mubr.msk.bf16.mxu1 %vm213_vm0, %v416_v36  ;;  %v491_v41 = vrot.slane %v489_v29, 3  ;;  %v494_v42 = vrot.slane %v492_v32, 4  ;;  %v499_v46 = vrot.slane %v497_v33, 3 }
  0x1a   : > { %v203_v44 = vsel %vm191_vm1, %v198_v35, %v202_v31  ;;  %v502_v47 = vrot.slane %v500_v37, 4  ;;  %v1009_v48 = vcombine.low %v636_v30, %v1245_v34  ;;  %v1016_v50 = vcombine.low %v638_v38, %v720_v43 }
  0x1b   : > { %1064 = vmatprep.mubr.msk.bf16.mxu0 %vm213_vm0, %v203_v44  ;;  %v495_v56 = vor.u32 %v494_v42, %v491_v41  ;;  %v1003_v3 = vcombine.low %v1232_v17, %v1232_v17  ;;  %v1010_v4 = vcombine.low %v638_v38, %v639_v59  ;;  %v1022_v11 = vcombine.low %v808_v8, %v1245_v34 }
  0x1c   : > { %1065 = vmatmul.mubr.msk.bf16.vlgmr.msra.gmra.mrb[0].mxu0 %vm213_vm0, %v206_v39  ;;  %v729_v52 = vshrl.u32 %v1009_v48, 16  ;;  %v732_v53 = vshll.u32 %v1009_v48, 16  ;;  %v737_v54 = vshrl.u32 %v1016_v50, 16  ;;  %v740_v55 = vshll.u32 %v1016_v50, 16 }
  0x1d   : > { %1075 = vmatpush3.bf16.msra.mxu0 %v1195_v2  ;;  %1076 = vmatprep.mubr.msk.bf16.mxu0 %vm213_vm0, %v338_v40  ;;  %v503_v57 = vor.u32 %v502_v47, %v499_v46  ;;  %v1139_v2 = vld [vmem:[%s1302_s1 + $0x30] sm:$0xff]   ;;  %v654_v6 = vrot.slane %v1009_v48, 2  ;;  %v815_v12 = vrot.slane %v1022_v11, 3  ;;  %v816_v13 = vrot.slane %v1016_v50, 3 }
  0x1e   : > { %1086 = vmatprep.subr.bf16.mxu0 %v1134_v45  ;;  %1083 = vmatmul.mubr.msk.bf16.vlgmr.msra.gmra.mrb[4].mxu1 %vm213_vm0, %v415_v28  ;;  %v731_v58 = vrot.slane %v729_v52, 2  ;;  %v734_v60 = vrot.slane %v732_v53, 3  ;;  %v739_v61 = vrot.slane %v737_v54, 2  ;;  %v742_v62 = vrot.slane %v740_v55, 3 }
  0x1f   : > { %1093 = vmatpush3.bf16.msra.mxu1 %v1217_v7  ;;  %1094 = vmatprep.mubr.msk.bf16.mxu1 %vm213_vm0, %v1002_v49  ;;  %v504_v1 = vsel %vm487_vm4, %v495_v56, %v503_v57  ;;  %v655_v7 = vrot.slane %v1010_v4, 2  ;;  %v817_v14 = vsel %vm413_vm3, %v815_v12, %v816_v13 }
  0x20   : > { %1104 = vmatprep.subr.bf16.mxu1 %v1142_v51  ;;  %v735_v63 = vor.u32 %v734_v60, %v731_v58  ;;  %v743_v0 = vor.u32 %v742_v62, %v739_v61 }
  0x21   : > { %v656_v9 = vsel %vm653_vm6, %v654_v6, %v655_v7 }
  0x22   : > { %v744_v5 = vsel %vm727_vm5, %v735_v63, %v743_v0 }
  0x24   : > { %1077 = vmatmul.mubr.msk.bf16.vlgmr.msra.gmra.mrb[4].mxu0 %vm213_vm0, %v337_v25 }
  0x25   : > { %1087 = vmatpush3.bf16.msra.mxu0 %v1134_v45  ;;  %1088 = vmatprep.mubr.msk.bf16.mxu0 %vm213_vm0, %v504_v1 }
  0x26   : > { %1098 = vmatprep.subr.bf16.mxu0 %v1139_v2  ;;  %1095 = vmatmul.mubr.msk.bf16.vlgmr.msra.gmra.mrb[8].mxu1 %vm213_vm0, %v1003_v3 }
  0x27   : > { %1105 = vmatpush3.bf16.msra.mxu1 %v1142_v51  ;;  %1106 = vmatprep.mubr.msk.bf16.mxu1 %vm213_vm0, %v744_v5  ;;  %v1026_v5 = vld [vmem:[%s1303_s2] ss:$0 sm:$0xff] }
  0x2c   : > { %1089 = vmatmul.mubr.msk.bf16.vlgmr.msra.gmra.mrb[8].mxu0 %vm213_vm0, %v503_v57 }
  0x2d   : > { %1099 = vmatpush3.bf16.msra.mxu0 %v1139_v2  ;;  %1100 = vmatprep.mubr.msk.bf16.mxu0 %vm213_vm0, %v656_v9 }
  0x2e   : > { %1110 = vmatprep.subr.bf16.mxu0 %v1146_v10  ;;  %1107 = vmatmul.mubr.msk.bf16.vlgmr.msra.gmra.mrb[12].mxu1 %vm213_vm0, %v743_v0 }
  0x34   : > { %1101 = vmatmul.mubr.msk.bf16.vlgmr.msra.gmra.mrb[12].mxu0 %vm213_vm0, %v655_v7 }
  0x35   : > { %1111 = vmatpush3.bf16.msra.mxu0 %v1146_v10  ;;  %1112 = vmatprep.mubr.msk.bf16.mxu0 %vm213_vm0, %v817_v14 }
  0x3c   : > { %1113 = vmatmul.mubr.msk.bf16.vlgmr.msra.gmra.mrb[16].mxu0 %vm213_vm0, %v816_v13 }
  0xe8   : > { %v1072_v15 = vpop.f32.mrb[0].mxu1 }
  0xe9   : > { %v314_v16 = vpop.f32.mrb[1].mxu1 }
  0xea   : > { %v1073_v17 = vpop.f32.mrb[2].mxu1 }
  0xeb   : > { %v317_v18 = vpop.f32.mrb[3].mxu1 }
  0xef   : > { %v1066_v19 = vpop.f32.mrb[0].mxu0 }
  0xf0   : > { %v323_v20 = vadd.f32 %v1072_v15, %v1066_v19  ;;  %v254_v21 = vpop.f32.mrb[1].mxu0 }
  0xf1   : > { %v315_v22 = vadd.f32 %v314_v16, %v254_v21  ;;  %v1067_v23 = vpop.f32.mrb[2].mxu0  ;;  %v1084_v24 = vpop.f32.mrb[4].mxu1 }
  0xf2   : > { %v257_v25 = vpop.f32.mrb[3].mxu0  ;;  %v463_v26 = vpop.f32.mrb[5].mxu1 }
  0xf3   : > { %v318_v27 = vadd.f32 %v317_v18, %v257_v25  ;;  %v1085_v28 = vpop.f32.mrb[6].mxu1 }
  0xf4   : > { %v466_v29 = vpop.f32.mrb[7].mxu1 }
  0xf7   : > { %v1078_v30 = vpop.f32.mrb[4].mxu0 }
  0xf8   : > { %v401_v31 = vadd.f32 %v1078_v30, %v323_v20  ;;  %v385_v32 = vpop.f32.mrb[5].mxu0 }
  0xf9   : > { %v399_v33 = vadd.f32 %v385_v32, %v315_v22  ;;  %v1079_v34 = vpop.f32.mrb[6].mxu0  ;;  %v1096_v35 = vpop.f32.mrb[8].mxu1 }
  0xfa   : > { %v479_v36 = vadd.f32 %v1084_v24, %v401_v31  ;;  %v388_v37 = vpop.f32.mrb[7].mxu0  ;;  %v619_v38 = vpop.f32.mrb[9].mxu1 }
  0xfb   : > { %v400_v39 = vadd.f32 %v388_v37, %v318_v27  ;;  %v477_v40 = vadd.f32 %v463_v26, %v399_v33  ;;  %v1097_v41 = vpop.f32.mrb[10].mxu1 }
  0xfc   : > { %v622_v42 = vpop.f32.mrb[11].mxu1 }
  0xfd   : > { %v478_v43 = vadd.f32 %v466_v29, %v400_v39 }
  0xff   : > { %v1090_v44 = vpop.f32.mrb[8].mxu0 }
 0x100   : > { %v567_v45 = vadd.f32 %v1090_v44, %v479_v36  ;;  %v551_v46 = vpop.f32.mrb[9].mxu0 }
 0x101   : > { %v565_v47 = vadd.f32 %v551_v46, %v477_v40  ;;  %v1091_v48 = vpop.f32.mrb[10].mxu0  ;;  %v1108_v49 = vpop.f32.mrb[12].mxu1 }
 0x102   : > { %v635_v50 = vadd.f32 %v1096_v35, %v567_v45  ;;  %v554_v51 = vpop.f32.mrb[11].mxu0  ;;  %v791_v52 = vpop.f32.mrb[13].mxu1 }
 0x103   : > { %v566_v53 = vadd.f32 %v554_v51, %v478_v43  ;;  %v633_v54 = vadd.f32 %v619_v38, %v565_v47  ;;  %v1109_v55 = vpop.f32.mrb[14].mxu1 }
 0x104   : > { %v794_v56 = vpop.f32.mrb[15].mxu1 }
 0x105   : > { %v634_v57 = vadd.f32 %v622_v42, %v566_v53 }
 0x107   : > { %v1102_v58 = vpop.f32.mrb[12].mxu0 }
 0x108   : > { %v719_v59 = vadd.f32 %v1102_v58, %v635_v50  ;;  %v703_v60 = vpop.f32.mrb[13].mxu0 }
 0x109   : > { %v717_v61 = vadd.f32 %v703_v60, %v633_v54  ;;  %v1103_v62 = vpop.f32.mrb[14].mxu0 }
 0x10a   : > { %v807_v63 = vadd.f32 %v1108_v49, %v719_v59  ;;  %v706_v0 = vpop.f32.mrb[15].mxu0 }
 0x10b   : > { %v718_v1 = vadd.f32 %v706_v0, %v634_v57  ;;  %v805_v2 = vadd.f32 %v791_v52, %v717_v61 }
 0x10d   : > { %v806_v3 = vadd.f32 %v794_v56, %v718_v1 }
 0x10f   : > { %v1114_v4 = vpop.f32.mrb[16].mxu0 }
 0x110   : > { %v880_v6 = vadd.f32 %v1114_v4, %v807_v63  ;;  %v864_v7 = vpop.f32.mrb[17].mxu0 }
 0x111   : > { %v878_v8 = vadd.f32 %v864_v7, %v805_v2  ;;  %v1115_v9 = vpop.f32.mrb[18].mxu0 }
 0x112   : > { %v890_v10 = vadd.f32 %v1026_v5, %v880_v6  ;;  %v867_v11 = vpop.f32.mrb[19].mxu0 }
 0x113   : > { %v888_v12 = vadd.f32 %v1026_v5, %v878_v8  ;;  %v879_v13 = vadd.f32 %v867_v11, %v806_v3 }
 0x114   : > { %v1034_v14 = vpack.c.bf16 %v890_v10, %v890_v10 }
 0x115   : > { %v1032_v15 = vpack.c.bf16 %v888_v12, %v888_v12  ;;  %v889_v16 = vadd.f32 %v1026_v5, %v879_v13 }
 0x116   : > { %907 = vst.msk [vmem:[%s170_s16 + $0x8] sm:$0xf] %vm904_vm7, %v1034_v14 }
 0x117   : > { %905 = vst.msk [vmem:[%s170_s16] sm:$0xf] %vm904_vm7, %v1032_v15  ;;  %v1033_v17 = vpack.c.bf16 %v889_v16, %v889_v16 }
 0x119   : > { %906 = vst.msk [vmem:[%s170_s16 + $0x4] sm:$0xf] %vm904_vm7, %v1033_v17 }
 0x11a PF: > { %s13_s12 = sadd.s32 1, %s1154_s12  }
 0x11b   : > { %p10_p4 = scmp.ge.s32.totalorder %s13_s12, 4  }
 0x11d   :  { %12 = sbr.rel (!%p10_p4) target bundleno = 1 (0x1), region = 70 }

// kernel: retinanet_forward.18
= control target key start
LH: loop header
LB: loop body
LE: loop exit
PB: predicated region body
PF: predicated region fallthrough
CT: control target
= control target key end

     0   :  { %s2032_s12 = smov 0   ;;  %s2441_s0 = inlined_call_operand.vmem [shape: bf16[2,116,16], index: 0, kind: input, shape index: {}]   ;;  %s2442_s1 = inlined_call_operand.vmem [shape: bf16[9,16,16], index: 1, kind: input, shape index: {}]   ;;  %s2443_s2 = inlined_call_operand.vmem [shape: f32[1,16], index: 2, kind: input, shape index: {}]   ;;  %s2444_s3 = inlined_call_operand.vmem [shape: bf16[2,80,16], index: 3, kind: output, shape index: {}]  }
   0x1 LB: > { %s1581_s13 = sadd.s32 4294967295, %s2008_s12   ;;  %p1585_p0 = scmp.ge.s32.totalorder %s2008_s12, 1  ;;  %s2008_s12 = sphi %s2032_s12, %s13_s12  }
   0x2   : > { %p137_p1 = scmp.lt.s32.totalorder %s2008_s12, 3 }
   0x4   : > { %p138_p2 = pnand %p1585_p0, %p137_p1 }
   0x5   : > { %v1970_v0 = vld [vmem:[%s2442_s1 + $0x8] sm:$0xff] (!%p138_p2)   ;;  %v2010_v1 = vmov (!%p138_p2), 0.0   ;;  %p161_p3 = scmp.lt.s32.totalorder (!%p138_p2), %s1581_s13, 1  ;;  %vm2011_vm0 = vmmov (!%p138_p2), 0   ;;  %vm216_vm1 = vsmask.f32 (!%p138_p2), 7424 }
   0x6   : > { %141 = sbr.rel (%p138_p2) target bundleno = 424 (0x1a8), region = 32  ;;  %1758 = vmatprep.subr.bf16.mxu0 (!%p138_p2), %v2010_v1  ;;  %1956 = vmatprep.subr.bf16.mxu1 (!%p138_p2), %v2010_v1  ;;  %vm267_vm2 = vcmask (!%p138_p2), 130048   ;;  %v1975_v20 = vld [vmem:[%s2442_s1 + $0x10] sm:$0xff] (!%p138_p2)   ;;  %v1976_v24 = vld [vmem:[%s2442_s1] sm:$0xff] (!%p138_p2)   ;;  %vm452_vm3 = vcmask (!%p138_p2), 1046528   ;;  %v1979_v46 = vld [vmem:[%s2442_s1 + $0x18] sm:$0xff] (!%p138_p2)  }
   0x7   : > { %1759 = vmatpush3.bf16.msra.mxu0 (!%p138_p2), %v1970_v0  ;;  %1957 = vmatpush3.bf16.msra.mxu1 (!%p138_p2), %v1970_v0  ;;  %v1981_v50 = vld [vmem:[%s2442_s1 + $0x20] sm:$0xff] (!%p138_p2)   ;;  %vm732_vm4 = vsmask.f32 (!%p138_p2), 6400  ;;  %vm897_vm5 = vcmask (!%p138_p2), 1045504   ;;  %vm1177_vm6 = vsmask.f32 (!%p138_p2), 5376 }
   0x8   : > { %1760 = vmatprep.mubr.msk.bf16.mxu0 (!%p138_p2), %vm2011_vm0, %v2010_v1  ;;  %1772 = vmatprep.mubr.msk.bf16.mxu1 (!%p138_p2), %vm2011_vm0, %v2010_v1  ;;  %vm1342_vm7 = vcmask (!%p138_p2), 1044480   ;;  %vm1515_vm8 = vcmask (!%p138_p2), 125952  }
   0x9   : > { %1802 = vmatprep.subr.bf16.mxu0 (!%p138_p2), %v2010_v1  ;;  %1780 = vmatprep.subr.bf16.mxu1 (!%p138_p2), %v2010_v1 }
   0xd   : > { %s2446_s13 = smov (!%p161_p3, %s1581_s13), 1 }
   0xe   : > { %s1958_s16 = smul.u32 60, %s2446_s13 }
   0xf   : > { %s1959_s9 = smul.u32 40, %s2446_s13 }
  0x10   : > { %s2057_s19 = scalar_lea.vmem %s2441_s0, %s1958_s16 }
  0x11   : > { %v172_v2 = vld [vmem:[%s2057_s19] sm:$0xf]  ;;  %v173_v3 = vld [vmem:[%s2057_s19 + $0x4] sm:$0xf]  ;;  %v2062_v5 = vld [vmem:[%s2057_s19 + $0x8] sm:$0xff]   ;;  %s2402_s13 = scalar_lea.vmem %s2444_s3, %s1959_s9 }
  0x12   : > { %v1590_v4 = vcombine.low %v172_v2, %v173_v3  ;;  %v225_v8 = vshll.u32 %v2062_v5, 16  ;;  %v2066_v9 = vld [vmem:[%s2057_s19 + $0x18] sm:$0xff]   ;;  %v2069_v10 = vld [vmem:[%s2057_s19 + $0x20] sm:$0xff]   ;;  %v2072_v11 = vld [vmem:[%s2057_s19 + $0x10] sm:$0xff]   ;;  %v229_v21 = vshrl.u32 %v2062_v5, 16  ;;  %v454_v48 = vrot.slane %v2062_v5, 1 }
  0x13   : > { %v241_v14 = vshll.u32 %v2066_v9, 16  ;;  %v245_v15 = vshrl.u32 %v2066_v9, 16  ;;  %v249_v16 = vshll.u32 %v2069_v10, 16  ;;  %v2078_v17 = vld [vmem:[%s2057_s19 + $0x28] ss:$0 sps:$4 sm:$0x11]  }
  0x14   : > { %v218_v6 = vshrl.u32 %v1590_v4, 16  ;;  %v220_v7 = vshll.u32 %v1590_v4, 16  ;;  %v227_v13 = vrot.slane %v225_v8, 1  ;;  %v233_v22 = vshll.u32 %v2072_v11, 16  ;;  %v2103_v36 = vld [vmem:[%s2057_s19 + $0x24] sm:$0xff]   ;;  %v2170_v60 = vld [vmem:[%s2057_s19 + $0xc] sm:$0xff]  }
  0x15   : > { %v243_v19 = vrot.slane %v241_v14, 1  ;;  %v251_v23 = vrot.slane %v249_v16, 1  ;;  %v253_v27 = vshrl.u32 %v2069_v10, 16  ;;  %v257_v28 = vshll.u32 %v2078_v17, 16  ;;  %v445_v40 = vld [vmem:[%s2057_s19] sm:$0xe] }
  0x16   : > { %v222_v12 = vrot.slane %v220_v7, 1  ;;  %v231_v30 = vor.u32 %v229_v21, %v227_v13  ;;  %v235_v31 = vrot.slane %v233_v22, 1  ;;  %v237_v35 = vshrl.u32 %v2072_v11, 16  ;;  %v1989_v37 = vld [vmem:[%s2057_s19 + $0x2c] ss:$0 sps:$4 sm:$0x11]  }
  0x17   : > { %v247_v26 = vor.u32 %v245_v15, %v243_v19  ;;  %v255_v32 = vor.u32 %v253_v27, %v251_v23  ;;  %v259_v33 = vrot.slane %v257_v28, 1  ;;  %v617_v41 = vrot.slane %v2103_v36, 1  ;;  %v568_v56 = vld [vmem:[%s2057_s19 + $0x4] sm:$0xe]  ;;  %v2165_v57 = vld [vmem:[%s2057_s19 + $0x8] sm:$0xf] }
  0x18   : > { %v223_v18 = vor.u32 %v222_v12, %v218_v6  ;;  %v236_v34 = vsel %vm216_vm1, %v231_v30, %v235_v31  ;;  %v239_v39 = vor.u32 %v237_v35, %v235_v31  ;;  %v619_v42 = vrot.slane %v1989_v37, 1  ;;  %v1984_v12 = vld [vmem:[%s2442_s1 + $0x28] sm:$0xff]  }
  0x19   : > { %v252_v29 = vsel %vm216_vm1, %v247_v26, %v251_v23  ;;  %v260_v38 = vsel %vm216_vm1, %v255_v32, %v259_v33  ;;  %v1610_v45 = vcombine.low %v445_v40, %v173_v3  ;;  %v456_v51 = vrot.slane %v2072_v11, 1  ;;  %v2207_v23 = vld [vmem:[%s2057_s19 + $0x1c] sm:$0xff]  }
  0x1a   : > { %v228_v25 = vsel %vm216_vm1, %v223_v18, %v227_v13  ;;  %1773 = vmatmul.mubr.msk.bf16.vlgmr.msra.gmra.mrb[0].mxu1 %vm267_vm2, %v252_v29  ;;  %v2118_v43 = vsel %vm452_vm3, %v617_v41, %v619_v42  ;;  %v244_v44 = vsel %vm216_vm1, %v239_v39, %v243_v19  ;;  %v458_v53 = vrot.slane %v2066_v9, 1  ;;  %v2189_v13 = vld [vmem:[%s2057_s19 + $0x14] sm:$0xff]   ;;  %v2231_v39 = vld [vmem:[%s2057_s19 + $0x2c] ss:$0 sps:$4 sm:$0x33]  }
  0x1b   : > { %1761 = vmatmul.mubr.msk.bf16.vlgmr.msra.gmra.mrb[0].mxu0 %vm267_vm2, %v228_v25  ;;  %1781 = vmatpush3.bf16.msra.mxu1 %v1976_v24  ;;  %v453_v47 = vrot.slane %v1610_v45, 1  ;;  %v457_v52 = vsel %vm452_vm3, %v454_v48, %v456_v51  ;;  %v460_v55 = vrot.slane %v2069_v10, 1  ;;  %v1619_v59 = vcombine.low %v568_v56, %v2165_v57  ;;  %v1986_v19 = vld [vmem:[%s2442_s1 + $0x30] sm:$0xff]  }
  0x1c   : > { %1803 = vmatpush3.bf16.msra.mxu0 %v1975_v20  ;;  %1764 = vmatprep.mubr.msk.bf16.mxu0 %vm2011_vm0, %v2010_v1  ;;  %v459_v54 = vsel %vm452_vm3, %v456_v51, %v458_v53  ;;  %v462_v61 = vrot.slane %v2078_v17, 1  ;;  %v742_v0 = vshrl.u32 %v2170_v60, 16  ;;  %v745_v2 = vshll.u32 %v2170_v60, 16  ;;  %v1013_v51 = vld [vmem:[%s2057_s19 + $0x8] sm:$0xc] }
  0x1d   : > { %1846 = vmatprep.subr.bf16.mxu0 %v2010_v1  ;;  %1776 = vmatprep.mubr.msk.bf16.mxu1 %vm2011_vm0, %v2010_v1  ;;  %v455_v49 = vsel %vm452_vm3, %v453_v47, %v454_v48  ;;  %v461_v58 = vsel %vm452_vm3, %v458_v53, %v460_v55  ;;  %v734_v62 = vshrl.u32 %v1619_v59, 16  ;;  %v737_v63 = vshll.u32 %v1619_v59, 16 }
  0x1e   : > { %1824 = vmatprep.subr.bf16.mxu1 %v2010_v1  ;;  %v610_v3 = vrot.slane %v1619_v59, 1  ;;  %v744_v8 = vrot.slane %v742_v0, 1  ;;  %v751_v15 = vshrl.u32 %v2189_v13, 16  ;;  %v754_v16 = vshll.u32 %v2189_v13, 16  ;;  %v2281_v0 = vld [vmem:[%s2057_s19 + $0x18] sm:$0xff]  }
  0x1f   : > { %v736_v6 = vrot.slane %v734_v62, 1  ;;  %v739_v7 = vrot.slane %v737_v63, 2  ;;  %v613_v17 = vrot.slane %v2189_v13, 1  ;;  %v760_v25 = vshrl.u32 %v2207_v23, 16  ;;  %v1995_v63 = vld [vmem:[%s2442_s1 + $0x40] sm:$0xff]  }
  0x20   : > { %v753_v20 = vrot.slane %v751_v15, 1  ;;  %v756_v21 = vrot.slane %v754_v16, 2  ;;  %v763_v26 = vshll.u32 %v2207_v23, 16  ;;  %v615_v27 = vrot.slane %v2207_v23, 1 }
  0x21   : > { %v762_v29 = vrot.slane %v760_v25, 1  ;;  %v769_v33 = vshrl.u32 %v2103_v36, 16  ;;  %v781_v45 = vshll.u32 %v2231_v39, 16 }
  0x22   : > { %1777 = vmatmul.mubr.msk.bf16.gmra.mrb[4].mxu1 %vm267_vm2, %v260_v38  ;;  %v757_v24 = vor.u32 %v756_v21, %v753_v20  ;;  %v765_v30 = vrot.slane %v763_v26, 2  ;;  %v616_v31 = vsel %vm452_vm3, %v613_v17, %v615_v27  ;;  %v618_v40 = vsel %vm452_vm3, %v615_v27, %v617_v41  ;;  %v1335_v26 = vld [vmem:[%s2057_s19 + $0x8] sm:$0x8] }
  0x23   : > { %1765 = vmatmul.mubr.msk.bf16.gmra.mrb[4].mxu0 %vm267_vm2, %v236_v34  ;;  %1782 = vmatprep.mubr.msk.bf16.mxu1 %vm2011_vm0, %v2010_v1  ;;  %v772_v34 = vshll.u32 %v2103_v36, 16  ;;  %v771_v37 = vrot.slane %v769_v33, 1  ;;  %v783_v48 = vrot.slane %v781_v45, 2 }
  0x24   : > { %1768 = vmatprep.mubr.msk.bf16.mxu0 %vm2011_vm0, %v2010_v1  ;;  %v766_v32 = vor.u32 %v765_v30, %v762_v29  ;;  %v1196_v29 = vshrl.u32 %v2281_v0, 16  ;;  %v1199_v30 = vshll.u32 %v2281_v0, 16 }
  0x25   : > { %v774_v38 = vrot.slane %v772_v34, 2 }
  0x26   : > { %v767_v35 = vsel %vm732_vm4, %v757_v24, %v766_v32  ;;  %v1198_v34 = vrot.slane %v1196_v29, 2 }
  0x27   : > { %v775_v42 = vor.u32 %v774_v38, %v771_v37 }
  0x29   : > { %v776_v41 = vsel %vm732_vm4, %v766_v32, %v775_v42 }
  0x2a   : > { %1783 = vmatmul.mubr.msk.bf16.vlgmr.msra.gmra.mrb[8].mxu1 %vm267_vm2, %v1590_v4  ;;  %v611_v4 = vrot.slane %v2170_v60, 1 }
  0x2b   : > { %1769 = vmatmul.mubr.msk.bf16.gmra.mrb[8].mxu0 %vm267_vm2, %v244_v44  ;;  %1825 = vmatpush3.bf16.msra.mxu1 %v1979_v46  ;;  %v778_v44 = vshrl.u32 %v2231_v39, 16  ;;  %v890_v46 = vld [vmem:[%s2057_s19 + $0x4] sm:$0xc] }
  0x2c   : > { %1804 = vmatprep.mubr.msk.bf16.mxu0 %vm2011_vm0, %v2010_v1  ;;  %1786 = vmatprep.mubr.msk.bf16.mxu1 %vm2011_vm0, %v2010_v1  ;;  %v614_v22 = vsel %vm452_vm3, %v611_v4, %v613_v17 }
  0x2d   : > { %1868 = vmatprep.subr.bf16.mxu1 %v2010_v1  ;;  %v780_v47 = vrot.slane %v778_v44, 1 }
  0x32   : > { %1787 = vmatmul.mubr.msk.bf16.gmra.mrb[12].mxu1 %vm267_vm2, %v2062_v5  ;;  %v463_v5 = vsel %vm452_vm3, %v460_v55, %v462_v61  ;;  %v901_v61 = vrot.slane %v2189_v13, 2 }
  0x33   : > { %1805 = vmatmul.mubr.msk.bf16.vlgmr.msra.gmra.mrb[12].mxu0 %vm267_vm2, %v455_v49  ;;  %1790 = vmatprep.mubr.msk.bf16.mxu1 %vm2011_vm0, %v2010_v1  ;;  %v1642_v49 = vcombine.low %v890_v46, %v2165_v57  ;;  %v2262_v57 = vld [vmem:[%s2057_s19 + $0x10] sm:$0xff]  }
  0x34   : > { %1847 = vmatpush3.bf16.msra.mxu0 %v1981_v50  ;;  %1808 = vmatprep.mubr.msk.bf16.mxu0 %vm2011_vm0, %v2010_v1  ;;  %v784_v50 = vor.u32 %v783_v48, %v780_v47  ;;  %v1187_v16 = vshrl.u32 %v2262_v57, 16  ;;  %v1190_v17 = vshll.u32 %v2262_v57, 16  ;;  %v1344_v38 = vrot.slane %v2262_v57, 3 }
  0x35   : > { %1890 = vmatprep.subr.bf16.mxu0 %v2010_v1  ;;  %v898_v53 = vrot.slane %v1642_v49, 2  ;;  %v1346_v47 = vrot.slane %v2281_v0, 3 }
  0x36   : > { %v785_v55 = vsel %vm732_vm4, %v775_v42, %v784_v50 }
  0x3a   : > { %1791 = vmatmul.mubr.msk.bf16.gmra.mrb[16].mxu1 %vm267_vm2, %v2072_v11  ;;  %v612_v11 = vsel %vm452_vm3, %v610_v3, %v611_v4  ;;  %v1058_v3 = vrot.slane %v2281_v0, 2  ;;  %v903_v4 = vrot.slane %v2207_v23, 2  ;;  %v1189_v23 = vrot.slane %v1187_v16, 2 }
  0x3b   : > { %1809 = vmatmul.mubr.msk.bf16.gmra.mrb[16].mxu0 %vm267_vm2, %v457_v52  ;;  %1794 = vmatprep.mubr.msk.bf16.mxu1 %vm2011_vm0, %v2010_v1  ;;  %v2254_v52 = vld [vmem:[%s2057_s19 + $0xc] sm:$0xf] }
  0x3c   : > { %1812 = vmatprep.mubr.msk.bf16.mxu0 %vm2011_vm0, %v2010_v1  ;;  %v1651_v56 = vcombine.low %v1013_v51, %v2254_v52  ;;  %v1674_v32 = vcombine.low %v1335_v26, %v2254_v52  ;;  %v1347_v51 = vsel %vm1342_vm7, %v1344_v38, %v1346_v47 }
  0x3e   : > { %v1055_v59 = vrot.slane %v1651_v56, 2  ;;  %v1182_v15 = vshll.u32 %v1651_v56, 16  ;;  %v1343_v37 = vrot.slane %v1674_v32, 3 }
  0x40   : > { %v1345_v44 = vsel %vm1342_vm7, %v1343_v37, %v1344_v38 }
  0x42   : > { %1795 = vmatmul.mubr.msk.bf16.gmra.mrb[20].mxu1 %vm267_vm2, %v2066_v9  ;;  %v747_v9 = vrot.slane %v745_v2, 2 }
  0x43   : > { %1813 = vmatmul.mubr.msk.bf16.gmra.mrb[20].mxu0 %vm267_vm2, %v459_v54  ;;  %1798 = vmatprep.mubr.msk.bf16.mxu1 %vm2011_vm0, %v2010_v1  ;;  %v899_v54 = vrot.slane %v2170_v60, 2  ;;  %v1056_v60 = vrot.slane %v2262_v57, 2 }
  0x44   : > { %1816 = vmatprep.mubr.msk.bf16.mxu0 %vm2011_vm0, %v2010_v1  ;;  %v748_v14 = vor.u32 %v747_v9, %v744_v8  ;;  %v905_v9 = vrot.slane %v2103_v36, 2  ;;  %v1179_v36 = vshrl.u32 %v1651_v56, 16 }
  0x45   : > { %v1057_v62 = vsel %vm897_vm5, %v1055_v59, %v1056_v60  ;;  %v902_v2 = vsel %vm897_vm5, %v899_v54, %v901_v61 }
  0x46   : > { %v758_v28 = vsel %vm732_vm4, %v748_v14, %v757_v24  ;;  %v906_v13 = vsel %vm897_vm5, %v903_v4, %v905_v9  ;;  %v1181_v21 = vrot.slane %v1179_v36, 2  ;;  %v1192_v24 = vrot.slane %v1190_v17, 3 }
  0x4a   : > { %1799 = vmatmul.mubr.msk.bf16.gmra.mrb[24].mxu1 %vm267_vm2, %v2069_v10  ;;  %v740_v10 = vor.u32 %v739_v7, %v736_v6  ;;  %v2294_v6 = vld [vmem:[%s2057_s19 + $0x20] sm:$0xff]   ;;  %v904_v7 = vsel %vm897_vm5, %v901_v61, %v903_v4 }
  0x4b   : > { %1817 = vmatmul.mubr.msk.bf16.gmra.mrb[24].mxu0 %vm267_vm2, %v461_v58  ;;  %1826 = vmatprep.mubr.msk.bf16.mxu1 %vm2011_vm0, %v2010_v1  ;;  %v900_v58 = vsel %vm897_vm5, %v898_v53, %v899_v54  ;;  %v1060_v8 = vrot.slane %v2294_v6, 2  ;;  %v1208_v42 = vshll.u32 %v2294_v6, 16  ;;  %v1348_v56 = vrot.slane %v2294_v6, 3 }
  0x4c   : > { %1820 = vmatprep.mubr.msk.bf16.mxu0 %vm2011_vm0, %v2010_v1  ;;  %v749_v18 = vsel %vm732_vm4, %v740_v10, %v748_v14  ;;  %v907_v14 = vrot.slane %v2231_v39, 2 }
  0x4d   : > { %v1349_v59 = vsel %vm1342_vm7, %v1346_v47, %v1348_v56 }
  0x4e   : > { %v908_v20 = vsel %vm897_vm5, %v905_v9, %v907_v14 }
  0x52   : > { %1827 = vmatmul.mubr.msk.bf16.vlgmr.msra.gmra.mrb[28].mxu1 %vm267_vm2, %v612_v11  ;;  %v1061_v11 = vsel %vm897_vm5, %v1058_v3, %v1060_v8 }
  0x53   : > { %1821 = vmatmul.mubr.msk.bf16.gmra.mrb[28].mxu0 %vm267_vm2, %v463_v5  ;;  %1869 = vmatpush3.bf16.msra.mxu1 %v1984_v12  ;;  %v1059_v5 = vsel %vm897_vm5, %v1056_v60, %v1058_v3  ;;  %v2307_v12 = vld [vmem:[%s2057_s19 + $0x28] sm:$0xff]  }
  0x54   : > { %1848 = vmatprep.mubr.msk.bf16.mxu0 %vm2011_vm0, %v2010_v1  ;;  %1830 = vmatprep.mubr.msk.bf16.mxu1 %vm2011_vm0, %v2010_v1  ;;  %v1062_v10 = vrot.slane %v2307_v12, 2  ;;  %v1214_v49 = vshrl.u32 %v2307_v12, 16  ;;  %v1217_v50 = vshll.u32 %v2307_v12, 16 }
  0x55   : > { %1912 = vmatprep.subr.bf16.mxu1 %v2010_v1 }
  0x56   : > { %v1216_v53 = vrot.slane %v1214_v49, 2  ;;  %v1219_v54 = vrot.slane %v1217_v50, 3 }
  0x58   : > { %v1220_v57 = vor.u32 %v1219_v54, %v1216_v53 }
  0x5a   : > { %1831 = vmatmul.mubr.msk.bf16.gmra.mrb[32].mxu1 %vm267_vm2, %v614_v22  ;;  %v1184_v22 = vrot.slane %v1182_v15, 3 }
  0x5b   : > { %1849 = vmatmul.mubr.msk.bf16.vlgmr.msra.gmra.mrb[32].mxu0 %vm267_vm2, %v749_v18  ;;  %1834 = vmatprep.mubr.msk.bf16.mxu1 %vm2011_vm0, %v2010_v1  ;;  %v1063_v18 = vsel %vm897_vm5, %v1060_v8, %v1062_v10 }
  0x5c   : > { %1891 = vmatpush3.bf16.msra.mxu0 %v1986_v19  ;;  %1852 = vmatprep.mubr.msk.bf16.mxu0 %vm2011_vm0, %v2010_v1  ;;  %v1999_v19 = vld [vmem:[%s2057_s19 + $0x30] ss:$0 sps:$4 sm:$0x33]   ;;  %v1185_v27 = vor.u32 %v1184_v22, %v1181_v21 }
  0x5d   : > { %1934 = vmatprep.subr.bf16.mxu0 %v2010_v1  ;;  %v1064_v25 = vrot.slane %v1999_v19, 2 }
  0x62   : > { %1835 = vmatmul.mubr.msk.bf16.gmra.mrb[36].mxu1 %vm267_vm2, %v616_v31  ;;  %v1065_v31 = vsel %vm897_vm5, %v1062_v10, %v1064_v25 }
  0x63   : > { %1853 = vmatmul.mubr.msk.bf16.gmra.mrb[36].mxu0 %vm267_vm2, %v758_v28  ;;  %1838 = vmatprep.mubr.msk.bf16.mxu1 %vm2011_vm0, %v2010_v1  ;;  %v1193_v28 = vor.u32 %v1192_v24, %v1189_v23 }
  0x64   : > { %1856 = vmatprep.mubr.msk.bf16.mxu0 %vm2011_vm0, %v2010_v1 }
  0x65   : > { %v1194_v33 = vsel %vm1177_vm6, %v1185_v27, %v1193_v28 }
  0x6a   : > { %1839 = vmatmul.mubr.msk.bf16.gmra.mrb[40].mxu1 %vm267_vm2, %v618_v40  ;;  %v1205_v40 = vshrl.u32 %v2294_v6, 16 }
  0x6b   : > { %1857 = vmatmul.mubr.msk.bf16.gmra.mrb[40].mxu0 %vm267_vm2, %v767_v35  ;;  %1842 = vmatprep.mubr.msk.bf16.mxu1 %vm2011_vm0, %v2010_v1  ;;  %v1201_v35 = vrot.slane %v1199_v30, 3 }
  0x6c   : > { %1860 = vmatprep.mubr.msk.bf16.mxu0 %vm2011_vm0, %v2010_v1  ;;  %v1207_v46 = vrot.slane %v1205_v40, 2 }
  0x6d   : > { %v1202_v39 = vor.u32 %v1201_v35, %v1198_v34 }
  0x6f   : > { %v1203_v45 = vsel %vm1177_vm6, %v1193_v28, %v1202_v39 }
  0x72   : > { %1843 = vmatmul.mubr.msk.bf16.gmra.mrb[44].mxu1 %vm267_vm2, %v2118_v43  ;;  %v1992_v43 = vld [vmem:[%s2442_s1 + $0x38] sm:$0xff]  }
  0x73   : > { %1861 = vmatmul.mubr.msk.bf16.gmra.mrb[44].mxu0 %vm267_vm2, %v776_v41  ;;  %1870 = vmatprep.mubr.msk.bf16.mxu1 %vm2011_vm0, %v2010_v1  ;;  %v1210_v41 = vrot.slane %v1208_v42, 3 }
  0x74   : > { %1864 = vmatprep.mubr.msk.bf16.mxu0 %vm2011_vm0, %v2010_v1 }
  0x75   : > { %v1211_v48 = vor.u32 %v1210_v41, %v1207_v46 }
  0x77   : > { %v1212_v52 = vsel %vm1177_vm6, %v1202_v39, %v1211_v48  ;;  %v1221_v60 = vsel %vm1177_vm6, %v1211_v48, %v1220_v57 }
  0x7a   : > { %1871 = vmatmul.mubr.msk.bf16.vlgmr.msra.gmra.mrb[48].mxu1 %vm267_vm2, %v900_v58 }
  0x7b   : > { %1865 = vmatmul.mubr.msk.bf16.gmra.mrb[48].mxu0 %vm267_vm2, %v785_v55  ;;  %1913 = vmatpush3.bf16.msra.mxu1 %v1992_v43  ;;  %v2001_v55 = vld [vmem:[%s2057_s19 + $0x30] ss:$0 sps:$4 sm:$0x77]  }
  0x7c   : > { %1892 = vmatprep.mubr.msk.bf16.mxu0 %vm2011_vm0, %v2010_v1  ;;  %1874 = vmatprep.mubr.msk.bf16.mxu1 %vm2011_vm0, %v2010_v1  ;;  %v1223_v58 = vshrl.u32 %v2001_v55, 16  ;;  %v1226_v43 = vshll.u32 %v2001_v55, 16  ;;  %v1352_v4 = vrot.slane %v2001_v55, 3 }
  0x7e   : > { %v1225_v61 = vrot.slane %v1223_v58, 2 }
  0x82   : > { %1875 = vmatmul.mubr.msk.bf16.gmra.mrb[52].mxu1 %vm267_vm2, %v902_v2 }
  0x83   : > { %1893 = vmatmul.mubr.msk.bf16.vlgmr.msra.gmra.mrb[52].mxu0 %vm267_vm2, %v1057_v62  ;;  %1878 = vmatprep.mubr.msk.bf16.mxu1 %vm2011_vm0, %v2010_v1  ;;  %v1228_v62 = vrot.slane %v1226_v43, 3 }
  0x84   : > { %1935 = vmatpush3.bf16.msra.mxu0 %v1995_v63  ;;  %1896 = vmatprep.mubr.msk.bf16.mxu0 %vm2011_vm0, %v2010_v1  ;;  %v1350_v63 = vrot.slane %v2307_v12, 3 }
  0x85   : > { %v1229_v0 = vor.u32 %v1228_v62, %v1225_v61 }
  0x86   : > { %v1351_v2 = vsel %vm1342_vm7, %v1348_v56, %v1350_v63 }
  0x87   : > { %v1230_v3 = vsel %vm1177_vm6, %v1220_v57, %v1229_v0 }
  0x8a   : > { %1879 = vmatmul.mubr.msk.bf16.gmra.mrb[56].mxu1 %vm267_vm2, %v904_v7 }
  0x8b   : > { %1897 = vmatmul.mubr.msk.bf16.gmra.mrb[56].mxu0 %vm267_vm2, %v1059_v5  ;;  %1882 = vmatprep.mubr.msk.bf16.mxu1 %vm2011_vm0, %v2010_v1  ;;  %v1353_v5 = vsel %vm1342_vm7, %v1350_v63, %v1352_v4 }
  0x8c   : > { %1900 = vmatprep.mubr.msk.bf16.mxu0 %vm2011_vm0, %v2010_v1 }
  0x92   : > { %1883 = vmatmul.mubr.msk.bf16.gmra.mrb[60].mxu1 %vm267_vm2, %v906_v13 }
  0x93   : > { %1901 = vmatmul.mubr.msk.bf16.gmra.mrb[60].mxu0 %vm267_vm2, %v1061_v11  ;;  %1886 = vmatprep.mubr.msk.bf16.mxu1 %vm2011_vm0, %v2010_v1 }
  0x94   : > { %1904 = vmatprep.mubr.msk.bf16.mxu0 %vm2011_vm0, %v2010_v1 }
  0x9a   : > { %1887 = vmatmul.mubr.msk.bf16.gmra.mrb[64].mxu1 %vm267_vm2, %v908_v20 }
  0x9b   : > { %1905 = vmatmul.mubr.msk.bf16.gmra.mrb[64].mxu0 %vm267_vm2, %v1063_v18  ;;  %1914 = vmatprep.mubr.msk.bf16.mxu1 %vm2011_vm0, %v2010_v1 }
  0x9c   : > { %1908 = vmatprep.mubr.msk.bf16.mxu0 %vm2011_vm0, %v2010_v1 }
  0xa2   : > { %1915 = vmatmul.mubr.msk.bf16.vlgmr.msra.gmra.mrb[68].mxu1 %vm267_vm2, %v1194_v33 }
  0xa3   : > { %1909 = vmatmul.mubr.msk.bf16.gmra.mrb[68].mxu0 %vm267_vm2, %v1065_v31  ;;  %1918 = vmatprep.mubr.msk.bf16.mxu1 %vm2011_vm0, %v2010_v1 }
  0xa4   : > { %1936 = vmatprep.mubr.msk.bf16.mxu0 %vm2011_vm0, %v2010_v1 }
  0xaa   : > { %1919 = vmatmul.mubr.msk.bf16.gmra.mrb[72].mxu1 %vm267_vm2, %v1203_v45 }
  0xab   : > { %1937 = vmatmul.mubr.msk.bf16.vlgmr.msra.gmra.mrb[72].mxu0 %vm267_vm2, %v1345_v44  ;;  %1922 = vmatprep.mubr.msk.bf16.mxu1 %vm2011_vm0, %v2010_v1 }
  0xac   : > { %1940 = vmatprep.mubr.msk.bf16.mxu0 %vm2011_vm0, %v2010_v1 }
  0xb2   : > { %1923 = vmatmul.mubr.msk.bf16.gmra.mrb[76].mxu1 %vm267_vm2, %v1212_v52 }
  0xb3   : > { %1941 = vmatmul.mubr.msk.bf16.gmra.mrb[76].mxu0 %vm267_vm2, %v1347_v51  ;;  %1926 = vmatprep.mubr.msk.bf16.mxu1 %vm2011_vm0, %v2010_v1 }
  0xb4   : > { %1944 = vmatprep.mubr.msk.bf16.mxu0 %vm2011_vm0, %v2010_v1 }
  0xba   : > { %1927 = vmatmul.mubr.msk.bf16.gmra.mrb[80].mxu1 %vm267_vm2, %v1221_v60 }
  0xbb   : > { %1945 = vmatmul.mubr.msk.bf16.gmra.mrb[80].mxu0 %vm267_vm2, %v1349_v59  ;;  %1930 = vmatprep.mubr.msk.bf16.mxu1 %vm2011_vm0, %v2010_v1 }
  0xbc   : > { %1948 = vmatprep.mubr.msk.bf16.mxu0 %vm2011_vm0, %v2010_v1 }
  0xc2   : > { %1931 = vmatmul.mubr.msk.bf16.gmra.mrb[84].mxu1 %vm267_vm2, %v1230_v3 }
  0xc3   : > { %1949 = vmatmul.mubr.msk.bf16.gmra.mrb[84].mxu0 %vm267_vm2, %v1351_v2 }
  0xc4   : > { %1952 = vmatprep.mubr.msk.bf16.mxu0 %vm2011_vm0, %v2010_v1 }
  0xcb   : > { %1953 = vmatmul.mubr.msk.bf16.gmra.mrb[88].mxu0 %vm267_vm2, %v1353_v5 }
  0xed   : > { %v341_v9 = vpop.f32.mrb[0].mxu1 }
  0xee   : > { %v317_v6 = vpop.f32.mrb[0].mxu0  ;;  %v1774_v12 = vpop.f32.mrb[1].mxu1 }
  0xef   : > { %v1762_v7 = vpop.f32.mrb[1].mxu0  ;;  %v344_v13 = vpop.f32.mrb[2].mxu1 }
  0xf0   : > { %v320_v8 = vpop.f32.mrb[2].mxu0  ;;  %v1775_v10 = vpop.f32.mrb[3].mxu1 }
  0xf1   : > { %v1763_v11 = vpop.f32.mrb[3].mxu0 }
  0xf5   : > { %v349_v16 = vpop.f32.mrb[4].mxu1 }
  0xf6   : > { %v325_v14 = vpop.f32.mrb[4].mxu0  ;;  %v1778_v17 = vpop.f32.mrb[5].mxu1 }
  0xf7   : > { %v1766_v36 = vpop.f32.mrb[5].mxu0  ;;  %v352_v18 = vpop.f32.mrb[6].mxu1 }
  0xf8   : > { %v328_v15 = vpop.f32.mrb[6].mxu0  ;;  %v1779_v19 = vpop.f32.mrb[7].mxu1 }
  0xf9   : > { %v1767_v1 = vpop.f32.mrb[7].mxu0 }
  0xfd   : > { %v406_v22 = vpop.f32.mrb[8].mxu1 }
  0xfe   : > { %v333_v20 = vpop.f32.mrb[8].mxu0  ;;  %v407_v24 = vadd.f32 %v406_v22, %v317_v6  ;;  %v1784_v25 = vpop.f32.mrb[9].mxu1 }
  0xff   : > { %v1770_v21 = vpop.f32.mrb[9].mxu0  ;;  %v409_v27 = vpop.f32.mrb[10].mxu1 }
 0x100   : > { %v336_v23 = vpop.f32.mrb[10].mxu0  ;;  %v410_v28 = vadd.f32 %v409_v27, %v320_v8  ;;  %v1785_v29 = vpop.f32.mrb[11].mxu1 }
 0x101   : > { %v1771_v26 = vpop.f32.mrb[11].mxu0 }
 0x105   : > { %v414_v33 = vpop.f32.mrb[12].mxu1 }
 0x106   : > { %v519_v30 = vpop.f32.mrb[12].mxu0  ;;  %v415_v35 = vadd.f32 %v414_v33, %v325_v14  ;;  %v1788_v37 = vpop.f32.mrb[13].mxu1 }
 0x107   : > { %v558_v31 = vadd.f32 %v519_v30, %v407_v24  ;;  %v1806_v32 = vpop.f32.mrb[13].mxu0  ;;  %v417_v40 = vpop.f32.mrb[14].mxu1 }
 0x108   : > { %v522_v34 = vpop.f32.mrb[14].mxu0  ;;  %v418_v42 = vadd.f32 %v417_v40, %v328_v15  ;;  %v1789_v44 = vpop.f32.mrb[15].mxu1 }
 0x109   : > { %v559_v38 = vadd.f32 %v522_v34, %v410_v28  ;;  %v1807_v39 = vpop.f32.mrb[15].mxu0 }
 0x10d   : > { %v422_v47 = vpop.f32.mrb[16].mxu1 }
 0x10e   : > { %v527_v45 = vpop.f32.mrb[16].mxu0  ;;  %v423_v49 = vadd.f32 %v422_v47, %v333_v20  ;;  %v1792_v50 = vpop.f32.mrb[17].mxu1 }
 0x10f   : > { %v560_v46 = vadd.f32 %v527_v45, %v415_v35  ;;  %v1810_v41 = vpop.f32.mrb[17].mxu0  ;;  %v425_v53 = vpop.f32.mrb[18].mxu1 }
 0x110   : > { %v530_v48 = vpop.f32.mrb[18].mxu0  ;;  %v426_v54 = vadd.f32 %v425_v53, %v336_v23  ;;  %v1793_v55 = vpop.f32.mrb[19].mxu1 }
 0x111   : > { %v561_v51 = vadd.f32 %v530_v48, %v418_v42  ;;  %v1811_v52 = vpop.f32.mrb[19].mxu0 }
 0x115   : > { %v430_v43 = vpop.f32.mrb[20].mxu1 }
 0x116   : > { %v535_v56 = vpop.f32.mrb[20].mxu0  ;;  %v431_v60 = vadd.f32 %v430_v43, %v341_v9  ;;  %v1796_v61 = vpop.f32.mrb[21].mxu1 }
 0x117   : > { %v562_v57 = vadd.f32 %v535_v56, %v423_v49  ;;  %v1814_v58 = vpop.f32.mrb[21].mxu0  ;;  %v433_v0 = vpop.f32.mrb[22].mxu1 }
 0x118   : > { %v538_v59 = vpop.f32.mrb[22].mxu0  ;;  %v434_v2 = vadd.f32 %v433_v0, %v344_v13  ;;  %v1797_v3 = vpop.f32.mrb[23].mxu1 }
 0x119   : > { %v563_v62 = vadd.f32 %v538_v59, %v426_v54  ;;  %v1815_v63 = vpop.f32.mrb[23].mxu0 }
 0x11d   : > { %v438_v7 = vpop.f32.mrb[24].mxu1 }
 0x11e   : > { %v543_v4 = vpop.f32.mrb[24].mxu0  ;;  %v439_v11 = vadd.f32 %v438_v7, %v349_v16  ;;  %v1800_v12 = vpop.f32.mrb[25].mxu1 }
 0x11f   : > { %v564_v5 = vadd.f32 %v543_v4, %v431_v60  ;;  %v1818_v6 = vpop.f32.mrb[25].mxu0  ;;  %v441_v36 = vpop.f32.mrb[26].mxu1 }
 0x120   : > { %v546_v8 = vpop.f32.mrb[26].mxu0  ;;  %v442_v15 = vadd.f32 %v441_v36, %v352_v18  ;;  %v1801_v1 = vpop.f32.mrb[27].mxu1 }
 0x121   : > { %v565_v10 = vadd.f32 %v546_v8, %v434_v2  ;;  %v1819_v14 = vpop.f32.mrb[27].mxu0 }
 0x125   : > { %v676_v20 = vpop.f32.mrb[28].mxu1 }
 0x126   : > { %v551_v17 = vpop.f32.mrb[28].mxu0  ;;  %v715_v22 = vadd.f32 %v676_v20, %v558_v31  ;;  %v1828_v13 = vpop.f32.mrb[29].mxu1 }
 0x127   : > { %v566_v9 = vadd.f32 %v551_v17, %v439_v11  ;;  %v1822_v19 = vpop.f32.mrb[29].mxu0  ;;  %v679_v25 = vpop.f32.mrb[30].mxu1 }
 0x128   : > { %v554_v21 = vpop.f32.mrb[30].mxu0  ;;  %v716_v26 = vadd.f32 %v679_v25, %v559_v38  ;;  %v1829_v27 = vpop.f32.mrb[31].mxu1 }
 0x129   : > { %v567_v23 = vadd.f32 %v554_v21, %v442_v15  ;;  %v1823_v24 = vpop.f32.mrb[31].mxu0 }
 0x12d   : > { %v684_v30 = vpop.f32.mrb[32].mxu1 }
 0x12e   : > { %v841_v28 = vpop.f32.mrb[32].mxu0  ;;  %v717_v33 = vadd.f32 %v684_v30, %v560_v46  ;;  %v1832_v18 = vpop.f32.mrb[33].mxu1 }
 0x12f   : > { %v880_v16 = vadd.f32 %v841_v28, %v715_v22  ;;  %v1850_v29 = vpop.f32.mrb[33].mxu0  ;;  %v687_v37 = vpop.f32.mrb[34].mxu1 }
 0x130   : > { %v844_v32 = vpop.f32.mrb[34].mxu0  ;;  %v718_v39 = vadd.f32 %v687_v37, %v561_v51  ;;  %v1833_v40 = vpop.f32.mrb[35].mxu1 }
 0x131   : > { %v881_v34 = vadd.f32 %v844_v32, %v716_v26  ;;  %v1851_v35 = vpop.f32.mrb[35].mxu0 }
 0x135   : > { %v692_v45 = vpop.f32.mrb[36].mxu1 }
 0x136   : > { %v849_v42 = vpop.f32.mrb[36].mxu0  ;;  %v719_v47 = vadd.f32 %v692_v45, %v562_v57  ;;  %v1836_v38 = vpop.f32.mrb[37].mxu1 }
 0x137   : > { %v882_v31 = vadd.f32 %v849_v42, %v717_v33  ;;  %v1854_v44 = vpop.f32.mrb[37].mxu0  ;;  %v695_v50 = vpop.f32.mrb[38].mxu1 }
 0x138   : > { %v852_v41 = vpop.f32.mrb[38].mxu0  ;;  %v720_v52 = vadd.f32 %v695_v50, %v563_v62  ;;  %v1837_v53 = vpop.f32.mrb[39].mxu1 }
 0x139   : > { %v883_v48 = vadd.f32 %v852_v41, %v718_v39  ;;  %v1855_v49 = vpop.f32.mrb[39].mxu0 }
 0x13d   : > { %v700_v56 = vpop.f32.mrb[40].mxu1 }
 0x13e   : > { %v857_v54 = vpop.f32.mrb[40].mxu0  ;;  %v721_v43 = vadd.f32 %v700_v56, %v564_v5  ;;  %v1840_v51 = vpop.f32.mrb[41].mxu1 }
 0x13f   : > { %v884_v46 = vadd.f32 %v857_v54, %v719_v47  ;;  %v1858_v55 = vpop.f32.mrb[41].mxu0  ;;  %v703_v61 = vpop.f32.mrb[42].mxu1 }
 0x140   : > { %v860_v58 = vpop.f32.mrb[42].mxu0  ;;  %v722_v63 = vadd.f32 %v703_v61, %v565_v10  ;;  %v1841_v0 = vpop.f32.mrb[43].mxu1 }
 0x141   : > { %v885_v59 = vadd.f32 %v860_v58, %v720_v52  ;;  %v1859_v60 = vpop.f32.mrb[43].mxu0 }
 0x145   : > { %v708_v4 = vpop.f32.mrb[44].mxu1 }
 0x146   : > { %v865_v2 = vpop.f32.mrb[44].mxu0  ;;  %v723_v7 = vadd.f32 %v708_v4, %v566_v9  ;;  %v1844_v62 = vpop.f32.mrb[45].mxu1 }
 0x147   : > { %v886_v57 = vadd.f32 %v865_v2, %v721_v43  ;;  %v1862_v3 = vpop.f32.mrb[45].mxu0  ;;  %v711_v12 = vpop.f32.mrb[46].mxu1 }
 0x148   : > { %v868_v6 = vpop.f32.mrb[46].mxu0  ;;  %v724_v14 = vadd.f32 %v711_v12, %v567_v23  ;;  %v1845_v36 = vpop.f32.mrb[47].mxu1 }
 0x149   : > { %v887_v8 = vadd.f32 %v868_v6, %v722_v63  ;;  %v1863_v11 = vpop.f32.mrb[47].mxu0 }
 0x14d   : > { %v964_v17 = vpop.f32.mrb[48].mxu1 }
 0x14e   : > { %v873_v15 = vpop.f32.mrb[48].mxu0  ;;  %v1003_v20 = vadd.f32 %v964_v17, %v880_v16  ;;  %v1872_v10 = vpop.f32.mrb[49].mxu1 }
 0x14f   : > { %v888_v5 = vadd.f32 %v873_v15, %v723_v7  ;;  %v1866_v1 = vpop.f32.mrb[49].mxu0  ;;  %v967_v13 = vpop.f32.mrb[50].mxu1 }
 0x150   : > { %v876_v19 = vpop.f32.mrb[50].mxu0  ;;  %v1004_v24 = vadd.f32 %v967_v13, %v881_v34  ;;  %v1873_v25 = vpop.f32.mrb[51].mxu1 }
 0x151   : > { %v889_v21 = vadd.f32 %v876_v19, %v724_v14  ;;  %v1867_v22 = vpop.f32.mrb[51].mxu0 }
 0x155   : > { %v972_v28 = vpop.f32.mrb[52].mxu1 }
 0x156   : > { %v1121_v26 = vpop.f32.mrb[52].mxu0  ;;  %v1005_v30 = vadd.f32 %v972_v28, %v882_v31  ;;  %v1876_v23 = vpop.f32.mrb[53].mxu1 }
 0x157   : > { %v1160_v9 = vadd.f32 %v1121_v26, %v1003_v20  ;;  %v1894_v27 = vpop.f32.mrb[53].mxu0  ;;  %v975_v18 = vpop.f32.mrb[54].mxu1 }
 0x158   : > { %v1124_v29 = vpop.f32.mrb[54].mxu0  ;;  %v1006_v35 = vadd.f32 %v975_v18, %v883_v48  ;;  %v1877_v37 = vpop.f32.mrb[55].mxu1 }
 0x159   : > { %v1161_v32 = vadd.f32 %v1124_v29, %v1004_v24  ;;  %v1895_v33 = vpop.f32.mrb[55].mxu0 }
 0x15d   : > { %v980_v42 = vpop.f32.mrb[56].mxu1 }
 0x15e   : > { %v1129_v39 = vpop.f32.mrb[56].mxu0  ;;  %v1007_v45 = vadd.f32 %v980_v42, %v884_v46  ;;  %v1880_v34 = vpop.f32.mrb[57].mxu1 }
 0x15f   : > { %v1162_v16 = vadd.f32 %v1129_v39, %v1005_v30  ;;  %v1898_v40 = vpop.f32.mrb[57].mxu0  ;;  %v983_v38 = vpop.f32.mrb[58].mxu1 }
 0x160   : > { %v1132_v44 = vpop.f32.mrb[58].mxu0  ;;  %v1008_v49 = vadd.f32 %v983_v38, %v885_v59  ;;  %v1881_v50 = vpop.f32.mrb[59].mxu1 }
 0x161   : > { %v1163_v41 = vadd.f32 %v1132_v44, %v1006_v35  ;;  %v1899_v47 = vpop.f32.mrb[59].mxu0 }
 0x165   : > { %v988_v54 = vpop.f32.mrb[60].mxu1 }
 0x166   : > { %v1137_v52 = vpop.f32.mrb[60].mxu0  ;;  %v1009_v56 = vadd.f32 %v988_v54, %v886_v57  ;;  %v1884_v48 = vpop.f32.mrb[61].mxu1 }
 0x167   : > { %v1164_v31 = vadd.f32 %v1137_v52, %v1007_v45  ;;  %v1902_v53 = vpop.f32.mrb[61].mxu0  ;;  %v991_v51 = vpop.f32.mrb[62].mxu1 }
 0x168   : > { %v1140_v55 = vpop.f32.mrb[62].mxu0  ;;  %v1010_v60 = vadd.f32 %v991_v51, %v887_v8  ;;  %v1885_v61 = vpop.f32.mrb[63].mxu1 }
 0x169   : > { %v2382_v58 = vadd.f32 %v1140_v55, %v1008_v49  ;;  %v1903_v43 = vpop.f32.mrb[63].mxu0 }
 0x16d   : > { %v996_v2 = vpop.f32.mrb[64].mxu1 }
 0x16e   : > { %v1145_v46 = vpop.f32.mrb[64].mxu0  ;;  %v1011_v3 = vadd.f32 %v996_v2, %v888_v5  ;;  %v1888_v4 = vpop.f32.mrb[65].mxu1 }
 0x16f   : > { %v2384_v63 = vadd.f32 %v1145_v46, %v1009_v56  ;;  %v1906_v0 = vpop.f32.mrb[65].mxu0  ;;  %v999_v57 = vpop.f32.mrb[66].mxu1 }
 0x170   : > { %v1148_v59 = vpop.f32.mrb[66].mxu0  ;;  %v1012_v62 = vadd.f32 %v999_v57, %v889_v21  ;;  %v1889_v11 = vpop.f32.mrb[67].mxu1  ;;  %v2396_v21 = vld [vmem:[%s2443_s2] ss:$0 sm:$0xff] }
 0x171   : > { %v2386_v6 = vadd.f32 %v1148_v59, %v1010_v60  ;;  %v1907_v7 = vpop.f32.mrb[67].mxu0 }
 0x175   : > { %v1286_v36 = vpop.f32.mrb[68].mxu1 }
 0x176   : > { %v1153_v12 = vpop.f32.mrb[68].mxu0  ;;  %v1325_v1 = vadd.f32 %v1286_v36, %v1160_v9  ;;  %v1916_v17 = vpop.f32.mrb[69].mxu1 }
 0x177   : > { %v2388_v14 = vadd.f32 %v1153_v12, %v1011_v3  ;;  %v1910_v8 = vpop.f32.mrb[69].mxu0  ;;  %v1289_v5 = vpop.f32.mrb[70].mxu1 }
 0x178   : > { %v1156_v15 = vpop.f32.mrb[70].mxu0  ;;  %v1326_v10 = vadd.f32 %v1289_v5, %v1161_v32  ;;  %v1917_v22 = vpop.f32.mrb[71].mxu1 }
 0x179   : > { %v2390_v19 = vadd.f32 %v1156_v15, %v1012_v62  ;;  %v1911_v20 = vpop.f32.mrb[71].mxu0 }
 0x17d   : > { %v1294_v26 = vpop.f32.mrb[72].mxu1 }
 0x17e   : > { %v1409_v13 = vpop.f32.mrb[72].mxu0  ;;  %v1327_v28 = vadd.f32 %v1294_v26, %v1162_v16  ;;  %v1920_v29 = vpop.f32.mrb[73].mxu1 }
 0x17f   : > { %v1448_v24 = vadd.f32 %v1409_v13, %v1325_v1  ;;  %v1938_v25 = vpop.f32.mrb[73].mxu0  ;;  %v1297_v32 = vpop.f32.mrb[74].mxu1 }
 0x180   : > { %v1412_v27 = vpop.f32.mrb[74].mxu0  ;;  %v1328_v18 = vadd.f32 %v1297_v32, %v1163_v41  ;;  %v1921_v37 = vpop.f32.mrb[75].mxu1 }
 0x181   : > { %v1465_v9 = vadd.f32 %v2396_v21, %v1448_v24  ;;  %v1449_v30 = vadd.f32 %v1412_v27, %v1326_v10  ;;  %v1939_v23 = vpop.f32.mrb[75].mxu0 }
 0x183   : > { %v1694_v33 = vpack.c.bf16 %v1465_v9, %v1465_v9  ;;  %v1466_v35 = vadd.f32 %v2396_v21, %v1449_v30 }
 0x185   : > { %1516 = vst.msk [vmem:[%s2402_s13] sm:$0xf] %vm1515_vm8, %v1694_v33  ;;  %v1695_v39 = vpack.c.bf16 %v1466_v35, %v1466_v35  ;;  %v1302_v44 = vpop.f32.mrb[76].mxu1 }
 0x186   : > { %v1417_v16 = vpop.f32.mrb[76].mxu0  ;;  %v1329_v34 = vadd.f32 %v1302_v44, %v1164_v31  ;;  %v1924_v38 = vpop.f32.mrb[77].mxu1 }
 0x187   : > { %1517 = vst.msk [vmem:[%s2402_s13 + $0x4] sm:$0xf] %vm1515_vm8, %v1695_v39  ;;  %v1450_v40 = vadd.f32 %v1417_v16, %v1327_v28  ;;  %v1942_v42 = vpop.f32.mrb[77].mxu0  ;;  %v1305_v50 = vpop.f32.mrb[78].mxu1 }
 0x188   : > { %v1420_v45 = vpop.f32.mrb[78].mxu0  ;;  %v1330_v53 = vadd.f32 %v1305_v50, %v2382_v58  ;;  %v1925_v55 = vpop.f32.mrb[79].mxu1 }
 0x189   : > { %v1467_v47 = vadd.f32 %v2396_v21, %v1450_v40  ;;  %v1451_v41 = vadd.f32 %v1420_v45, %v1328_v18  ;;  %v1943_v49 = vpop.f32.mrb[79].mxu0 }
 0x18b   : > { %v1696_v52 = vpack.c.bf16 %v1467_v47, %v1467_v47  ;;  %v1468_v54 = vadd.f32 %v2396_v21, %v1451_v41 }
 0x18d   : > { %1518 = vst.msk [vmem:[%s2402_s13 + $0x8] sm:$0xf] %vm1515_vm8, %v1696_v52  ;;  %v1697_v56 = vpack.c.bf16 %v1468_v54, %v1468_v54  ;;  %v1310_v51 = vpop.f32.mrb[80].mxu1 }
 0x18e   : > { %v1425_v48 = vpop.f32.mrb[80].mxu0  ;;  %v1331_v61 = vadd.f32 %v1310_v51, %v2384_v63  ;;  %v1928_v58 = vpop.f32.mrb[81].mxu1 }
 0x18f   : > { %1519 = vst.msk [vmem:[%s2402_s13 + $0xc] sm:$0xf] %vm1515_vm8, %v1697_v56  ;;  %v1452_v31 = vadd.f32 %v1425_v48, %v1329_v34  ;;  %v1946_v43 = vpop.f32.mrb[81].mxu0  ;;  %v1313_v59 = vpop.f32.mrb[82].mxu1 }
 0x190   : > { %v1428_v60 = vpop.f32.mrb[82].mxu0  ;;  %v1332_v4 = vadd.f32 %v1313_v59, %v2386_v6  ;;  %v1929_v57 = vpop.f32.mrb[83].mxu1 }
 0x191   : > { %v1469_v46 = vadd.f32 %v2396_v21, %v1452_v31  ;;  %v1453_v0 = vadd.f32 %v1428_v60, %v1330_v53  ;;  %v1947_v2 = vpop.f32.mrb[83].mxu0 }
 0x193   : > { %v1698_v3 = vpack.c.bf16 %v1469_v46, %v1469_v46  ;;  %v1470_v7 = vadd.f32 %v2396_v21, %v1453_v0 }
 0x195   : > { %1520 = vst.msk [vmem:[%s2402_s13 + $0x10] sm:$0xf] %vm1515_vm8, %v1698_v3  ;;  %v1699_v62 = vpack.c.bf16 %v1470_v7, %v1470_v7  ;;  %v1318_v8 = vpop.f32.mrb[84].mxu1 }
 0x196   : > { %v1433_v11 = vpop.f32.mrb[84].mxu0  ;;  %v1333_v15 = vadd.f32 %v1318_v8, %v2388_v14  ;;  %v1932_v6 = vpop.f32.mrb[85].mxu1 }
 0x197   : > { %1521 = vst.msk [vmem:[%s2402_s13 + $0x14] sm:$0xf] %vm1515_vm8, %v1699_v62  ;;  %v1454_v63 = vadd.f32 %v1433_v11, %v1331_v61  ;;  %v1950_v12 = vpop.f32.mrb[85].mxu0  ;;  %v1321_v5 = vpop.f32.mrb[86].mxu1 }
 0x198   : > { %v1436_v36 = vpop.f32.mrb[86].mxu0  ;;  %v1334_v22 = vadd.f32 %v1321_v5, %v2390_v19  ;;  %v1933_v24 = vpop.f32.mrb[87].mxu1 }
 0x199   : > { %v1471_v1 = vadd.f32 %v2396_v21, %v1454_v63  ;;  %v1455_v17 = vadd.f32 %v1436_v36, %v1332_v4  ;;  %v1951_v20 = vpop.f32.mrb[87].mxu0 }
 0x19b   : > { %v1700_v10 = vpack.c.bf16 %v1471_v1, %v1471_v1  ;;  %v1472_v13 = vadd.f32 %v2396_v21, %v1455_v17 }
 0x19d   : > { %1522 = vst.msk [vmem:[%s2402_s13 + $0x18] sm:$0xf] %vm1515_vm8, %v1700_v10  ;;  %v1701_v25 = vpack.c.bf16 %v1472_v13, %v1472_v13 }
 0x19e   : > { %v1441_v26 = vpop.f32.mrb[88].mxu0 }
 0x19f   : > { %1523 = vst.msk [vmem:[%s2402_s13 + $0x1c] sm:$0xf] %vm1515_vm8, %v1701_v25  ;;  %v1456_v14 = vadd.f32 %v1441_v26, %v1333_v15  ;;  %v1954_v27 = vpop.f32.mrb[89].mxu0 }
 0x1a0   : > { %v1444_v28 = vpop.f32.mrb[90].mxu0 }
 0x1a1   : > { %v1473_v9 = vadd.f32 %v2396_v21, %v1456_v14  ;;  %v1457_v29 = vadd.f32 %v1444_v28, %v1334_v22  ;;  %v1955_v30 = vpop.f32.mrb[91].mxu0 }
 0x1a3   : > { %v1702_v23 = vpack.c.bf16 %v1473_v9, %v1473_v9  ;;  %v1474_v19 = vadd.f32 %v2396_v21, %v1457_v29 }
 0x1a5   : > { %1524 = vst.msk [vmem:[%s2402_s13 + $0x20] sm:$0xf] %vm1515_vm8, %v1702_v23  ;;  %v1703_v32 = vpack.c.bf16 %v1474_v19, %v1474_v19 }
 0x1a7   : > { %1525 = vst.msk [vmem:[%s2402_s13 + $0x24] sm:$0xf] %vm1515_vm8, %v1703_v32 }
 0x1a8 PF: > { %s13_s12 = sadd.s32 1, %s2008_s12  }
 0x1a9   : > { %p10_p4 = scmp.ge.s32.totalorder %s13_s12, 4  }
 0x1ab   :  { %12 = sbr.rel (!%p10_p4) target bundleno = 1 (0x1), region = 70 }

// kernel: retinanet_forward.17
= control target key start
LH: loop header
LB: loop body
LE: loop exit
PB: predicated region body
PF: predicated region fallthrough
CT: control target
= control target key end

     0   :  { %s5188_s12 = smov 0   ;;  %s6130_s0 = inlined_call_operand.vmem [shape: bf16[2,340,16], index: 0, kind: input, shape index: {}]   ;;  %s6131_s1 = inlined_call_operand.vmem [shape: bf16[9,16,16], index: 1, kind: input, shape index: {}]   ;;  %s6132_s2 = inlined_call_operand.vmem [shape: f32[1,16], index: 2, kind: input, shape index: {}]   ;;  %s6133_s3 = inlined_call_operand.vmem [shape: bf16[2,288,16], index: 3, kind: output, shape index: {}]  }
   0x1 LB: > { %s3934_s13 = sadd.s32 4294967295, %s5166_s12   ;;  %p3938_p0 = scmp.ge.s32.totalorder %s5166_s12, 1  ;;  %s5166_s12 = sphi %s5188_s12, %s13_s12  }
   0x2   : > { %p137_p1 = scmp.lt.s32.totalorder %s5166_s12, 3 }
   0x4   : > { %p138_p2 = pnand %p3938_p0, %p137_p1 }
   0x5   : > { %v5078_v0 = vld [vmem:[%s6131_s1 + $0x20] sm:$0xff] (!%p138_p2)   ;;  %p161_p3 = scmp.lt.s32.totalorder (!%p138_p2), %s3934_s13, 1  ;;  %v5079_v1 = vld [vmem:[%s6131_s1 + $0x8] sm:$0xff] (!%p138_p2)   ;;  %vm307_vm0 = vsmask.f32 (!%p138_p2), 7424  ;;  %vm462_vm1 = vcmask (!%p138_p2), 130048  }
   0x6   : > { %141 = sbr.rel (%p138_p2) target bundleno = 573 (0x23d), region = 32  ;;  %4588 = vmatprep.subr.bf16.mxu0 (!%p138_p2), %v5078_v0  ;;  %v5207_v2 = vld [vmem:[%s6131_s1 + $0x28] sm:$0xff] (!%p138_p2)   ;;  %4436 = vmatprep.subr.bf16.mxu1 (!%p138_p2), %v5079_v1  ;;  %v5088_v3 = vld [vmem:[%s6131_s1] sm:$0xff] (!%p138_p2)   ;;  %vm1681_vm2 = vsmask.f32 (!%p138_p2), 6400  ;;  %v5263_v31 = vld [vmem:[%s6131_s1 + $0x10] sm:$0xff] (!%p138_p2)  }
   0x7   : > { %4589 = vmatpush3.bf16.msra.mxu0 (!%p138_p2), %v5078_v0  ;;  %4437 = vmatpush3.bf16.msra.mxu1 (!%p138_p2), %v5079_v1  ;;  %v5293_v56 = vld [vmem:[%s6131_s1 + $0x30] sm:$0xff] (!%p138_p2)   ;;  %vm2132_vm3 = vcmask (!%p138_p2), 1045504   ;;  %vm920_vm4 = vcmask (!%p138_p2), 1046528   ;;  %vm2893_vm5 = vsmask.f32 (!%p138_p2), 5376  ;;  %vm3344_vm6 = vcmask (!%p138_p2), 1044480  }
   0x8   : > { %4626 = vmatprep.subr.bf16.mxu0 (!%p138_p2), %v5207_v2  ;;  %4474 = vmatprep.subr.bf16.mxu1 (!%p138_p2), %v5088_v3  ;;  %vm3842_vm7 = vcmask (!%p138_p2), 125952  }
   0xd   : > { %s6135_s13 = smov (!%p161_p3, %s3934_s13), 1 }
   0xe   : > { %s5068_s20 = smul.u32 172, %s6135_s13 }
   0xf   : > { %s5069_s11 = smul.u32 144, %s6135_s13 }
  0x10   : > { %s5217_s25 = scalar_lea.vmem %s6130_s0, %s5068_s20 }
  0x11   : > { %v172_v4 = vld [vmem:[%s5217_s25] sm:$0xf]  ;;  %v5221_v5 = vld [vmem:[%s5217_s25 + $0x4] sm:$0xf]  ;;  %v5227_v7 = vld [vmem:[%s5217_s25 + $0x8] sm:$0xff]   ;;  %s6010_s18 = scalar_lea.vmem %s6133_s3, %s5069_s11 }
  0x12   : > { %v5224_v6 = vcombine.low %v172_v4, %v5221_v5  ;;  %v1231_v8 = vld [vmem:[%s5217_s25 + $0x8] sm:$0xe]  ;;  %v5231_v9 = vld [vmem:[%s5217_s25 + $0xc] sm:$0xf]  ;;  %v316_v12 = vshll.u32 %v5227_v7, 16  ;;  %v320_v13 = vshrl.u32 %v5227_v7, 16 }
  0x13   : > { %v5238_v14 = vld [vmem:[%s5217_s25 + $0x10] sm:$0xff]   ;;  %v5244_v16 = vcombine.low %v1231_v8, %v5231_v9  ;;  %v5252_v24 = vld [vmem:[%s5217_s25 + $0x18] sm:$0xff]   ;;  %v5258_v30 = vld [vmem:[%s5217_s25 + $0x20] sm:$0xff]  }
  0x14   : > { %v309_v10 = vshrl.u32 %v5224_v6, 16  ;;  %v311_v11 = vshll.u32 %v5224_v6, 16  ;;  %v5241_v15 = vld [vmem:[%s5217_s25 + $0x10] sm:$0xff]   ;;  %v318_v18 = vrot.slane %v316_v12, 1  ;;  %v1691_v19 = vshrl.u32 %v5238_v14, 16  ;;  %v5255_v29 = vld [vmem:[%s5217_s25 + $0x18] sm:$0xff]  }
  0x15   : > { %v1694_v20 = vshll.u32 %v5238_v14, 16  ;;  %v1683_v21 = vshrl.u32 %v5244_v16, 16  ;;  %v1686_v22 = vshll.u32 %v5244_v16, 16  ;;  %v324_v23 = vshll.u32 %v5241_v15, 16  ;;  %v5273_v44 = vld [vmem:[%s5217_s25 + $0x20] sm:$0xff]   ;;  %v5276_v45 = vld [vmem:[%s5217_s25 + $0x28] sm:$0xff]  }
  0x16   : > { %v313_v17 = vrot.slane %v311_v11, 1  ;;  %v322_v26 = vor.u32 %v320_v13, %v318_v18  ;;  %v1693_v27 = vrot.slane %v1691_v19, 1  ;;  %v1700_v35 = vshrl.u32 %v5252_v24, 16  ;;  %v5282_v50 = vld [vmem:[%s5217_s25 + $0x28] sm:$0xff]   ;;  %v5288_v55 = vld [vmem:[%s5217_s25 + $0x30] sm:$0xff]  }
  0x17   : > { %v1696_v28 = vrot.slane %v1694_v20, 2  ;;  %v1685_v32 = vrot.slane %v1683_v21, 1  ;;  %v1688_v33 = vrot.slane %v1686_v22, 2  ;;  %v326_v34 = vrot.slane %v324_v23, 1  ;;  %v5298_v61 = vld [vmem:[%s5217_s25 + $0x30] sm:$0xff]  }
  0x18   : > { %v314_v25 = vor.u32 %v313_v17, %v309_v10  ;;  %v1703_v38 = vshll.u32 %v5252_v24, 16  ;;  %v328_v39 = vshrl.u32 %v5241_v15, 16  ;;  %v1702_v42 = vrot.slane %v1700_v35, 1 }
  0x19   : > { %v1697_v37 = vor.u32 %v1696_v28, %v1693_v27  ;;  %v1689_v40 = vor.u32 %v1688_v33, %v1685_v32  ;;  %v327_v41 = vsel %vm307_vm0, %v322_v26, %v326_v34  ;;  %v332_v43 = vshll.u32 %v5255_v29, 16  ;;  %v5320_v28 = vld [vmem:[%s5217_s25 + $0x38] sm:$0xff]  }
  0x1a   : > { %v319_v36 = vsel %vm307_vm0, %v314_v25, %v318_v18  ;;  %v1705_v46 = vrot.slane %v1703_v38, 2  ;;  %v330_v47 = vor.u32 %v328_v39, %v326_v34  ;;  %v1709_v48 = vshrl.u32 %v5258_v30, 16  ;;  %v5311_v18 = vld [vmem:[%s5217_s25 + $0x38] sm:$0xff]   ;;  %v5330_v39 = vld [vmem:[%s5217_s25 + $0x40] sm:$0xff]  }
  0x1b   : > { %4438 = vmatprep.mubr.msk.bf16.mxu1 %vm462_vm1, %v319_v36  ;;  %v1712_v49 = vshll.u32 %v5258_v30, 16  ;;  %v1698_v51 = vsel %vm1681_vm2, %v1689_v40, %v1697_v37  ;;  %v334_v52 = vrot.slane %v332_v43, 1  ;;  %v336_v53 = vshrl.u32 %v5255_v29, 16 }
  0x1c   : > { %4439 = vmatmul.mubr.msk.bf16.vlgmr.msra.gmra.mrb[0].mxu1 %vm462_vm1, %v327_v41  ;;  %v340_v54 = vshll.u32 %v5273_v44, 16  ;;  %4590 = vmatprep.mubr.msk.bf16.mxu0 %vm462_vm1, %v1698_v51  ;;  %v1706_v57 = vor.u32 %v1705_v46, %v1702_v42  ;;  %v1711_v58 = vrot.slane %v1709_v48, 1  ;;  %v1718_v60 = vshrl.u32 %v5276_v45, 16  ;;  %v5335_v46 = vld [vmem:[%s5217_s25 + $0x40] sm:$0xff]  }
  0x1d   : > { %4475 = vmatpush3.bf16.msra.mxu1 %v5088_v3  ;;  %v1714_v59 = vrot.slane %v1712_v49, 2  ;;  %v335_v62 = vsel %vm307_vm0, %v330_v47, %v334_v52  ;;  %v338_v63 = vor.u32 %v336_v53, %v334_v52  ;;  %v1721_v1 = vshll.u32 %v5276_v45, 16 }
  0x1e   : > { %4512 = vmatprep.subr.bf16.mxu1 %v5263_v31  ;;  %v342_v0 = vrot.slane %v340_v54, 1  ;;  %v1707_v3 = vsel %vm1681_vm2, %v1697_v37, %v1706_v57  ;;  %4442 = vmatprep.mubr.msk.bf16.mxu1 %vm462_vm1, %v335_v62  ;;  %v1720_v8 = vrot.slane %v1718_v60, 1  ;;  %v344_v10 = vshrl.u32 %v5273_v44, 16 }
  0x1f   : > { %v1715_v4 = vor.u32 %v1714_v59, %v1711_v58  ;;  %4591 = vmatmul.mubr.msk.bf16.vlgmr.msra.gmra.mrb[0].mxu0 %vm462_vm1, %v1707_v3  ;;  %v1723_v12 = vrot.slane %v1721_v1, 2  ;;  %v348_v13 = vshll.u32 %v5282_v50, 16  ;;  %v1727_v17 = vshrl.u32 %v5288_v55, 16  ;;  %v5343_v58 = vld [vmem:[%s5217_s25 + $0x48] sm:$0xff]  }
  0x20   : > { %v343_v11 = vsel %vm307_vm0, %v338_v63, %v342_v0  ;;  %4627 = vmatpush3.bf16.msra.mxu0 %v5207_v2  ;;  %v346_v20 = vor.u32 %v344_v10, %v342_v0  ;;  %v1730_v21 = vshll.u32 %v5288_v55, 16  ;;  %v352_v22 = vshrl.u32 %v5282_v50, 16  ;;  %v5346_v59 = vld [vmem:[%s5217_s25 + $0x48] sm:$0xff]  }
  0x21   : > { %v1716_v19 = vsel %vm1681_vm2, %v1706_v57, %v1715_v4  ;;  %v1724_v23 = vor.u32 %v1723_v12, %v1720_v8  ;;  %v350_v25 = vrot.slane %v348_v13, 1  ;;  %v1729_v26 = vrot.slane %v1727_v17, 1  ;;  %4664 = vmatprep.subr.bf16.mxu0 %v5293_v56 }
  0x22   : > { %4594 = vmatprep.mubr.msk.bf16.mxu0 %vm462_vm1, %v1716_v19  ;;  %v356_v27 = vshll.u32 %v5298_v61, 16  ;;  %v1732_v2 = vrot.slane %v1730_v21, 2  ;;  %v1736_v32 = vshrl.u32 %v5311_v18, 16  ;;  %v1739_v33 = vshll.u32 %v5311_v18, 16  ;;  %v5363_v19 = vld [vmem:[%s5217_s25 + $0x50] sm:$0xff]  }
  0x23   : > { %v360_v34 = vshrl.u32 %v5298_v61, 16  ;;  %v1725_v35 = vsel %vm1681_vm2, %v1715_v4, %v1724_v23  ;;  %v351_v36 = vsel %vm307_vm0, %v346_v20, %v350_v25  ;;  %v354_v37 = vor.u32 %v352_v22, %v350_v25  ;;  %v5355_v4 = vld [vmem:[%s5217_s25 + $0x50] sm:$0xff]   ;;  %v5368_v22 = vld [vmem:[%s5217_s25 + $0x58] sm:$0xff]  }
  0x24   : > { %4443 = vmatmul.mubr.msk.bf16.gmra.mrb[4].mxu1 %vm462_vm1, %v343_v11  ;;  %v358_v38 = vrot.slane %v356_v27, 1  ;;  %v1733_v40 = vor.u32 %v1732_v2, %v1729_v26  ;;  %v1738_v41 = vrot.slane %v1736_v32, 1  ;;  %v1741_v42 = vrot.slane %v1739_v33, 2 }
  0x25   : > { %4446 = vmatprep.mubr.msk.bf16.mxu1 %vm462_vm1, %v351_v36  ;;  %v364_v43 = vshll.u32 %v5320_v28, 16  ;;  %v1745_v49 = vshrl.u32 %v5330_v39, 16  ;;  %v1748_v51 = vshll.u32 %v5330_v39, 16  ;;  %v368_v57 = vshrl.u32 %v5320_v28, 16 }
  0x26   : > { %v359_v47 = vsel %vm307_vm0, %v354_v37, %v358_v38  ;;  %v362_v48 = vor.u32 %v360_v34, %v358_v38  ;;  %v1734_v52 = vsel %vm1681_vm2, %v1724_v23, %v1733_v40  ;;  %v1742_v53 = vor.u32 %v1741_v42, %v1738_v41 }
  0x27   : > { %v366_v54 = vrot.slane %v364_v43, 1  ;;  %4595 = vmatmul.mubr.msk.bf16.gmra.mrb[4].mxu0 %vm462_vm1, %v1725_v35  ;;  %v1747_v60 = vrot.slane %v1745_v49, 1  ;;  %v1750_v62 = vrot.slane %v1748_v51, 2  ;;  %v372_v63 = vshll.u32 %v5335_v46, 16  ;;  %v5373_v35 = vld [vmem:[%s5217_s25 + $0x58] sm:$0xff]  }
  0x28   : > { %v376_v0 = vshrl.u32 %v5335_v46, 16  ;;  %4598 = vmatprep.mubr.msk.bf16.mxu0 %vm462_vm1, %v1734_v52  ;;  %v1754_v3 = vshrl.u32 %v5343_v58, 16  ;;  %v1757_v10 = vshll.u32 %v5343_v58, 16  ;;  %v380_v11 = vshll.u32 %v5346_v59, 16  ;;  %v2125_v51 = vld [vmem:[%s5217_s25 + $0x8] sm:$0xc] }
  0x29   : > { %v367_v1 = vsel %vm307_vm0, %v362_v48, %v366_v54  ;;  %v1751_v8 = vor.u32 %v1750_v62, %v1747_v60  ;;  %v374_v12 = vrot.slane %v372_v63, 1  ;;  %v1763_v13 = vshrl.u32 %v5355_v4, 16  ;;  %v5387_v52 = vld [vmem:[%s5217_s25 + $0x60] sm:$0xff]  }
  0x2a   : > { %v1766_v17 = vshll.u32 %v5355_v4, 16  ;;  %v1743_v20 = vsel %vm1681_vm2, %v1733_v40, %v1742_v53  ;;  %v370_v21 = vor.u32 %v368_v57, %v366_v54  ;;  %v1756_v23 = vrot.slane %v1754_v3, 1 }
  0x2b   : > { %v1759_v25 = vrot.slane %v1757_v10, 2  ;;  %v378_v26 = vor.u32 %v376_v0, %v374_v12  ;;  %v382_v27 = vrot.slane %v380_v11, 1  ;;  %v1752_v2 = vsel %vm1681_vm2, %v1742_v53, %v1751_v8  ;;  %v5392_v0 = vld [vmem:[%s5217_s25 + $0x68] sm:$0xff]  }
  0x2c   : > { %4447 = vmatmul.mubr.msk.bf16.gmra.mrb[8].mxu1 %vm462_vm1, %v359_v47  ;;  %v1765_v32 = vrot.slane %v1763_v13, 1  ;;  %v1768_v33 = vrot.slane %v1766_v17, 2  ;;  %v388_v34 = vshll.u32 %v5363_v19, 16  ;;  %v375_v36 = vsel %vm307_vm0, %v370_v21, %v374_v12 }
  0x2d   : > { %4450 = vmatprep.mubr.msk.bf16.mxu1 %vm462_vm1, %v367_v1  ;;  %v384_v37 = vshrl.u32 %v5346_v59, 16  ;;  %v1772_v38 = vshrl.u32 %v5368_v22, 16  ;;  %v1775_v40 = vshll.u32 %v5368_v22, 16  ;;  %v1760_v41 = vor.u32 %v1759_v25, %v1756_v23  ;;  %v5409_v25 = vld [vmem:[%s5217_s25 + $0x70] sm:$0xff]  }
  0x2e   : > { %v383_v42 = vsel %vm307_vm0, %v378_v26, %v382_v27  ;;  %v392_v43 = vshrl.u32 %v5363_v19, 16  ;;  %v396_v47 = vshll.u32 %v5373_v35, 16  ;;  %v1769_v48 = vor.u32 %v1768_v33, %v1765_v32  ;;  %v5415_v33 = vld [vmem:[%s5217_s25 + $0x78] sm:$0xff]  }
  0x2f   : > { %4599 = vmatmul.mubr.msk.bf16.gmra.mrb[8].mxu0 %vm462_vm1, %v1743_v20  ;;  %v390_v49 = vrot.slane %v388_v34, 1  ;;  %v386_v53 = vor.u32 %v384_v37, %v382_v27  ;;  %v1774_v54 = vrot.slane %v1772_v38, 1  ;;  %v1777_v57 = vrot.slane %v1775_v40, 2 }
  0x30   : > { %4602 = vmatprep.mubr.msk.bf16.mxu0 %vm462_vm1, %v1752_v2  ;;  %v1761_v60 = vsel %vm1681_vm2, %v1751_v8, %v1760_v41  ;;  %v398_v63 = vrot.slane %v396_v47, 1  ;;  %v1770_v1 = vsel %vm1681_vm2, %v1760_v41, %v1769_v48  ;;  %v4086_v3 = vcombine.low %v2125_v51, %v5231_v9 }
  0x31   : > { %v394_v62 = vor.u32 %v392_v43, %v390_v49  ;;  %v404_v10 = vshll.u32 %v5387_v52, 16  ;;  %v391_v11 = vsel %vm307_vm0, %v386_v53, %v390_v49  ;;  %v400_v12 = vshrl.u32 %v5373_v35, 16 }
  0x32   : > { %v5401_v8 = vor.u32 %v1777_v57, %v1774_v54  ;;  %v408_v17 = vshrl.u32 %v5387_v52, 16  ;;  %v412_v20 = vshll.u32 %v5392_v0, 16  ;;  %v2133_v9 = vrot.slane %v4086_v3, 2  ;;  %v5435_v54 = vld [vmem:[%s5217_s25 + $0x88] sm:$0xff]  }
  0x33   : > { %v399_v13 = vsel %vm307_vm0, %v394_v62, %v398_v63  ;;  %v2134_v21 = vrot.slane %v5238_v14, 2  ;;  %v406_v23 = vrot.slane %v404_v10, 1  ;;  %v402_v26 = vor.u32 %v400_v12, %v398_v63 }
  0x34   : > { %4451 = vmatmul.mubr.msk.bf16.gmra.mrb[12].mxu1 %vm462_vm1, %v375_v36  ;;  %v1779_v27 = vsel %vm1681_vm2, %v1769_v48, %v5401_v8  ;;  %v414_v32 = vrot.slane %v412_v20, 1  ;;  %v420_v14 = vshll.u32 %v5409_v25, 16  ;;  %v2136_v37 = vrot.slane %v5252_v24, 2  ;;  %v5430_v48 = vld [vmem:[%s5217_s25 + $0x80] sm:$0xff]  }
  0x35   : > { %4454 = vmatprep.mubr.msk.bf16.mxu1 %vm462_vm1, %v383_v42  ;;  %v410_v2 = vor.u32 %v408_v17, %v406_v23  ;;  %v2135_v34 = vsel %vm2132_vm3, %v2133_v9, %v2134_v21  ;;  %v407_v36 = vsel %vm307_vm0, %v402_v26, %v406_v23  ;;  %v416_v38 = vshrl.u32 %v5392_v0, 16  ;;  %v5458_v17 = vld [vmem:[%s5217_s25 + $0x90] ss:$0 sps:$4 sm:$0x11]  }
  0x36   : > { %v424_v41 = vshrl.u32 %v5409_v25, 16  ;;  %v428_v42 = vshll.u32 %v5415_v33, 16  ;;  %v2138_v43 = vrot.slane %v5258_v30, 2  ;;  %v422_v47 = vrot.slane %v420_v14, 1  ;;  %v5441_v30 = vld [vmem:[%s6131_s1 + $0x38] sm:$0xff]  }
  0x37   : > { %4603 = vmatmul.mubr.msk.bf16.gmra.mrb[12].mxu0 %vm462_vm1, %v1761_v60  ;;  %v415_v40 = vsel %vm307_vm0, %v410_v2, %v414_v32  ;;  %v418_v24 = vor.u32 %v416_v38, %v414_v32  ;;  %v2137_v49 = vsel %vm2132_vm3, %v2134_v21, %v2136_v37  ;;  %v436_v60 = vshll.u32 %v5430_v48, 16 }
  0x38   : > { %4606 = vmatprep.mubr.msk.bf16.mxu0 %vm462_vm1, %v1770_v1  ;;  %v426_v51 = vor.u32 %v424_v41, %v422_v47  ;;  %v430_v53 = vrot.slane %v428_v42, 1  ;;  %v2139_v57 = vsel %vm2132_vm3, %v2136_v37, %v2138_v43  ;;  %v2140_v63 = vrot.slane %v5276_v45, 2  ;;  %v5485_v42 = vld [vmem:[%s5217_s25 + $0x60] sm:$0xff]  }
  0x39   : > { %v423_v62 = vsel %vm307_vm0, %v418_v24, %v422_v47  ;;  %v432_v1 = vshrl.u32 %v5415_v33, 16  ;;  %v440_v10 = vshrl.u32 %v5430_v48, 16  ;;  %v2142_v12 = vrot.slane %v5288_v55, 2  ;;  %v5508_v24 = vld [vmem:[%s5217_s25 + $0x70] sm:$0xff]  }
  0x3a   : > { %v431_v3 = vsel %vm307_vm0, %v426_v51, %v430_v53  ;;  %v448_v23 = vshrl.u32 %v5435_v54, 16  ;;  %v452_v26 = vshll.u32 %v5458_v17, 16  ;;  %v2146_v32 = vrot.slane %v5330_v39, 2 }
  0x3b   : > { %v434_v45 = vor.u32 %v432_v1, %v430_v53  ;;  %v2143_v21 = vsel %vm2132_vm3, %v2140_v63, %v2142_v12  ;;  %v2150_v39 = vrot.slane %v5355_v4, 2  ;;  %v5493_v4 = vld [vmem:[%s6131_s1 + $0x18] sm:$0xff]   ;;  %v2158_v51 = vrot.slane %v5508_v24, 2 }
  0x3c   : > { %4455 = vmatmul.mubr.msk.bf16.gmra.mrb[16].mxu1 %vm462_vm1, %v391_v11  ;;  %v444_v11 = vshll.u32 %v5435_v54, 16  ;;  %v454_v14 = vrot.slane %v452_v26, 1  ;;  %v5520_v53 = vld [vmem:[%s5217_s25 + $0x78] sm:$0xff]  }
  0x3d   : > { %4458 = vmatprep.mubr.msk.bf16.mxu1 %vm462_vm1, %v399_v13  ;;  %v438_v13 = vrot.slane %v436_v60, 1  ;;  %v5524_v60 = vld [vmem:[%s5217_s25 + $0x80] sm:$0xff]  }
  0x3e   : > { %v446_v9 = vrot.slane %v444_v11, 1  ;;  %v5540_v11 = vld [vmem:[%s5217_s25 + $0x90] sm:$0xff]  }
  0x3f   : > { %4607 = vmatmul.mubr.msk.bf16.gmra.mrb[16].mxu0 %vm462_vm1, %v1779_v27  ;;  %v442_v20 = vor.u32 %v440_v10, %v438_v13  ;;  %v439_v55 = vsel %vm307_vm0, %v434_v45, %v438_v13  ;;  %v2144_v27 = vrot.slane %v5311_v18, 2  ;;  %v2148_v18 = vrot.slane %v5343_v58, 2  ;;  %v2443_v45 = vld [vmem:[%s5217_s25 + $0x10] sm:$0xc] }
  0x40   : > { %4628 = vmatprep.mubr.msk.bf16.mxu0 %vm462_vm1, %v2135_v34  ;;  %v450_v34 = vor.u32 %v448_v23, %v446_v9  ;;  %v2152_v58 = vrot.slane %v5368_v22, 2  ;;  %v5503_v22 = vld [vmem:[%s5217_s25 + $0x68] sm:$0xff]   ;;  %v2166_v13 = vrot.slane %v5540_v11, 2  ;;  %v5563_v23 = vld [vmem:[%s5217_s25 + $0x18] sm:$0xff]  }
  0x41   : > { %v447_v2 = vsel %vm307_vm0, %v442_v20, %v446_v9  ;;  %v2147_v37 = vsel %vm2132_vm3, %v2144_v27, %v2146_v32  ;;  %v2151_v41 = vsel %vm2132_vm3, %v2148_v18, %v2150_v39  ;;  %v5556_v9 = vld [vmem:[%s5217_s25 + $0x98] ss:$0 sps:$4 sm:$0x33]  }
  0x42   : > { %v455_v38 = vsel %vm307_vm0, %v450_v34, %v454_v14  ;;  %v2168_v26 = vrot.slane %v5556_v9, 2  ;;  %v5576_v34 = vld [vmem:[%s5217_s25 + $0x20] sm:$0xff]  }
  0x44   : > { %4459 = vmatmul.mubr.msk.bf16.gmra.mrb[20].mxu1 %vm462_vm1, %v407_v36  ;;  %v2145_v36 = vsel %vm2132_vm3, %v2142_v12, %v2144_v27 }
  0x45   : > { %4462 = vmatprep.mubr.msk.bf16.mxu1 %vm462_vm1, %v415_v40  ;;  %v2149_v40 = vsel %vm2132_vm3, %v2146_v32, %v2148_v18  ;;  %v2169_v32 = vsel %vm2132_vm3, %v2166_v13, %v2168_v26 }
  0x47   : > { %4629 = vmatmul.mubr.msk.bf16.vlgmr.msra.gmra.mrb[0].mxu0 %vm462_vm1, %v2137_v49  ;;  %v2156_v49 = vrot.slane %v5503_v22, 2 }
  0x48   : > { %4665 = vmatpush3.bf16.msra.mxu0 %v5293_v56  ;;  %4632 = vmatprep.mubr.msk.bf16.mxu0 %vm462_vm1, %v2139_v57  ;;  %v2141_v56 = vsel %vm2132_vm3, %v2138_v43, %v2140_v63  ;;  %v2153_v43 = vsel %vm2132_vm3, %v2150_v39, %v2152_v58  ;;  %v2162_v63 = vrot.slane %v5524_v60, 2  ;;  %v5592_v39 = vld [vmem:[%s5217_s25 + $0x30] sm:$0xff]  }
  0x49   : > { %4702 = vmatprep.subr.bf16.mxu0 %v5441_v30  ;;  %v2159_v57 = vsel %vm2132_vm3, %v2156_v49, %v2158_v51 }
  0x4c   : > { %4463 = vmatmul.mubr.msk.bf16.gmra.mrb[24].mxu1 %vm462_vm1, %v423_v62  ;;  %v2160_v62 = vrot.slane %v5520_v53, 2 }
  0x4d   : > { %4466 = vmatprep.mubr.msk.bf16.mxu1 %vm462_vm1, %v431_v3  ;;  %v5536_v3 = vld [vmem:[%s5217_s25 + $0x88] sm:$0xff]  }
  0x4e   : > { %v2161_v1 = vsel %vm2132_vm3, %v2158_v51, %v2160_v62  ;;  %v2163_v10 = vsel %vm2132_vm3, %v2160_v62, %v2162_v63  ;;  %v2164_v12 = vrot.slane %v5536_v3, 2  ;;  %v5619_v51 = vld [vmem:[%s5217_s25 + $0x48] sm:$0xff]  }
  0x4f   : > { %4633 = vmatmul.mubr.msk.bf16.gmra.mrb[4].mxu0 %vm462_vm1, %v2141_v56  ;;  %v5550_v56 = vld [vmem:[%s5217_s25 + $0x14] sm:$0xf] }
  0x50   : > { %4636 = vmatprep.mubr.msk.bf16.mxu0 %vm462_vm1, %v2143_v21  ;;  %v2165_v20 = vsel %vm2132_vm3, %v2162_v63, %v2164_v12  ;;  %v2167_v21 = vsel %vm2132_vm3, %v2164_v12, %v2166_v13  ;;  %v2589_v63 = vrot.slane %v5619_v51, 2  ;;  %v922_v13 = vrot.slane %v5227_v7, 1 }
  0x54   : > { %4467 = vmatmul.mubr.msk.bf16.gmra.mrb[28].mxu1 %vm462_vm1, %v439_v55  ;;  %v5560_v55 = vcombine.low %v2443_v45, %v5550_v56 }
  0x55   : > { %4470 = vmatprep.mubr.msk.bf16.mxu1 %vm462_vm1, %v447_v2  ;;  %v2577_v2 = vrot.slane %v5563_v23, 2 }
  0x56   : > { %v2576_v27 = vrot.slane %v5560_v55, 2 }
  0x57   : > { %4637 = vmatmul.mubr.msk.bf16.gmra.mrb[8].mxu0 %vm462_vm1, %v2145_v36  ;;  %v5580_v36 = vld [vmem:[%s5217_s25 + $0x28] sm:$0xff]  }
  0x58   : > { %4640 = vmatprep.mubr.msk.bf16.mxu0 %vm462_vm1, %v2147_v37  ;;  %v2578_v14 = vsel %vm2132_vm3, %v2576_v27, %v2577_v2  ;;  %v2579_v37 = vrot.slane %v5576_v34, 2 }
  0x5a   : > { %v2580_v18 = vsel %vm2132_vm3, %v2577_v2, %v2579_v37  ;;  %v5651_v2 = vld [vmem:[%s5217_s25 + $0x60] sm:$0xff]  }
  0x5c   : > { %4471 = vmatmul.mubr.msk.bf16.gmra.mrb[32].mxu1 %vm462_vm1, %v455_v38  ;;  %v2581_v38 = vrot.slane %v5580_v36, 2 }
  0x5d   : > { %4476 = vmatprep.mubr.msk.bf16.mxu1 %vm462_vm1, %v5224_v6  ;;  %v2154_v6 = vrot.slane %v5485_v42, 2 }
  0x5f   : > { %4641 = vmatmul.mubr.msk.bf16.gmra.mrb[12].mxu0 %vm462_vm1, %v2149_v40  ;;  %v2155_v47 = vsel %vm2132_vm3, %v2152_v58, %v2154_v6  ;;  %v2582_v40 = vsel %vm2132_vm3, %v2579_v37, %v2581_v38  ;;  %v5601_v58 = vld [vmem:[%s6131_s1 + $0x40] sm:$0xff]   ;;  %v5656_v37 = vld [vmem:[%s5217_s25 + $0x68] sm:$0xff]  }
  0x60   : > { %4644 = vmatprep.mubr.msk.bf16.mxu0 %vm462_vm1, %v2151_v41  ;;  %v5596_v41 = vld [vmem:[%s5217_s25 + $0x38] sm:$0xff]  }
  0x64   : > { %4477 = vmatmul.mubr.msk.bf16.vlgmr.msra.gmra.mrb[0].mxu1 %vm462_vm1, %v5227_v7  ;;  %v924_v7 = vrot.slane %v5241_v15, 1 }
  0x65   : > { %4480 = vmatprep.mubr.msk.bf16.mxu1 %vm462_vm1, %v5241_v15  ;;  %4513 = vmatpush3.bf16.msra.mxu1 %v5263_v31  ;;  %v2157_v31 = vsel %vm2132_vm3, %v2154_v6, %v2156_v49  ;;  %v2583_v6 = vrot.slane %v5592_v39, 2  ;;  %v5615_v49 = vld [vmem:[%s5217_s25 + $0x40] sm:$0xff]   ;;  %v2595_v15 = vrot.slane %v5651_v2, 2 }
  0x66   : > { %4550 = vmatprep.subr.bf16.mxu1 %v5493_v4 }
  0x67   : > { %4645 = vmatmul.mubr.msk.bf16.gmra.mrb[16].mxu0 %vm462_vm1, %v2153_v43  ;;  %v2585_v43 = vrot.slane %v5596_v41, 2 }
  0x68   : > { %4648 = vmatprep.mubr.msk.bf16.mxu0 %vm462_vm1, %v2155_v47  ;;  %v2584_v47 = vsel %vm2132_vm3, %v2581_v38, %v2583_v6  ;;  %v925_v38 = vsel %vm920_vm4, %v922_v13, %v924_v7 }
  0x6c   : > { %4481 = vmatmul.mubr.msk.bf16.gmra.mrb[4].mxu1 %vm462_vm1, %v5255_v29 }
  0x6d   : > { %4484 = vmatprep.mubr.msk.bf16.mxu1 %vm462_vm1, %v5273_v44 }
  0x6f   : > { %4649 = vmatmul.mubr.msk.bf16.gmra.mrb[20].mxu0 %vm462_vm1, %v2157_v31  ;;  %v913_v31 = vld [vmem:[%s5217_s25] sm:$0xe] }
  0x70   : > { %4652 = vmatprep.mubr.msk.bf16.mxu0 %vm462_vm1, %v2159_v57  ;;  %v2587_v57 = vrot.slane %v5615_v49, 2  ;;  %v4002_v62 = vcombine.low %v913_v31, %v5221_v5  ;;  %v5638_v5 = vld [vmem:[%s5217_s25 + $0x58] sm:$0xff]  }
  0x71   : > { %v2593_v26 = vrot.slane %v5638_v5, 2 }
  0x72   : > { %v921_v12 = vrot.slane %v4002_v62, 1  ;;  %v2590_v45 = vsel %vm2132_vm3, %v2587_v57, %v2589_v63 }
  0x74   : > { %4485 = vmatmul.mubr.msk.bf16.gmra.mrb[8].mxu1 %vm462_vm1, %v5282_v50 }
  0x75   : > { %4488 = vmatprep.mubr.msk.bf16.mxu1 %vm462_vm1, %v5298_v61 }
  0x77   : > { %4653 = vmatmul.mubr.msk.bf16.gmra.mrb[24].mxu0 %vm462_vm1, %v2161_v1  ;;  %v2588_v1 = vsel %vm2132_vm3, %v2585_v43, %v2587_v57 }
  0x78   : > { %4656 = vmatprep.mubr.msk.bf16.mxu0 %vm462_vm1, %v2163_v10  ;;  %v5633_v10 = vld [vmem:[%s5217_s25 + $0x50] sm:$0xff]  }
  0x7c   : > { %4489 = vmatmul.mubr.msk.bf16.gmra.mrb[12].mxu1 %vm462_vm1, %v5320_v28 }
  0x7d   : > { %4492 = vmatprep.mubr.msk.bf16.mxu1 %vm462_vm1, %v5335_v46 }
  0x7f   : > { %4657 = vmatmul.mubr.msk.bf16.gmra.mrb[28].mxu0 %vm462_vm1, %v2165_v20  ;;  %v2591_v20 = vrot.slane %v5633_v10, 2 }
  0x80   : > { %4660 = vmatprep.mubr.msk.bf16.mxu0 %vm462_vm1, %v2167_v21  ;;  %v923_v21 = vsel %vm920_vm4, %v921_v12, %v922_v13  ;;  %v5694_v12 = vld [vmem:[%s5217_s25 + $0x80] sm:$0xff]   ;;  %v934_v13 = vrot.slane %v5320_v28, 1  ;;  %v936_v28 = vrot.slane %v5335_v46, 1 }
  0x81   : > { %v2592_v27 = vsel %vm2132_vm3, %v2589_v63, %v2591_v20  ;;  %v932_v63 = vrot.slane %v5298_v61, 1  ;;  %v2603_v61 = vrot.slane %v5694_v12, 2 }
  0x84   : > { %4493 = vmatmul.mubr.msk.bf16.gmra.mrb[16].mxu1 %vm462_vm1, %v5346_v59 }
  0x85   : > { %4496 = vmatprep.mubr.msk.bf16.mxu1 %vm462_vm1, %v5363_v19 }
  0x87   : > { %4661 = vmatmul.mubr.msk.bf16.gmra.mrb[32].mxu0 %vm462_vm1, %v2169_v32  ;;  %v926_v32 = vrot.slane %v5255_v29, 1  ;;  %v928_v29 = vrot.slane %v5273_v44, 1  ;;  %v5681_v44 = vld [vmem:[%s5217_s25 + $0x78] sm:$0xff]  }
  0x88   : > { %4666 = vmatprep.mubr.msk.bf16.mxu0 %vm462_vm1, %v2578_v14  ;;  %v2594_v14 = vsel %vm2132_vm3, %v2591_v20, %v2593_v26  ;;  %v2601_v62 = vrot.slane %v5681_v44, 2  ;;  %v5699_v20 = vld [vmem:[%s5217_s25 + $0x88] sm:$0xff]  }
  0x8c   : > { %4497 = vmatmul.mubr.msk.bf16.gmra.mrb[20].mxu1 %vm462_vm1, %v5373_v35 }
  0x8d   : > { %4500 = vmatprep.mubr.msk.bf16.mxu1 %vm462_vm1, %v5387_v52 }
  0x8f   : > { %4667 = vmatmul.mubr.msk.bf16.vlgmr.msra.gmra.mrb[0].mxu0 %vm462_vm1, %v2580_v18  ;;  %v927_v18 = vsel %vm920_vm4, %v924_v7, %v926_v32  ;;  %v2605_v7 = vrot.slane %v5699_v20, 2 }
  0x90   : > { %4703 = vmatpush3.bf16.msra.mxu0 %v5441_v30  ;;  %4670 = vmatprep.mubr.msk.bf16.mxu0 %vm462_vm1, %v2582_v40  ;;  %v2586_v30 = vsel %vm2132_vm3, %v2583_v6, %v2585_v43  ;;  %v2597_v40 = vrot.slane %v5656_v37, 2  ;;  %v2596_v6 = vsel %vm2132_vm3, %v2593_v26, %v2595_v15  ;;  %v5670_v43 = vld [vmem:[%s5217_s25 + $0x70] sm:$0xff]   ;;  %v935_v26 = vsel %vm920_vm4, %v932_v63, %v934_v13 }
  0x91   : > { %4740 = vmatprep.subr.bf16.mxu0 %v5601_v58 }
  0x92   : > { %v2598_v31 = vsel %vm2132_vm3, %v2595_v15, %v2597_v40  ;;  %v2606_v15 = vsel %vm2132_vm3, %v2603_v61, %v2605_v7 }
  0x94   : > { %4501 = vmatmul.mubr.msk.bf16.gmra.mrb[24].mxu1 %vm462_vm1, %v5392_v0 }
  0x95   : > { %4504 = vmatprep.mubr.msk.bf16.mxu1 %vm462_vm1, %v5409_v25 }
  0x97   : > { %4671 = vmatmul.mubr.msk.bf16.gmra.mrb[4].mxu0 %vm462_vm1, %v2584_v47  ;;  %v930_v47 = vrot.slane %v5282_v50, 1  ;;  %v2599_v50 = vrot.slane %v5670_v43, 2 }
  0x98   : > { %4674 = vmatprep.mubr.msk.bf16.mxu0 %vm462_vm1, %v2586_v30  ;;  %v5676_v30 = vld [vmem:[%s6131_s1 + $0x20] sm:$0xff]  }
  0x99   : > { %v931_v57 = vsel %vm920_vm4, %v928_v29, %v930_v47 }
  0x9c   : > { %4505 = vmatmul.mubr.msk.bf16.gmra.mrb[28].mxu1 %vm462_vm1, %v5415_v33 }
  0x9d   : > { %4508 = vmatprep.mubr.msk.bf16.mxu1 %vm462_vm1, %v5430_v48 }
  0x9f   : > { %4675 = vmatmul.mubr.msk.bf16.gmra.mrb[8].mxu0 %vm462_vm1, %v2588_v1  ;;  %v2600_v1 = vsel %vm2132_vm3, %v2597_v40, %v2599_v50 }
  0xa0   : > { %4678 = vmatprep.mubr.msk.bf16.mxu0 %vm462_vm1, %v2590_v45  ;;  %v2602_v45 = vsel %vm2132_vm3, %v2599_v50, %v2601_v62 }
  0xa4   : > { %4509 = vmatmul.mubr.msk.bf16.gmra.mrb[32].mxu1 %vm462_vm1, %v5435_v54 }
  0xa5   : > { %4514 = vmatprep.mubr.msk.bf16.mxu1 %vm462_vm1, %v923_v21  ;;  %v933_v21 = vsel %vm920_vm4, %v930_v47, %v932_v63  ;;  %v2903_v47 = vshrl.u32 %v5563_v23, 16  ;;  %v942_v63 = vrot.slane %v5373_v35, 1  ;;  %v2921_v35 = vshrl.u32 %v5580_v36, 16 }
  0xa7   : > { %4679 = vmatmul.mubr.msk.bf16.gmra.mrb[12].mxu0 %vm462_vm1, %v2592_v27  ;;  %v2604_v27 = vsel %vm2132_vm3, %v2601_v62, %v2603_v61  ;;  %v5144_v62 = vld [vmem:[%s5217_s25 + $0xa0] ss:$0 sps:$4 sm:$0x33]  }
  0xa8   : > { %4682 = vmatprep.mubr.msk.bf16.mxu0 %vm462_vm1, %v2594_v14  ;;  %v938_v14 = vrot.slane %v5346_v59, 1  ;;  %v2898_v59 = vshll.u32 %v5560_v55, 16  ;;  %v2611_v61 = vrot.slane %v5144_v62, 2 }
  0xaa   : > { %v939_v46 = vsel %vm920_vm4, %v936_v28, %v938_v14 }
  0xac   : > { %4515 = vmatmul.mubr.msk.bf16.vlgmr.msra.gmra.mrb[0].mxu1 %vm462_vm1, %v925_v38  ;;  %v5716_v38 = vld [vmem:[%s5217_s25 + $0x98] sm:$0xff]  }
  0xad   : > { %4518 = vmatprep.mubr.msk.bf16.mxu1 %vm462_vm1, %v927_v18  ;;  %4551 = vmatpush3.bf16.msra.mxu1 %v5493_v4  ;;  %v929_v4 = vsel %vm920_vm4, %v926_v32, %v928_v29  ;;  %v5712_v32 = vld [vmem:[%s5217_s25 + $0x90] sm:$0xff]   ;;  %v937_v18 = vsel %vm920_vm4, %v934_v13, %v936_v28  ;;  %v2609_v29 = vrot.slane %v5716_v38, 2  ;;  %v2900_v13 = vrot.slane %v2898_v59, 3 }
  0xae   : > { %4778 = vmatprep.subr.bf16.mxu1 %v5676_v30  ;;  %v2607_v40 = vrot.slane %v5712_v32, 2 }
  0xaf   : > { %4683 = vmatmul.mubr.msk.bf16.gmra.mrb[16].mxu0 %vm462_vm1, %v2596_v6  ;;  %v2895_v6 = vshrl.u32 %v5560_v55, 16  ;;  %v2905_v55 = vrot.slane %v2903_v47, 2  ;;  %v2923_v47 = vrot.slane %v2921_v35, 2  ;;  %v2951_v35 = vshll.u32 %v5615_v49, 16 }
  0xb0   : > { %4686 = vmatprep.mubr.msk.bf16.mxu0 %vm462_vm1, %v2598_v31  ;;  %v2906_v31 = vshll.u32 %v5563_v23, 16  ;;  %v2608_v50 = vsel %vm2132_vm3, %v2605_v7, %v2607_v40  ;;  %v2915_v7 = vshll.u32 %v5576_v34, 16 }
  0xb4   : > { %4519 = vmatmul.mubr.msk.bf16.gmra.mrb[4].mxu1 %vm462_vm1, %v929_v4  ;;  %v940_v4 = vrot.slane %v5363_v19, 1 }
  0xb5   : > { %4522 = vmatprep.mubr.msk.bf16.mxu1 %vm462_vm1, %v931_v57  ;;  %v2610_v57 = vsel %vm2132_vm3, %v2607_v40, %v2609_v29 }
  0xb6   : > { %v943_v19 = vsel %vm920_vm4, %v940_v4, %v942_v63 }
  0xb7   : > { %4687 = vmatmul.mubr.msk.bf16.gmra.mrb[20].mxu0 %vm462_vm1, %v2600_v1  ;;  %v2897_v1 = vrot.slane %v2895_v6, 2  ;;  %v946_v6 = vrot.slane %v5392_v0, 1  ;;  %v2939_v0 = vshrl.u32 %v5596_v41, 16 }
  0xb8   : > { %4690 = vmatprep.mubr.msk.bf16.mxu0 %vm462_vm1, %v2602_v45  ;;  %v2908_v45 = vrot.slane %v2906_v31, 3 }
  0xb9   : > { %v2901_v28 = vor.u32 %v2900_v13, %v2897_v1  ;;  %v2942_v1 = vshll.u32 %v5596_v41, 16 }
  0xbc   : > { %4523 = vmatmul.mubr.msk.bf16.gmra.mrb[8].mxu1 %vm462_vm1, %v933_v21  ;;  %v941_v21 = vsel %vm920_vm4, %v938_v14, %v940_v4  ;;  %v944_v14 = vrot.slane %v5387_v52, 1  ;;  %v2930_v52 = vshrl.u32 %v5592_v39, 16 }
  0xbd   : > { %4526 = vmatprep.mubr.msk.bf16.mxu1 %vm462_vm1, %v935_v26  ;;  %v2912_v26 = vshrl.u32 %v5576_v34, 16 }
  0xbe   : > { %v945_v4 = vsel %vm920_vm4, %v942_v63, %v944_v14  ;;  %v948_v63 = vrot.slane %v5409_v25, 1 }
  0xbf   : > { %4691 = vmatmul.mubr.msk.bf16.gmra.mrb[24].mxu0 %vm462_vm1, %v2604_v27  ;;  %v2909_v27 = vor.u32 %v2908_v45, %v2905_v55  ;;  %v2914_v40 = vrot.slane %v2912_v26, 2  ;;  %v2932_v55 = vrot.slane %v2930_v52, 2  ;;  %v2944_v26 = vrot.slane %v2942_v1, 3 }
  0xc0   : > { %4694 = vmatprep.mubr.msk.bf16.mxu0 %vm462_vm1, %v2606_v15  ;;  %v2924_v15 = vshll.u32 %v5580_v36, 16  ;;  %v2969_v52 = vshll.u32 %v5633_v10, 16 }
  0xc1   : > { %v2910_v59 = vsel %vm2893_vm5, %v2901_v28, %v2909_v27 }
  0xc2   : > { %v2926_v31 = vrot.slane %v2924_v15, 3  ;;  %v2957_v15 = vshrl.u32 %v5619_v51, 16 }
  0xc4   : > { %4527 = vmatmul.mubr.msk.bf16.gmra.mrb[12].mxu1 %vm462_vm1, %v937_v18  ;;  %v2612_v18 = vsel %vm2132_vm3, %v2609_v29, %v2611_v61  ;;  %v2933_v29 = vshll.u32 %v5592_v39, 16  ;;  %v2927_v62 = vor.u32 %v2926_v31, %v2923_v47  ;;  %v2959_v47 = vrot.slane %v2957_v15, 2  ;;  %v5151_v15 = vld [vmem:[%s5217_s25 + $0x18] sm:$0xff]  }
  0xc5   : > { %4530 = vmatprep.mubr.msk.bf16.mxu1 %vm462_vm1, %v939_v46  ;;  %v2917_v46 = vrot.slane %v2915_v7, 3  ;;  %v949_v7 = vsel %vm920_vm4, %v946_v6, %v948_v63 }
  0xc6   : > { %v2935_v45 = vrot.slane %v2933_v29, 3 }
  0xc7   : > { %4695 = vmatmul.mubr.msk.bf16.gmra.mrb[28].mxu0 %vm462_vm1, %v2608_v50  ;;  %v2918_v50 = vor.u32 %v2917_v46, %v2914_v40  ;;  %v2953_v46 = vrot.slane %v2951_v35, 3  ;;  %v2993_v35 = vshrl.u32 %v5656_v37, 16 }
  0xc8   : > { %4698 = vmatprep.mubr.msk.bf16.mxu0 %vm462_vm1, %v2610_v57  ;;  %v947_v57 = vsel %vm920_vm4, %v944_v14, %v946_v6  ;;  %v2936_v28 = vor.u32 %v2935_v45, %v2932_v55  ;;  %v2960_v14 = vshll.u32 %v5619_v51, 16  ;;  %v954_v6 = vrot.slane %v5435_v54, 1  ;;  %v5150_v45 = vld [vmem:[%s5217_s25 + $0x10] sm:$0xff]  }
  0xc9   : > { %v2919_v13 = vsel %vm2893_vm5, %v2909_v27, %v2918_v50  ;;  %v2928_v61 = vsel %vm2893_vm5, %v2918_v50, %v2927_v62  ;;  %v2948_v27 = vshrl.u32 %v5615_v49, 16  ;;  %v2966_v50 = vshrl.u32 %v5633_v10, 16 }
  0xca   : > { %v2962_v31 = vrot.slane %v2960_v14, 3  ;;  %v2975_v54 = vshrl.u32 %v5638_v5, 16  ;;  %v1364_v55 = vrot.slane %v5244_v16, 1  ;;  %v2987_v16 = vshll.u32 %v5651_v2, 16 }
  0xcb   : > { %v2950_v40 = vrot.slane %v2948_v27, 2  ;;  %v2968_v1 = vrot.slane %v2966_v50, 2  ;;  %v1367_v14 = vrot.slane %v5151_v15, 1 }
  0xcc   : > { %4531 = vmatmul.mubr.msk.bf16.gmra.mrb[16].mxu1 %vm462_vm1, %v941_v21  ;;  %v950_v21 = vrot.slane %v5415_v33, 1  ;;  %v2963_v29 = vor.u32 %v2962_v31, %v2959_v47  ;;  %v2995_v47 = vrot.slane %v2993_v35, 2  ;;  %v3032_v35 = vshll.u32 %v5699_v20, 16 }
  0xcd   : > { %4534 = vmatprep.mubr.msk.bf16.mxu1 %vm462_vm1, %v943_v19  ;;  %v2941_v19 = vrot.slane %v2939_v0, 2  ;;  %v956_v0 = vrot.slane %v5458_v17, 1 }
  0xce   : > { %v951_v25 = vsel %vm920_vm4, %v948_v63, %v950_v21 }
  0xcf   : > { %4699 = vmatmul.mubr.msk.bf16.gmra.mrb[32].mxu0 %vm462_vm1, %v2612_v18  ;;  %v2945_v33 = vor.u32 %v2944_v26, %v2941_v19  ;;  %v2937_v18 = vsel %vm2893_vm5, %v2927_v62, %v2936_v28  ;;  %v2978_v62 = vshll.u32 %v5638_v5, 16  ;;  %v2977_v19 = vrot.slane %v2975_v54, 2 }
  0xd0   : > { %4704 = vmatprep.mubr.msk.bf16.mxu0 %vm462_vm1, %v2910_v59  ;;  %v3011_v54 = vshrl.u32 %v5681_v44, 16 }
  0xd1   : > { %v2946_v59 = vsel %vm2893_vm5, %v2936_v28, %v2945_v33  ;;  %v2980_v26 = vrot.slane %v2978_v62, 3  ;;  %v3014_v62 = vshll.u32 %v5681_v44, 16 }
  0xd3   : > { %v2981_v27 = vor.u32 %v2980_v26, %v2977_v19  ;;  %v3013_v19 = vrot.slane %v3011_v54, 2  ;;  %v3016_v26 = vrot.slane %v3014_v62, 3  ;;  %v3050_v54 = vshll.u32 %v5716_v38, 16  ;;  %v5157_v62 = vld [vmem:[%s5217_s25 + $0x48] sm:$0xff]  }
  0xd4   : > { %4535 = vmatmul.mubr.msk.bf16.gmra.mrb[20].mxu1 %vm462_vm1, %v945_v4 }
  0xd5   : > { %4538 = vmatprep.mubr.msk.bf16.mxu1 %vm462_vm1, %v947_v57 }
  0xd7   : > { %4705 = vmatmul.mubr.msk.bf16.vlgmr.msra.gmra.mrb[0].mxu0 %vm462_vm1, %v2919_v13  ;;  %v2971_v13 = vrot.slane %v2969_v52, 3  ;;  %v3005_v52 = vshll.u32 %v5670_v43, 16 }
  0xd8   : > { %4741 = vmatpush3.bf16.msra.mxu0 %v5601_v58  ;;  %4708 = vmatprep.mubr.msk.bf16.mxu0 %vm462_vm1, %v2928_v61  ;;  %v952_v58 = vrot.slane %v5430_v48, 1  ;;  %v2954_v48 = vor.u32 %v2953_v46, %v2950_v40  ;;  %v2989_v40 = vrot.slane %v2987_v16, 3  ;;  %v5152_v46 = vld [vmem:[%s5217_s25 + $0x20] sm:$0xff]   ;;  %v3017_v16 = vor.u32 %v3016_v26, %v3013_v19 }
  0xd9   : > { %v2972_v17 = vor.u32 %v2971_v13, %v2968_v1  ;;  %v3052_v26 = vrot.slane %v3050_v54, 3  ;;  %v3350_v54 = vrot.slane %v5580_v36, 3  ;;  %v3352_v36 = vrot.slane %v5592_v39, 3 }
  0xda   : > { %v953_v4 = vsel %vm920_vm4, %v950_v21, %v952_v58  ;;  %v955_v57 = vsel %vm920_vm4, %v952_v58, %v954_v6  ;;  %v2955_v63 = vsel %vm2893_vm5, %v2945_v33, %v2954_v48  ;;  %v1365_v21 = vrot.slane %v5150_v45, 1  ;;  %v5154_v45 = vld [vmem:[%s5217_s25 + $0x30] sm:$0xff]  }
  0xdb   : > { %v2964_v61 = vsel %vm2893_vm5, %v2954_v48, %v2963_v29  ;;  %v2996_v33 = vshll.u32 %v5656_v37, 16  ;;  %v2973_v58 = vsel %vm2893_vm5, %v2963_v29, %v2972_v17 }
  0xdc   : > { %4539 = vmatmul.mubr.msk.bf16.gmra.mrb[24].mxu1 %vm462_vm1, %v949_v7  ;;  %v957_v7 = vsel %vm920_vm4, %v954_v6, %v956_v0  ;;  %v1366_v28 = vsel %vm920_vm4, %v1364_v55, %v1365_v21  ;;  %v1369_v6 = vrot.slane %v5152_v46, 1  ;;  %v5153_v0 = vld [vmem:[%s5217_s25 + $0x28] sm:$0xff]   ;;  %v3007_v55 = vrot.slane %v3005_v52, 3 }
  0xdd   : > { %4542 = vmatprep.mubr.msk.bf16.mxu1 %vm462_vm1, %v951_v25  ;;  %v2984_v25 = vshrl.u32 %v5651_v2, 16  ;;  %v2998_v31 = vrot.slane %v2996_v33, 3  ;;  %v1371_v1 = vrot.slane %v5153_v0, 1  ;;  %v5155_v33 = vld [vmem:[%s5217_s25 + $0x38] sm:$0xff]   ;;  %v1379_v0 = vrot.slane %v5157_v62, 1 }
  0xde   : > { %v1370_v48 = vsel %vm920_vm4, %v1367_v14, %v1369_v6  ;;  %v1375_v15 = vrot.slane %v5155_v33, 1  ;;  %v1391_v62 = vrot.slane %v5520_v53, 1 }
  0xdf   : > { %4709 = vmatmul.mubr.msk.bf16.gmra.mrb[4].mxu0 %vm462_vm1, %v2937_v18  ;;  %v2986_v18 = vrot.slane %v2984_v25, 2  ;;  %v2999_v29 = vor.u32 %v2998_v31, %v2995_v47  ;;  %v3023_v25 = vshll.u32 %v5694_v12, 16  ;;  %v3034_v47 = vrot.slane %v3032_v35, 3  ;;  %v5159_v35 = vld [vmem:[%s5217_s25 + $0x58] sm:$0xff]  }
  0xe0   : > { %4712 = vmatprep.mubr.msk.bf16.mxu0 %vm462_vm1, %v2946_v59  ;;  %v2982_v59 = vsel %vm2893_vm5, %v2972_v17, %v2981_v27  ;;  %v1383_v33 = vrot.slane %v5159_v35, 1  ;;  %v1790_v35 = vshrl.u32 %v5503_v22, 16 }
  0xe1   : > { %v2990_v50 = vor.u32 %v2989_v40, %v2986_v18  ;;  %v3025_v18 = vrot.slane %v3023_v25, 3  ;;  %v5156_v40 = vld [vmem:[%s5217_s25 + $0x40] sm:$0xff]  }
  0xe2   : > { %v1377_v46 = vrot.slane %v5156_v40, 1 }
  0xe4   : > { %4543 = vmatmul.mubr.msk.bf16.gmra.mrb[28].mxu1 %vm462_vm1, %v953_v4  ;;  %v1368_v4 = vsel %vm920_vm4, %v1365_v21, %v1367_v14  ;;  %v1373_v21 = vrot.slane %v5154_v45, 1 }
  0xe5   : > { %4546 = vmatprep.mubr.msk.bf16.mxu1 %vm462_vm1, %v955_v57  ;;  %v3002_v57 = vshrl.u32 %v5670_v43, 16 }
  0xe6   : > { %v1376_v31 = vsel %vm920_vm4, %v1373_v21, %v1375_v15 }
  0xe7   : > { %4713 = vmatmul.mubr.msk.bf16.gmra.mrb[8].mxu0 %vm462_vm1, %v2955_v63  ;;  %v2991_v63 = vsel %vm2893_vm5, %v2981_v27, %v2990_v50  ;;  %v3004_v13 = vrot.slane %v3002_v57, 2  ;;  %v3029_v27 = vshrl.u32 %v5699_v20, 16  ;;  %v3041_v57 = vshll.u32 %v5712_v32, 16 }
  0xe8   : > { %4716 = vmatprep.mubr.msk.bf16.mxu0 %vm462_vm1, %v2964_v61  ;;  %v3000_v61 = vsel %vm2893_vm5, %v2990_v50, %v2999_v29  ;;  %v1378_v50 = vsel %vm920_vm4, %v1375_v15, %v1377_v46 }
  0xe9   : > { %v3008_v17 = vor.u32 %v3007_v55, %v3004_v13  ;;  %v3043_v13 = vrot.slane %v3041_v57, 3  ;;  %v5158_v55 = vld [vmem:[%s5217_s25 + $0x50] sm:$0xff]  }
  0xea   : > { %v1381_v45 = vrot.slane %v5158_v55, 1  ;;  %v3354_v55 = vrot.slane %v5596_v41, 3 }
  0xeb   : > { %v3009_v14 = vsel %vm2893_vm5, %v2999_v29, %v3008_v17  ;;  %v3047_v29 = vshrl.u32 %v5716_v38, 16 }
  0xec   : > { %4547 = vmatmul.mubr.msk.bf16.gmra.mrb[32].mxu1 %vm462_vm1, %v957_v7  ;;  %v1372_v7 = vsel %vm920_vm4, %v1369_v6, %v1371_v1  ;;  %v3018_v6 = vsel %vm2893_vm5, %v3008_v17, %v3017_v16  ;;  %v3355_v39 = vsel %vm3344_vm6, %v3352_v36, %v3354_v55 }
  0xed   : > { %4552 = vmatprep.mubr.msk.bf16.mxu1 %vm462_vm1, %v1366_v28  ;;  %v3020_v28 = vshrl.u32 %v5694_v12, 16  ;;  %v3049_v19 = vrot.slane %v3047_v29, 2 }
  0xef   : > { %4717 = vmatmul.mubr.msk.bf16.gmra.mrb[12].mxu0 %vm462_vm1, %v2973_v58  ;;  %v3022_v58 = vrot.slane %v3020_v28, 2 }
  0xf0   : > { %4720 = vmatprep.mubr.msk.bf16.mxu0 %vm462_vm1, %v2982_v59  ;;  %v3031_v59 = vrot.slane %v3029_v27, 2  ;;  %v3337_v27 = vld [vmem:[%s5217_s25 + $0x10] sm:$0x8] }
  0xf2   : > { %v3035_v52 = vor.u32 %v3034_v47, %v3031_v59 }
  0xf4   : > { %4553 = vmatmul.mubr.msk.bf16.vlgmr.msra.gmra.mrb[0].mxu1 %vm462_vm1, %v1368_v4  ;;  %v3026_v4 = vor.u32 %v3025_v18, %v3022_v58  ;;  %v1385_v18 = vrot.slane %v5485_v42, 1 }
  0xf5   : > { %4556 = vmatprep.mubr.msk.bf16.mxu1 %vm462_vm1, %v1370_v48  ;;  %4779 = vmatpush3.bf16.msra.mxu1 %v5676_v30  ;;  %v1374_v30 = vsel %vm920_vm4, %v1371_v1, %v1373_v21  ;;  %v3038_v48 = vshrl.u32 %v5712_v32, 16  ;;  %v5851_v21 = vld [vmem:[%s5217_s25 + $0xa0] ss:$0 sps:$4 sm:$0x77]  }
  0xf6   : > { %v3027_v1 = vsel %vm2893_vm5, %v3017_v16, %v3026_v4  ;;  %v3056_v28 = vshrl.u32 %v5851_v21, 16  ;;  %v3059_v25 = vshll.u32 %v5851_v21, 16  ;;  %v3053_v16 = vor.u32 %v3052_v26, %v3049_v19 }
  0xf7   : > { %4721 = vmatmul.mubr.msk.bf16.gmra.mrb[16].mxu0 %vm462_vm1, %v2991_v63  ;;  %v3040_v63 = vrot.slane %v3038_v48, 2  ;;  %v1386_v47 = vsel %vm920_vm4, %v1383_v33, %v1385_v18  ;;  %v1389_v48 = vrot.slane %v5508_v24, 1  ;;  %v1397_v19 = vrot.slane %v5540_v11, 1 }
  0xf8   : > { %4724 = vmatprep.mubr.msk.bf16.mxu0 %vm462_vm1, %v3000_v61  ;;  %v3036_v61 = vsel %vm2893_vm5, %v3026_v4, %v3035_v52  ;;  %v3061_v58 = vrot.slane %v3059_v25, 3  ;;  %v3346_v4 = vrot.slane %v5563_v23, 3  ;;  %v3348_v23 = vrot.slane %v5576_v34, 3 }
  0xf9   : > { %v3044_v17 = vor.u32 %v3043_v13, %v3040_v63  ;;  %v1392_v34 = vsel %vm920_vm4, %v1389_v48, %v1391_v62  ;;  %v1781_v26 = vshrl.u32 %v5485_v42, 16 }
  0xfa   : > { %v3351_v63 = vsel %vm3344_vm6, %v3348_v23, %v3350_v54 }
  0xfb   : > { %v3045_v15 = vsel %vm2893_vm5, %v3035_v52, %v3044_v17  ;;  %v3054_v40 = vsel %vm2893_vm5, %v3044_v17, %v3053_v16  ;;  %v5148_v17 = vld [vmem:[%s5217_s25 + $0x98] ss:$0 sps:$4 sm:$0x11]   ;;  %v1783_v25 = vrot.slane %v1781_v26, 1 }
  0xfc   : > { %4557 = vmatmul.mubr.msk.bf16.gmra.mrb[4].mxu1 %vm462_vm1, %v1372_v7  ;;  %v1380_v7 = vsel %vm920_vm4, %v1377_v46, %v1379_v0  ;;  %v4170_v46 = vcombine.low %v3337_v27, %v5550_v56  ;;  %v3358_v27 = vrot.slane %v5619_v51, 3 }
  0xfd   : > { %4560 = vmatprep.mubr.msk.bf16.mxu1 %vm462_vm1, %v1374_v30  ;;  %v1382_v30 = vsel %vm920_vm4, %v1379_v0, %v1381_v45  ;;  %v3349_v0 = vsel %vm3344_vm6, %v3346_v4, %v3348_v23 }
  0xff   : > { %4725 = vmatmul.mubr.msk.bf16.gmra.mrb[20].mxu0 %vm462_vm1, %v3009_v14  ;;  %v3058_v14 = vrot.slane %v3056_v28, 2 }
 0x100   : > { %4728 = vmatprep.mubr.msk.bf16.mxu0 %vm462_vm1, %v3018_v6  ;;  %v1384_v6 = vsel %vm920_vm4, %v1381_v45, %v1383_v33  ;;  %v1395_v45 = vrot.slane %v5536_v3, 1  ;;  %v1793_v33 = vshll.u32 %v5503_v22, 16 }
 0x101   : > { %v3062_v59 = vor.u32 %v3061_v58, %v3058_v14  ;;  %v1802_v58 = vshll.u32 %v5508_v24, 16 }
 0x102   : > { %v1398_v28 = vsel %vm920_vm4, %v1395_v45, %v1397_v19 }
 0x103   : > { %v3063_v56 = vsel %vm2893_vm5, %v3053_v16, %v3062_v59 }
 0x104   : > { %4561 = vmatmul.mubr.msk.bf16.gmra.mrb[8].mxu1 %vm462_vm1, %v1376_v31  ;;  %v3345_v31 = vrot.slane %v4170_v46, 3  ;;  %v1795_v46 = vrot.slane %v1793_v33, 2 }
 0x105   : > { %4564 = vmatprep.mubr.msk.bf16.mxu1 %vm462_vm1, %v1378_v50  ;;  %v1387_v50 = vrot.slane %v5503_v22, 1 }
 0x106   : > { %v3347_v57 = vsel %vm3344_vm6, %v3345_v31, %v3346_v4  ;;  %v3362_v31 = vrot.slane %v5638_v5, 3  ;;  %v1808_v4 = vshrl.u32 %v5520_v53, 16 }
 0x107   : > { %4729 = vmatmul.mubr.msk.bf16.gmra.mrb[24].mxu0 %vm462_vm1, %v3027_v1  ;;  %v1388_v52 = vsel %vm920_vm4, %v1385_v18, %v1387_v50  ;;  %v1390_v29 = vsel %vm920_vm4, %v1387_v50, %v1389_v48  ;;  %v1393_v1 = vrot.slane %v5524_v60, 1  ;;  %v1811_v50 = vshll.u32 %v5520_v53, 16 }
 0x108   : > { %4732 = vmatprep.mubr.msk.bf16.mxu0 %vm462_vm1, %v3036_v61  ;;  %v3353_v61 = vsel %vm3344_vm6, %v3350_v54, %v3352_v36 }
 0x109   : > { %v1394_v13 = vsel %vm920_vm4, %v1391_v62, %v1393_v1  ;;  %v1396_v41 = vsel %vm920_vm4, %v1393_v1, %v1395_v45  ;;  %v1813_v23 = vrot.slane %v1811_v50, 2  ;;  %v1826_v1 = vshrl.u32 %v5536_v3, 16 }
 0x10b   : > { %v1828_v45 = vrot.slane %v1826_v1, 1 }
 0x10c   : > { %4565 = vmatmul.mubr.msk.bf16.gmra.mrb[12].mxu1 %vm462_vm1, %v1380_v7  ;;  %v1784_v7 = vshll.u32 %v5485_v42, 16  ;;  %v1399_v42 = vrot.slane %v5148_v17, 1  ;;  %v1847_v17 = vshll.u32 %v5556_v9, 16 }
 0x10d   : > { %4568 = vmatprep.mubr.msk.bf16.mxu1 %vm462_vm1, %v1382_v30  ;;  %v3356_v30 = vrot.slane %v5615_v49, 3  ;;  %v1799_v49 = vshrl.u32 %v5508_v24, 16 }
 0x10e   : > { %v1786_v16 = vrot.slane %v1784_v7, 2  ;;  %v1400_v51 = vsel %vm920_vm4, %v1397_v19, %v1399_v42  ;;  %v3368_v19 = vrot.slane %v5670_v43, 3 }
 0x10f   : > { %4733 = vmatmul.mubr.msk.bf16.gmra.mrb[28].mxu0 %vm462_vm1, %v3045_v15  ;;  %v3357_v15 = vsel %vm3344_vm6, %v3354_v55, %v3356_v30  ;;  %v3359_v18 = vsel %vm3344_vm6, %v3356_v30, %v3358_v27  ;;  %v1801_v59 = vrot.slane %v1799_v49, 1  ;;  %v3378_v49 = vrot.slane %v5716_v38, 3 }
 0x110   : > { %4736 = vmatprep.mubr.msk.bf16.mxu0 %vm462_vm1, %v3054_v40  ;;  %v1787_v14 = vor.u32 %v1786_v16, %v1783_v25  ;;  %v1792_v40 = vrot.slane %v1790_v35, 1  ;;  %v3374_v35 = vrot.slane %v5699_v20, 3 }
 0x112   : > { %v1788_v22 = vsel %vm1681_vm2, %v5401_v8, %v1787_v14  ;;  %v1796_v24 = vor.u32 %v1795_v46, %v1792_v40  ;;  %v1820_v8 = vshll.u32 %v5524_v60, 16 }
 0x114   : > { %4569 = vmatmul.mubr.msk.bf16.gmra.mrb[16].mxu1 %vm462_vm1, %v1384_v6  ;;  %v3360_v6 = vrot.slane %v5633_v10, 3  ;;  %v1817_v10 = vshrl.u32 %v5524_v60, 16  ;;  %v1797_v5 = vsel %vm1681_vm2, %v1787_v14, %v1796_v24  ;;  %v1822_v62 = vrot.slane %v1820_v8, 2 }
 0x115   : > { %4572 = vmatprep.mubr.msk.bf16.mxu1 %vm462_vm1, %v1386_v47  ;;  %v1804_v47 = vrot.slane %v1802_v58, 2 }
 0x116   : > { %v1819_v54 = vrot.slane %v1817_v10, 1 }
 0x117   : > { %4737 = vmatmul.mubr.msk.bf16.gmra.mrb[32].mxu0 %vm462_vm1, %v3063_v56  ;;  %v3361_v56 = vsel %vm3344_vm6, %v3358_v27, %v3360_v6  ;;  %v1805_v48 = vor.u32 %v1804_v47, %v1801_v59  ;;  %v3372_v27 = vrot.slane %v5694_v12, 3  ;;  %v3376_v12 = vrot.slane %v5712_v32, 3 }
 0x118   : > { %4742 = vmatprep.mubr.msk.bf16.mxu0 %vm462_vm1, %v3347_v57  ;;  %v3363_v57 = vsel %vm3344_vm6, %v3360_v6, %v3362_v31  ;;  %v1823_v36 = vor.u32 %v1822_v62, %v1819_v54 }
 0x119   : > { %v1806_v53 = vsel %vm1681_vm2, %v1796_v24, %v1805_v48  ;;  %v3377_v20 = vsel %vm3344_vm6, %v3374_v35, %v3376_v12  ;;  %v3379_v58 = vsel %vm3344_vm6, %v3376_v12, %v3378_v49 }
 0x11c   : > { %4573 = vmatmul.mubr.msk.bf16.gmra.mrb[20].mxu1 %vm462_vm1, %v1388_v52  ;;  %v1810_v52 = vrot.slane %v1808_v4, 1 }
 0x11d   : > { %4576 = vmatprep.mubr.msk.bf16.mxu1 %vm462_vm1, %v1390_v29  ;;  %v3364_v29 = vrot.slane %v5651_v2, 3  ;;  %v1835_v2 = vshrl.u32 %v5540_v11, 16 }
 0x11e   : > { %v1814_v60 = vor.u32 %v1813_v23, %v1810_v52 }
 0x11f   : > { %4743 = vmatmul.mubr.msk.bf16.vlgmr.msra.gmra.mrb[0].mxu0 %vm462_vm1, %v3349_v0  ;;  %v3366_v0 = vrot.slane %v5656_v37, 3  ;;  %v1837_v26 = vrot.slane %v1835_v2, 1 }
 0x120   : > { %4746 = vmatprep.mubr.msk.bf16.mxu0 %vm462_vm1, %v3351_v63  ;;  %v1829_v63 = vshll.u32 %v5536_v3, 16  ;;  %v1815_v37 = vsel %vm1681_vm2, %v1805_v48, %v1814_v60  ;;  %v1824_v3 = vsel %vm1681_vm2, %v1814_v60, %v1823_v36 }
 0x121   : > { %v3367_v55 = vsel %vm3344_vm6, %v3364_v29, %v3366_v0  ;;  %v3369_v30 = vsel %vm3344_vm6, %v3366_v0, %v3368_v19 }
 0x124   : > { %4577 = vmatmul.mubr.msk.bf16.gmra.mrb[24].mxu1 %vm462_vm1, %v1392_v34  ;;  %v3365_v34 = vsel %vm3344_vm6, %v3362_v31, %v3364_v29  ;;  %v6004_v29 = vld [vmem:[%s6132_s2] ss:$0 sm:$0xff] }
 0x125   : > { %4580 = vmatprep.mubr.msk.bf16.mxu1 %vm462_vm1, %v1394_v13  ;;  %v1838_v13 = vshll.u32 %v5540_v11, 16 }
 0x127   : > { %4747 = vmatmul.mubr.msk.bf16.gmra.mrb[4].mxu0 %vm462_vm1, %v3353_v61  ;;  %v1831_v61 = vrot.slane %v1829_v63, 2  ;;  %v1840_v7 = vrot.slane %v1838_v13, 2 }
 0x128   : > { %4750 = vmatprep.mubr.msk.bf16.mxu0 %vm462_vm1, %v3355_v39  ;;  %v3370_v39 = vrot.slane %v5681_v44, 3  ;;  %v1849_v44 = vrot.slane %v1847_v17, 2 }
 0x129   : > { %v1832_v11 = vor.u32 %v1831_v61, %v1828_v45 }
 0x12a   : > { %v3371_v43 = vsel %vm3344_vm6, %v3368_v19, %v3370_v39  ;;  %v3373_v33 = vsel %vm3344_vm6, %v3370_v39, %v3372_v27 }
 0x12b   : > { %v1833_v25 = vsel %vm1681_vm2, %v1823_v36, %v1832_v11 }
 0x12c   : > { %4581 = vmatmul.mubr.msk.bf16.gmra.mrb[28].mxu1 %vm462_vm1, %v1396_v41  ;;  %v1844_v41 = vshrl.u32 %v5556_v9, 16 }
 0x12d   : > { %4584 = vmatprep.mubr.msk.bf16.mxu1 %vm462_vm1, %v1398_v28  ;;  %v1841_v28 = vor.u32 %v1840_v7, %v1837_v26 }
 0x12e   : > { %v1846_v16 = vrot.slane %v1844_v41, 1 }
 0x12f   : > { %4751 = vmatmul.mubr.msk.bf16.gmra.mrb[8].mxu0 %vm462_vm1, %v3357_v15  ;;  %v1842_v42 = vsel %vm1681_vm2, %v1832_v11, %v1841_v28  ;;  %v3375_v15 = vsel %vm3344_vm6, %v3372_v27, %v3374_v35 }
 0x130   : > { %4754 = vmatprep.mubr.msk.bf16.mxu0 %vm462_vm1, %v3359_v18  ;;  %v1850_v9 = vor.u32 %v1849_v44, %v1846_v16  ;;  %v3380_v18 = vrot.slane %v5851_v21, 3 }
 0x132   : > { %v1851_v14 = vsel %vm1681_vm2, %v1841_v28, %v1850_v9 }
 0x134   : > { %4585 = vmatmul.mubr.msk.bf16.gmra.mrb[32].mxu1 %vm462_vm1, %v1400_v51  ;;  %v3381_v51 = vsel %vm3344_vm6, %v3378_v49, %v3380_v18 }
 0x135   : > { %4610 = vmatprep.mubr.msk.bf16.mxu1 %vm462_vm1, %v1788_v22 }
 0x137   : > { %4755 = vmatmul.mubr.msk.bf16.gmra.mrb[12].mxu0 %vm462_vm1, %v3361_v56 }
 0x138   : > { %4758 = vmatprep.mubr.msk.bf16.mxu0 %vm462_vm1, %v3363_v57 }
 0x13c   : > { %4611 = vmatmul.mubr.msk.bf16.vlgmr.msra.gmra.mrb[20].mxu1 %vm462_vm1, %v1797_v5 }
 0x13d   : > { %4614 = vmatprep.mubr.msk.bf16.mxu1 %vm462_vm1, %v1806_v53 }
 0x13f   : > { %4759 = vmatmul.mubr.msk.bf16.gmra.mrb[16].mxu0 %vm462_vm1, %v3365_v34 }
 0x140   : > { %4762 = vmatprep.mubr.msk.bf16.mxu0 %vm462_vm1, %v3367_v55 }
 0x144   : > { %4615 = vmatmul.mubr.msk.bf16.gmra.mrb[24].mxu1 %vm462_vm1, %v1815_v37 }
 0x145   : > { %4618 = vmatprep.mubr.msk.bf16.mxu1 %vm462_vm1, %v1824_v3 }
 0x147   : > { %4763 = vmatmul.mubr.msk.bf16.gmra.mrb[20].mxu0 %vm462_vm1, %v3369_v30 }
 0x148   : > { %4766 = vmatprep.mubr.msk.bf16.mxu0 %vm462_vm1, %v3371_v43 }
 0x14c   : > { %4619 = vmatmul.mubr.msk.bf16.gmra.mrb[28].mxu1 %vm462_vm1, %v1833_v25 }
 0x14d   : > { %4622 = vmatprep.mubr.msk.bf16.mxu1 %vm462_vm1, %v1842_v42 }
 0x14f   : > { %4767 = vmatmul.mubr.msk.bf16.gmra.mrb[24].mxu0 %vm462_vm1, %v3373_v33 }
 0x150   : > { %4770 = vmatprep.mubr.msk.bf16.mxu0 %vm462_vm1, %v3375_v15 }
 0x154   : > { %4623 = vmatmul.mubr.msk.bf16.gmra.mrb[32].mxu1 %vm462_vm1, %v1851_v14 }
 0x157   : > { %4771 = vmatmul.mubr.msk.bf16.gmra.mrb[28].mxu0 %vm462_vm1, %v3377_v20 }
 0x158   : > { %4774 = vmatprep.mubr.msk.bf16.mxu0 %vm462_vm1, %v3379_v58 }
 0x15f   : > { %4775 = vmatmul.mubr.msk.bf16.gmra.mrb[32].mxu0 %vm462_vm1, %v3381_v51 }
 0x1c7   : > { %v4554_v40 = vpop.f32.mrb[0].mxu1 }
 0x1c8   : > { %v1495_v32 = vpop.f32.mrb[1].mxu1 }
 0x1c9   : > { %v4555_v46 = vpop.f32.mrb[2].mxu1 }
 0x1ca   : > { %v1498_v38 = vpop.f32.mrb[3].mxu1 }
 0x1cf   : > { %v4558_v6 = vpop.f32.mrb[4].mxu1 }
 0x1d0   : > { %v1511_v22 = vpop.f32.mrb[5].mxu1 }
 0x1d1   : > { %v4559_v59 = vpop.f32.mrb[6].mxu1 }
 0x1d2   : > { %v1514_v47 = vpop.f32.mrb[7].mxu1 }
 0x1d7   : > { %v4562_v31 = vpop.f32.mrb[8].mxu1 }
 0x1d8   : > { %v1527_v24 = vpop.f32.mrb[9].mxu1 }
 0x1d9   : > { %v4563_v4 = vpop.f32.mrb[10].mxu1 }
 0x1da   : > { %v1530_v50 = vpop.f32.mrb[11].mxu1 }
 0x1df   : > { %v5984_v56 = vpop.f32.mrb[12].mxu1 }
 0x1e0   : > { %v5986_v21 = vpop.f32.mrb[13].mxu1 }
 0x1e1   : > { %v5988_v48 = vpop.f32.mrb[14].mxu1 }
 0x1e2   : > { %v5990_v10 = vpop.f32.mrb[15].mxu1 }
 0x1e7   : > { %v5992_v8 = vpop.f32.mrb[16].mxu1 }
 0x1e8   : > { %v5994_v57 = vpop.f32.mrb[17].mxu1 }
 0x1e9   : > { %v5996_v5 = vpop.f32.mrb[18].mxu1 }
 0x1ea   : > { %v5998_v52 = vpop.f32.mrb[19].mxu1 }
 0x1f2   : > { %v4744_v23 = vpop.f32.mrb[0].mxu0 }
 0x1f3   : > { %v4780_v53 = vadd.f32 %v4744_v23, %v4554_v40  ;;  %v3476_v54 = vpop.f32.mrb[1].mxu0 }
 0x1f4   : > { %v4781_v62 = vadd.f32 %v3476_v54, %v1495_v32  ;;  %v4745_v0 = vpop.f32.mrb[2].mxu0 }
 0x1f5   : > { %v3664_v60 = vadd.f32 %v4780_v53, %v6004_v29  ;;  %v4782_v1 = vadd.f32 %v4745_v0, %v4555_v46  ;;  %v3479_v63 = vpop.f32.mrb[3].mxu0 }
 0x1f6   : > { %v3662_v34 = vadd.f32 %v4781_v62, %v6004_v29  ;;  %v4783_v36 = vadd.f32 %v3479_v63, %v1498_v38 }
 0x1f7   : > { %v4231_v2 = vpack.c.bf16 %v3664_v60, %v3664_v60  ;;  %v3665_v13 = vadd.f32 %v4782_v1, %v6004_v29 }
 0x1f8   : > { %v4229_v55 = vpack.c.bf16 %v3662_v34, %v3662_v34  ;;  %v3663_v37 = vadd.f32 %v4783_v36, %v6004_v29 }
 0x1f9   : > { %3845 = vst.msk [vmem:[%s6010_s18 + $0x8] sm:$0xf] %vm3842_vm7, %v4231_v2  ;;  %v4232_v45 = vpack.c.bf16 %v3665_v13, %v3665_v13 }
 0x1fa   : > { %3843 = vst.msk [vmem:[%s6010_s18] sm:$0xf] %vm3842_vm7, %v4229_v55  ;;  %v4230_v61 = vpack.c.bf16 %v3663_v37, %v3663_v37  ;;  %v4748_v19 = vpop.f32.mrb[4].mxu0 }
 0x1fb   : > { %3846 = vst.msk [vmem:[%s6010_s18 + $0xc] sm:$0xf] %vm3842_vm7, %v4232_v45  ;;  %v4784_v3 = vadd.f32 %v4748_v19, %v4558_v6  ;;  %v3492_v26 = vpop.f32.mrb[5].mxu0 }
 0x1fc   : > { %3844 = vst.msk [vmem:[%s6010_s18 + $0x4] sm:$0xf] %vm3842_vm7, %v4230_v61  ;;  %v4785_v7 = vadd.f32 %v3492_v26, %v1511_v22  ;;  %v4749_v39 = vpop.f32.mrb[6].mxu0 }
 0x1fd   : > { %v3668_v11 = vadd.f32 %v4784_v3, %v6004_v29  ;;  %v4786_v41 = vadd.f32 %v4749_v39, %v4559_v59  ;;  %v3495_v17 = vpop.f32.mrb[7].mxu0 }
 0x1fe   : > { %v3666_v30 = vadd.f32 %v4785_v7, %v6004_v29  ;;  %v4787_v28 = vadd.f32 %v3495_v17, %v1514_v47 }
 0x1ff   : > { %v4235_v43 = vpack.c.bf16 %v3668_v11, %v3668_v11  ;;  %v3669_v25 = vadd.f32 %v4786_v41, %v6004_v29 }
 0x200   : > { %v4233_v16 = vpack.c.bf16 %v3666_v30, %v3666_v30  ;;  %v3667_v44 = vadd.f32 %v4787_v28, %v6004_v29 }
 0x201   : > { %3849 = vst.msk [vmem:[%s6010_s18 + $0x18] sm:$0xf] %vm3842_vm7, %v4235_v43  ;;  %v4236_v27 = vpack.c.bf16 %v3669_v25, %v3669_v25 }
 0x202   : > { %3847 = vst.msk [vmem:[%s6010_s18 + $0x10] sm:$0xf] %vm3842_vm7, %v4233_v16  ;;  %v4234_v42 = vpack.c.bf16 %v3667_v44, %v3667_v44  ;;  %v4752_v35 = vpop.f32.mrb[8].mxu0 }
 0x203   : > { %3850 = vst.msk [vmem:[%s6010_s18 + $0x1c] sm:$0xf] %vm3842_vm7, %v4236_v27  ;;  %v4788_v9 = vadd.f32 %v4752_v35, %v4562_v31  ;;  %v3508_v33 = vpop.f32.mrb[9].mxu0 }
 0x204   : > { %3848 = vst.msk [vmem:[%s6010_s18 + $0x14] sm:$0xf] %vm3842_vm7, %v4234_v42  ;;  %v4789_v15 = vadd.f32 %v3508_v33, %v1527_v24  ;;  %v4753_v14 = vpop.f32.mrb[10].mxu0 }
 0x205   : > { %v3672_v12 = vadd.f32 %v4788_v9, %v6004_v29  ;;  %v4790_v49 = vadd.f32 %v4753_v14, %v4563_v4  ;;  %v3511_v20 = vpop.f32.mrb[11].mxu0 }
 0x206   : > { %v3670_v58 = vadd.f32 %v4789_v15, %v6004_v29  ;;  %v4791_v18 = vadd.f32 %v3511_v20, %v1530_v50 }
 0x207   : > { %v4239_v51 = vpack.c.bf16 %v3672_v12, %v3672_v12  ;;  %v3673_v40 = vadd.f32 %v4790_v49, %v6004_v29 }
 0x208   : > { %v4237_v32 = vpack.c.bf16 %v3670_v58, %v3670_v58  ;;  %v3671_v46 = vadd.f32 %v4791_v18, %v6004_v29 }
 0x209   : > { %3853 = vst.msk [vmem:[%s6010_s18 + $0x28] sm:$0xf] %vm3842_vm7, %v4239_v51  ;;  %v4240_v38 = vpack.c.bf16 %v3673_v40, %v3673_v40 }
 0x20a   : > { %3851 = vst.msk [vmem:[%s6010_s18 + $0x20] sm:$0xf] %vm3842_vm7, %v4237_v32  ;;  %v4238_v6 = vpack.c.bf16 %v3671_v46, %v3671_v46  ;;  %v4756_v22 = vpop.f32.mrb[12].mxu0 }
 0x20b   : > { %3854 = vst.msk [vmem:[%s6010_s18 + $0x2c] sm:$0xf] %vm3842_vm7, %v4240_v38  ;;  %v4792_v59 = vadd.f32 %v4756_v22, %v5984_v56  ;;  %v3524_v47 = vpop.f32.mrb[13].mxu0 }
 0x20c   : > { %3852 = vst.msk [vmem:[%s6010_s18 + $0x24] sm:$0xf] %vm3842_vm7, %v4238_v6  ;;  %v4793_v31 = vadd.f32 %v3524_v47, %v5986_v21  ;;  %v4757_v24 = vpop.f32.mrb[14].mxu0 }
 0x20d   : > { %v3676_v4 = vadd.f32 %v4792_v59, %v6004_v29  ;;  %v4794_v50 = vadd.f32 %v4757_v24, %v5988_v48  ;;  %v3527_v23 = vpop.f32.mrb[15].mxu0 }
 0x20e   : > { %v3674_v54 = vadd.f32 %v4793_v31, %v6004_v29  ;;  %v4795_v62 = vadd.f32 %v3527_v23, %v5990_v10 }
 0x20f   : > { %v4612_v53 = vpop.f32.mrb[20].mxu1  ;;  %v4243_v0 = vpack.c.bf16 %v3676_v4, %v3676_v4  ;;  %v3677_v60 = vadd.f32 %v4794_v50, %v6004_v29 }
 0x210   : > { %v2026_v56 = vpop.f32.mrb[21].mxu1  ;;  %v4241_v21 = vpack.c.bf16 %v3674_v54, %v3674_v54  ;;  %v3675_v63 = vadd.f32 %v4795_v62, %v6004_v29 }
 0x211   : > { %v4613_v1 = vpop.f32.mrb[22].mxu1  ;;  %3857 = vst.msk [vmem:[%s6010_s18 + $0x38] sm:$0xf] %vm3842_vm7, %v4243_v0  ;;  %v4244_v48 = vpack.c.bf16 %v3677_v60, %v3677_v60 }
 0x212   : > { %v2029_v34 = vpop.f32.mrb[23].mxu1  ;;  %3855 = vst.msk [vmem:[%s6010_s18 + $0x30] sm:$0xf] %vm3842_vm7, %v4241_v21  ;;  %v4242_v36 = vpack.c.bf16 %v3675_v63, %v3675_v63  ;;  %v4760_v2 = vpop.f32.mrb[16].mxu0 }
 0x213   : > { %3858 = vst.msk [vmem:[%s6010_s18 + $0x3c] sm:$0xf] %vm3842_vm7, %v4244_v48  ;;  %v4796_v10 = vadd.f32 %v4760_v2, %v5992_v8  ;;  %v3540_v13 = vpop.f32.mrb[17].mxu0 }
 0x214   : > { %3856 = vst.msk [vmem:[%s6010_s18 + $0x34] sm:$0xf] %vm3842_vm7, %v4242_v36  ;;  %v4797_v55 = vadd.f32 %v3540_v13, %v5994_v57  ;;  %v4761_v37 = vpop.f32.mrb[18].mxu0 }
 0x215   : > { %v3680_v45 = vadd.f32 %v4796_v10, %v6004_v29  ;;  %v4798_v61 = vadd.f32 %v4761_v37, %v5996_v5  ;;  %v3543_v19 = vpop.f32.mrb[19].mxu0 }
 0x216   : > { %v3678_v26 = vadd.f32 %v4797_v55, %v6004_v29  ;;  %v4799_v7 = vadd.f32 %v3543_v19, %v5998_v52 }
 0x217   : > { %v4616_v3 = vpop.f32.mrb[24].mxu1  ;;  %v4247_v39 = vpack.c.bf16 %v3680_v45, %v3680_v45  ;;  %v3681_v11 = vadd.f32 %v4798_v61, %v6004_v29 }
 0x218   : > { %v2042_v8 = vpop.f32.mrb[25].mxu1  ;;  %v4245_v57 = vpack.c.bf16 %v3678_v26, %v3678_v26  ;;  %v3679_v17 = vadd.f32 %v4799_v7, %v6004_v29 }
 0x219   : > { %v4617_v41 = vpop.f32.mrb[26].mxu1  ;;  %3861 = vst.msk [vmem:[%s6010_s18 + $0x48] sm:$0xf] %vm3842_vm7, %v4247_v39  ;;  %v4248_v5 = vpack.c.bf16 %v3681_v11, %v3681_v11 }
 0x21a   : > { %v2045_v30 = vpop.f32.mrb[27].mxu1  ;;  %3859 = vst.msk [vmem:[%s6010_s18 + $0x40] sm:$0xf] %vm3842_vm7, %v4245_v57  ;;  %v4246_v28 = vpack.c.bf16 %v3679_v17, %v3679_v17  ;;  %v4764_v43 = vpop.f32.mrb[20].mxu0 }
 0x21b   : > { %3862 = vst.msk [vmem:[%s6010_s18 + $0x4c] sm:$0xf] %vm3842_vm7, %v4248_v5  ;;  %v4800_v52 = vadd.f32 %v4764_v43, %v4612_v53  ;;  %v3556_v25 = vpop.f32.mrb[21].mxu0 }
 0x21c   : > { %3860 = vst.msk [vmem:[%s6010_s18 + $0x44] sm:$0xf] %vm3842_vm7, %v4246_v28  ;;  %v4801_v16 = vadd.f32 %v3556_v25, %v2026_v56  ;;  %v4765_v44 = vpop.f32.mrb[22].mxu0 }
 0x21d   : > { %v3684_v27 = vadd.f32 %v4800_v52, %v6004_v29  ;;  %v4802_v42 = vadd.f32 %v4765_v44, %v4613_v1  ;;  %v3559_v35 = vpop.f32.mrb[23].mxu0 }
 0x21e   : > { %v3682_v33 = vadd.f32 %v4801_v16, %v6004_v29  ;;  %v4803_v15 = vadd.f32 %v3559_v35, %v2029_v34 }
 0x21f   : > { %v4620_v9 = vpop.f32.mrb[28].mxu1  ;;  %v4251_v12 = vpack.c.bf16 %v3684_v27, %v3684_v27  ;;  %v3685_v49 = vadd.f32 %v4802_v42, %v6004_v29 }
 0x220   : > { %v2058_v14 = vpop.f32.mrb[29].mxu1  ;;  %v4249_v58 = vpack.c.bf16 %v3682_v33, %v3682_v33  ;;  %v3683_v18 = vadd.f32 %v4803_v15, %v6004_v29 }
 0x221   : > { %v4621_v20 = vpop.f32.mrb[30].mxu1  ;;  %3865 = vst.msk [vmem:[%s6010_s18 + $0x58] sm:$0xf] %vm3842_vm7, %v4251_v12  ;;  %v4252_v40 = vpack.c.bf16 %v3685_v49, %v3685_v49 }
 0x222   : > { %v2061_v51 = vpop.f32.mrb[31].mxu1  ;;  %3863 = vst.msk [vmem:[%s6010_s18 + $0x50] sm:$0xf] %vm3842_vm7, %v4249_v58  ;;  %v4250_v32 = vpack.c.bf16 %v3683_v18, %v3683_v18  ;;  %v4768_v46 = vpop.f32.mrb[24].mxu0 }
 0x223   : > { %3866 = vst.msk [vmem:[%s6010_s18 + $0x5c] sm:$0xf] %vm3842_vm7, %v4252_v40  ;;  %v4804_v38 = vadd.f32 %v4768_v46, %v4616_v3  ;;  %v3572_v6 = vpop.f32.mrb[25].mxu0 }
 0x224   : > { %3864 = vst.msk [vmem:[%s6010_s18 + $0x54] sm:$0xf] %vm3842_vm7, %v4250_v32  ;;  %v4805_v22 = vadd.f32 %v3572_v6, %v2042_v8  ;;  %v4769_v59 = vpop.f32.mrb[26].mxu0 }
 0x225   : > { %v3688_v47 = vadd.f32 %v4804_v38, %v6004_v29  ;;  %v4806_v31 = vadd.f32 %v4769_v59, %v4617_v41  ;;  %v3575_v24 = vpop.f32.mrb[27].mxu0 }
 0x226   : > { %v3686_v50 = vadd.f32 %v4805_v22, %v6004_v29  ;;  %v4807_v23 = vadd.f32 %v3575_v24, %v2045_v30 }
 0x227   : > { %v4624_v4 = vpop.f32.mrb[32].mxu1  ;;  %v4255_v54 = vpack.c.bf16 %v3688_v47, %v3688_v47  ;;  %v3689_v62 = vadd.f32 %v4806_v31, %v6004_v29 }
 0x228   : > { %v2074_v53 = vpop.f32.mrb[33].mxu1  ;;  %v4253_v0 = vpack.c.bf16 %v3686_v50, %v3686_v50  ;;  %v3687_v60 = vadd.f32 %v4807_v23, %v6004_v29 }
 0x229   : > { %v4625_v56 = vpop.f32.mrb[34].mxu1  ;;  %3869 = vst.msk [vmem:[%s6010_s18 + $0x68] sm:$0xf] %vm3842_vm7, %v4255_v54  ;;  %v4256_v21 = vpack.c.bf16 %v3689_v62, %v3689_v62 }
 0x22a   : > { %v2077_v1 = vpop.f32.mrb[35].mxu1  ;;  %3867 = vst.msk [vmem:[%s6010_s18 + $0x60] sm:$0xf] %vm3842_vm7, %v4253_v0  ;;  %v4254_v63 = vpack.c.bf16 %v3687_v60, %v3687_v60  ;;  %v4772_v34 = vpop.f32.mrb[28].mxu0 }
 0x22b   : > { %3870 = vst.msk [vmem:[%s6010_s18 + $0x6c] sm:$0xf] %vm3842_vm7, %v4256_v21  ;;  %v4808_v48 = vadd.f32 %v4772_v34, %v4620_v9  ;;  %v3588_v36 = vpop.f32.mrb[29].mxu0 }
 0x22c   : > { %3868 = vst.msk [vmem:[%s6010_s18 + $0x64] sm:$0xf] %vm3842_vm7, %v4254_v63  ;;  %v4809_v2 = vadd.f32 %v3588_v36, %v2058_v14  ;;  %v4773_v10 = vpop.f32.mrb[30].mxu0 }
 0x22d   : > { %v3692_v13 = vadd.f32 %v4808_v48, %v6004_v29  ;;  %v4810_v55 = vadd.f32 %v4773_v10, %v4621_v20  ;;  %v3591_v37 = vpop.f32.mrb[31].mxu0 }
 0x22e   : > { %v3690_v45 = vadd.f32 %v4809_v2, %v6004_v29  ;;  %v4811_v61 = vadd.f32 %v3591_v37, %v2061_v51 }
 0x22f   : > { %v4259_v19 = vpack.c.bf16 %v3692_v13, %v3692_v13  ;;  %v3693_v3 = vadd.f32 %v4810_v55, %v6004_v29 }
 0x230   : > { %v4257_v26 = vpack.c.bf16 %v3690_v45, %v3690_v45  ;;  %v3691_v7 = vadd.f32 %v4811_v61, %v6004_v29 }
 0x231   : > { %3873 = vst.msk [vmem:[%s6010_s18 + $0x78] sm:$0xf] %vm3842_vm7, %v4259_v19  ;;  %v4260_v8 = vpack.c.bf16 %v3693_v3, %v3693_v3 }
 0x232   : > { %3871 = vst.msk [vmem:[%s6010_s18 + $0x70] sm:$0xf] %vm3842_vm7, %v4257_v26  ;;  %v4258_v39 = vpack.c.bf16 %v3691_v7, %v3691_v7  ;;  %v4776_v11 = vpop.f32.mrb[32].mxu0 }
 0x233   : > { %3874 = vst.msk [vmem:[%s6010_s18 + $0x7c] sm:$0xf] %vm3842_vm7, %v4260_v8  ;;  %v4812_v41 = vadd.f32 %v4776_v11, %v4624_v4  ;;  %v3604_v57 = vpop.f32.mrb[33].mxu0 }
 0x234   : > { %3872 = vst.msk [vmem:[%s6010_s18 + $0x74] sm:$0xf] %vm3842_vm7, %v4258_v39  ;;  %v4813_v17 = vadd.f32 %v3604_v57, %v2074_v53  ;;  %v4777_v30 = vpop.f32.mrb[34].mxu0 }
 0x235   : > { %v3696_v5 = vadd.f32 %v4812_v41, %v6004_v29  ;;  %v4814_v28 = vadd.f32 %v4777_v30, %v4625_v56  ;;  %v3607_v43 = vpop.f32.mrb[35].mxu0 }
 0x236   : > { %v3694_v52 = vadd.f32 %v4813_v17, %v6004_v29  ;;  %v4815_v25 = vadd.f32 %v3607_v43, %v2077_v1 }
 0x237   : > { %v4263_v16 = vpack.c.bf16 %v3696_v5, %v3696_v5  ;;  %v3697_v44 = vadd.f32 %v4814_v28, %v6004_v29 }
 0x238   : > { %v4261_v27 = vpack.c.bf16 %v3694_v52, %v3694_v52  ;;  %v3695_v42 = vadd.f32 %v4815_v25, %v6004_v29 }
 0x239   : > { %3877 = vst.msk [vmem:[%s6010_s18 + $0x88] sm:$0xf] %vm3842_vm7, %v4263_v16  ;;  %v4264_v35 = vpack.c.bf16 %v3697_v44, %v3697_v44 }
 0x23a   : > { %3875 = vst.msk [vmem:[%s6010_s18 + $0x80] sm:$0xf] %vm3842_vm7, %v4261_v27  ;;  %v4262_v9 = vpack.c.bf16 %v3695_v42, %v3695_v42 }
 0x23b   : > { %3878 = vst.msk [vmem:[%s6010_s18 + $0x8c] sm:$0xf] %vm3842_vm7, %v4264_v35 }
 0x23c   : > { %3876 = vst.msk [vmem:[%s6010_s18 + $0x84] sm:$0xf] %vm3842_vm7, %v4262_v9 }
 0x23d PF: > { %s13_s12 = sadd.s32 1, %s5166_s12  }
 0x23e   : > { %p10_p4 = scmp.ge.s32.totalorder %s13_s12, 4  }
 0x240   :  { %12 = sbr.rel (!%p10_p4) target bundleno = 1 (0x1), region = 70 }

// kernel: retinanet_forward.20
= control target key start
LH: loop header
LB: loop body
LE: loop exit
PB: predicated region body
PF: predicated region fallthrough
CT: control target
= control target key end

     0   :  { %s2109_s12 = smov 0   ;;  %s2111_s13 = smov 0   ;;  %s2326_s0 = inlined_call_operand.vmem [shape: bf16[768,144], index: 0, kind: input, shape index: {}]   ;;  %s2327_s1 = inlined_call_operand.vmem [shape: bf16[144,128], index: 1, kind: input, shape index: {}]   ;;  %s2328_s2 = inlined_call_operand.vmem [shape: f32[1,128], index: 2, kind: input, shape index: {}]   ;;  %s2329_s3 = inlined_call_operand.vmem [shape: bf16[768,128], index: 3, kind: output, shape index: {}]  }
   0x1   :  { %s2113_s14 = smov 0  }
   0x2 LB: > { %s32_s15 = sadd.s32 1, %s2082_s13  ;;  %p1612_p0 = scmp.ge.s32.totalorder %s2086_s14, 1  ;;  %s2086_s14 = sphi %s2113_s14, %s13_s14   ;;  %s2082_s13 = sphi %s2111_s13, %s2331_s13   ;;  %s2078_s12 = sphi %s2109_s12, %s2330_s12  }
   0x3   : > { %p34_p1 = scmp.ge.s32.totalorder %s32_s15, 2  ;;  %p191_p2 = scmp.lt.s32.totalorder %s2086_s14, 3 }
   0x5   : > { %s2333_s15 = smov (%p34_p1, %s32_s15), 0  ;;  %p192_p3 = pnand %p1612_p0, %p191_p2 }
   0x6   : > { %v1983_v0 = vld [vmem:[%s2327_s1] sm:$0xff] (!%p192_p3)   ;;  %v2088_v1 = vmov (!%p192_p3), 0   ;;  %s234_s18 = smul.u32 (!%p192_p3), 48, %s2078_s12  ;;  %v1984_v2 = vld [vmem:[%s2327_s1 + $0x8] sm:$0xff] (!%p192_p3)   ;;  %v1985_v3 = vld [vmem:[%s2327_s1 + $0x10] sm:$0xff] (!%p192_p3)   ;;  %vm704_vm0 = vcmask (!%p192_p3), 130048  }
   0x7   : > { %195 = sbr.rel (%p192_p3) target bundleno = 352 (0x160), region = 32  ;;  %777 = vmatprep.subr.bf16.mxu0 (!%p192_p3), %v2088_v1  ;;  %1940 = vmatprep.subr.bf16.mxu1 (!%p192_p3), %v2088_v1  ;;  %v1986_v4 = vld [vmem:[%s2327_s1 + $0x18] sm:$0xff] (!%p192_p3)   ;;  %v1987_v7 = vld [vmem:[%s2327_s1 + $0x20] sm:$0xff] (!%p192_p3)   ;;  %v1988_v8 = vld [vmem:[%s2327_s1 + $0x28] sm:$0xff] (!%p192_p3)  }
   0x8   : > { %778 = vmatpush1.bf16.msra.mxu0 (!%p192_p3), %v1983_v0  ;;  %1949 = vmatpush1.bf16.msra.mxu1 (!%p192_p3), %v1983_v0  ;;  %p236_p4 = scmp.lt.s32.totalorder (!%p192_p3), %s234_s18, 95  ;;  %v1989_v9 = vld [vmem:[%s2327_s1 + $0x30] sm:$0xff] (!%p192_p3)   ;;  %v1990_v10 = vld [vmem:[%s2327_s1 + $0x38] sm:$0xff] (!%p192_p3)   ;;  %v1991_v11 = vld [vmem:[%s2327_s1 + $0x40] sm:$0xff] (!%p192_p3)  }
   0x9   : > { %779 = vmatprep.subr.bf16.mxu0 (!%p192_p3), %v2088_v1  ;;  %1941 = vmatprep.subr.bf16.mxu1 (!%p192_p3), %v2088_v1  ;;  %v2237_v58 = vld [vmem:[%s2328_s2] ss:$0 sm:$0xff] (!%p192_p3) }
   0xc   : > { %780 = vmatpush1.bf16.msra.mxu0 (!%p192_p3), %v1984_v2  ;;  %1950 = vmatpush1.bf16.msra.mxu1 (!%p192_p3), %v1984_v2 }
   0xd   : > { %781 = vmatprep.subr.bf16.mxu0 (!%p192_p3), %v2088_v1  ;;  %1942 = vmatprep.subr.bf16.mxu1 (!%p192_p3), %v2088_v1 }
   0xe   : > { %s2335_s18 = smov (!%p236_p4, %s234_s18), 95 }
   0xf   : > { %s1748_s23 = sshll.u32 %s2335_s18, 3  ;;  %s1615_s17 = sshll.u32 %s2335_s18, 2 }
  0x10   : > { %s2142_s26 = scalar_lea.vmem %s2326_s0, %s1748_s23  ;;  %782 = vmatpush1.bf16.msra.mxu0 %v1985_v3  ;;  %1951 = vmatpush1.bf16.msra.mxu1 %v1985_v3  ;;  %s2247_s21 = scalar_lea.vmem %s2329_s3, %s1615_s17 }
  0x11   : > { %v1994_v5 = vld [vmem:[%s2142_s26 + $0x4] ss:$8 sps:$4 sm:$0xff]   ;;  %783 = vmatprep.subr.bf16.mxu0 %v2088_v1  ;;  %1943 = vmatprep.subr.bf16.mxu1 %v2088_v1  ;;  %v1992_v12 = vld [vmem:[%s2142_s26] ss:$8 sps:$4 sm:$0xff]   ;;  %v1998_v14 = vld [vmem:[%s2142_s26 + $0x14] ss:$8 sps:$4 sm:$0xff]  }
  0x12   : > { %v1997_v6 = vld [vmem:[%s2142_s26 + $0xc4] ss:$8 sps:$4 sm:$0xff]   ;;  %1673 = vmatprep.mubr.msk.bf16.mxu0 %vm704_vm0, %v1994_v5  ;;  %v1995_v13 = vld [vmem:[%s2142_s26 + $0xc0] ss:$8 sps:$4 sm:$0xff]   ;;  %v2000_v15 = vld [vmem:[%s2142_s26 + $0xd4] ss:$8 sps:$4 sm:$0xff]  }
  0x13   : > { %1685 = vmatprep.mubr.msk.bf16.mxu1 %vm704_vm0, %v1997_v6  ;;  %v2002_v16 = vld [vmem:[%s2142_s26 + $0x10] ss:$8 sps:$4 sm:$0xff]   ;;  %v2004_v18 = vld [vmem:[%s2142_s26 + $0x24] ss:$8 sps:$4 sm:$0xff]   ;;  %v2008_v20 = vld [vmem:[%s2142_s26 + $0x20] ss:$8 sps:$4 sm:$0xff]  }
  0x14   : > { %784 = vmatpush1.bf16.msra.mxu0 %v1986_v4  ;;  %1952 = vmatpush1.bf16.msra.mxu1 %v1986_v4  ;;  %v2003_v17 = vld [vmem:[%s2142_s26 + $0xd0] ss:$8 sps:$4 sm:$0xff]   ;;  %v2006_v19 = vld [vmem:[%s2142_s26 + $0xe4] ss:$8 sps:$4 sm:$0xff]   ;;  %v2009_v21 = vld [vmem:[%s2142_s26 + $0xe0] ss:$8 sps:$4 sm:$0xff]  }
  0x15   : > { %785 = vmatprep.subr.bf16.mxu0 %v2088_v1  ;;  %1944 = vmatprep.subr.bf16.mxu1 %v2088_v1  ;;  %v2010_v22 = vld [vmem:[%s2142_s26 + $0x34] ss:$8 sps:$4 sm:$0xff]   ;;  %v2014_v24 = vld [vmem:[%s2142_s26 + $0x30] ss:$8 sps:$4 sm:$0xff]   ;;  %v2016_v26 = vld [vmem:[%s2142_s26 + $0x44] ss:$8 sps:$4 sm:$0xff]  }
  0x16   : > { %v2012_v23 = vld [vmem:[%s2142_s26 + $0xf4] ss:$8 sps:$4 sm:$0xff]   ;;  %v2015_v25 = vld [vmem:[%s2142_s26 + $0xf0] ss:$8 sps:$4 sm:$0xff]   ;;  %v2018_v27 = vld [vmem:[%s2142_s26 + $0x104] ss:$8 sps:$4 sm:$0xff]  }
  0x17   : > { %v2020_v28 = vld [vmem:[%s2142_s26 + $0x40] ss:$8 sps:$4 sm:$0xff]   ;;  %v2022_v30 = vld [vmem:[%s2142_s26 + $0x54] ss:$8 sps:$4 sm:$0xff]   ;;  %v2026_v32 = vld [vmem:[%s2142_s26 + $0x50] ss:$8 sps:$4 sm:$0xff]  }
  0x18   : > { %786 = vmatpush1.bf16.msra.mxu0 %v1987_v7  ;;  %1953 = vmatpush1.bf16.msra.mxu1 %v1987_v7  ;;  %v2021_v29 = vld [vmem:[%s2142_s26 + $0x100] ss:$8 sps:$4 sm:$0xff]   ;;  %v2024_v31 = vld [vmem:[%s2142_s26 + $0x114] ss:$8 sps:$4 sm:$0xff]   ;;  %v2027_v33 = vld [vmem:[%s2142_s26 + $0x110] ss:$8 sps:$4 sm:$0xff]  }
  0x19   : > { %787 = vmatprep.subr.bf16.mxu0 %v2088_v1  ;;  %1945 = vmatprep.subr.bf16.mxu1 %v2088_v1  ;;  %v2028_v34 = vld [vmem:[%s2142_s26 + $0x64] ss:$8 sps:$4 sm:$0xff]   ;;  %v2032_v36 = vld [vmem:[%s2142_s26 + $0x60] ss:$8 sps:$4 sm:$0xff]   ;;  %v2034_v38 = vld [vmem:[%s2142_s26 + $0x74] ss:$8 sps:$4 sm:$0xff]  }
  0x1a   : > { %v2030_v35 = vld [vmem:[%s2142_s26 + $0x124] ss:$8 sps:$4 sm:$0xff]   ;;  %v2033_v37 = vld [vmem:[%s2142_s26 + $0x120] ss:$8 sps:$4 sm:$0xff]   ;;  %v2036_v39 = vld [vmem:[%s2142_s26 + $0x134] ss:$8 sps:$4 sm:$0xff]  }
  0x1b   : > { %v2038_v40 = vld [vmem:[%s2142_s26 + $0x70] ss:$8 sps:$4 sm:$0xff]   ;;  %v2040_v42 = vld [vmem:[%s2142_s26 + $0x84] ss:$8 sps:$4 sm:$0xff]   ;;  %v2044_v44 = vld [vmem:[%s2142_s26 + $0x80] ss:$8 sps:$4 sm:$0xff]  }
  0x1c   : > { %788 = vmatpush1.bf16.msra.mxu0 %v1988_v8  ;;  %1954 = vmatpush1.bf16.msra.mxu1 %v1988_v8  ;;  %v2039_v41 = vld [vmem:[%s2142_s26 + $0x130] ss:$8 sps:$4 sm:$0xff]   ;;  %v2042_v43 = vld [vmem:[%s2142_s26 + $0x144] ss:$8 sps:$4 sm:$0xff]   ;;  %v2045_v45 = vld [vmem:[%s2142_s26 + $0x140] ss:$8 sps:$4 sm:$0xff]  }
  0x1d   : > { %789 = vmatprep.subr.bf16.mxu0 %v2088_v1  ;;  %1946 = vmatprep.subr.bf16.mxu1 %v2088_v1  ;;  %v2046_v46 = vld [vmem:[%s2142_s26 + $0x94] ss:$8 sps:$4 sm:$0xff]   ;;  %v2050_v48 = vld [vmem:[%s2142_s26 + $0x90] ss:$8 sps:$4 sm:$0xff]   ;;  %v2052_v50 = vld [vmem:[%s2142_s26 + $0xa4] ss:$8 sps:$4 sm:$0xff]  }
  0x1e   : > { %v2048_v47 = vld [vmem:[%s2142_s26 + $0x154] ss:$8 sps:$4 sm:$0xff]   ;;  %v2051_v49 = vld [vmem:[%s2142_s26 + $0x150] ss:$8 sps:$4 sm:$0xff]   ;;  %v2054_v51 = vld [vmem:[%s2142_s26 + $0x164] ss:$8 sps:$4 sm:$0xff]  }
  0x1f   : > { %v2056_v52 = vld [vmem:[%s2142_s26 + $0xa0] ss:$8 sps:$4 sm:$0xff]   ;;  %v2058_v54 = vld [vmem:[%s2142_s26 + $0xb4] ss:$8 sps:$4 sm:$0xff]   ;;  %v2062_v56 = vld [vmem:[%s2142_s26 + $0xb0] ss:$8 sps:$4 sm:$0xff]  }
  0x20   : > { %790 = vmatpush1.bf16.msra.mxu0 %v1989_v9  ;;  %1955 = vmatpush1.bf16.msra.mxu1 %v1989_v9  ;;  %v2057_v53 = vld [vmem:[%s2142_s26 + $0x160] ss:$8 sps:$4 sm:$0xff]   ;;  %v2060_v55 = vld [vmem:[%s2142_s26 + $0x174] ss:$8 sps:$4 sm:$0xff]   ;;  %v2063_v57 = vld [vmem:[%s2142_s26 + $0x170] ss:$8 sps:$4 sm:$0xff]  }
  0x21   : > { %791 = vmatprep.subr.bf16.mxu0 %v2088_v1  ;;  %1947 = vmatprep.subr.bf16.mxu1 %v2088_v1 }
  0x24   : > { %792 = vmatpush1.bf16.msra.mxu0 %v1990_v10  ;;  %1956 = vmatpush1.bf16.msra.mxu1 %v1990_v10 }
  0x25   : > { %793 = vmatprep.subr.bf16.mxu0 %v2088_v1  ;;  %1948 = vmatprep.subr.bf16.mxu1 %v2088_v1 }
  0x28   : > { %794 = vmatpush1.bf16.msra.mxu0 %v1991_v11  ;;  %1957 = vmatpush1.bf16.msra.mxu1 %v1991_v11 }
  0x2b   : > { %810 = vmatmul.mubr.bf16.vlgmr.msra.gmra.mrb[0].mxu0 %v1992_v12  ;;  %906 = vmatmul.mubr.bf16.vlgmr.msra.gmra.mrb[0].mxu1 %v1995_v13 }
  0x2c   : > { %1674 = vmatprep.mubr.msk.bf16.mxu0 %vm704_vm0, %v1998_v14  ;;  %1686 = vmatprep.mubr.msk.bf16.mxu1 %vm704_vm0, %v2000_v15 }
  0x33   : > { %818 = vmatmul.mubr.bf16.gmra.mrb[4].mxu0 %v2002_v16  ;;  %914 = vmatmul.mubr.bf16.gmra.mrb[4].mxu1 %v2003_v17 }
  0x34   : > { %1675 = vmatprep.mubr.msk.bf16.mxu0 %vm704_vm0, %v2004_v18  ;;  %1687 = vmatprep.mubr.msk.bf16.mxu1 %vm704_vm0, %v2006_v19 }
  0x3b   : > { %826 = vmatmul.mubr.bf16.gmra.mrb[8].mxu0 %v2008_v20  ;;  %922 = vmatmul.mubr.bf16.gmra.mrb[8].mxu1 %v2009_v21 }
  0x3c   : > { %1676 = vmatprep.mubr.msk.bf16.mxu0 %vm704_vm0, %v2010_v22  ;;  %1688 = vmatprep.mubr.msk.bf16.mxu1 %vm704_vm0, %v2012_v23 }
  0x43   : > { %834 = vmatmul.mubr.bf16.gmra.mrb[12].mxu0 %v2014_v24  ;;  %930 = vmatmul.mubr.bf16.gmra.mrb[12].mxu1 %v2015_v25 }
  0x44   : > { %1677 = vmatprep.mubr.msk.bf16.mxu0 %vm704_vm0, %v2016_v26  ;;  %1689 = vmatprep.mubr.msk.bf16.mxu1 %vm704_vm0, %v2018_v27 }
  0x4b   : > { %842 = vmatmul.mubr.bf16.gmra.mrb[16].mxu0 %v2020_v28  ;;  %938 = vmatmul.mubr.bf16.gmra.mrb[16].mxu1 %v2021_v29 }
  0x4c   : > { %1678 = vmatprep.mubr.msk.bf16.mxu0 %vm704_vm0, %v2022_v30  ;;  %1690 = vmatprep.mubr.msk.bf16.mxu1 %vm704_vm0, %v2024_v31 }
  0x53   : > { %850 = vmatmul.mubr.bf16.gmra.mrb[20].mxu0 %v2026_v32  ;;  %946 = vmatmul.mubr.bf16.gmra.mrb[20].mxu1 %v2027_v33 }
  0x54   : > { %1679 = vmatprep.mubr.msk.bf16.mxu0 %vm704_vm0, %v2028_v34  ;;  %1691 = vmatprep.mubr.msk.bf16.mxu1 %vm704_vm0, %v2030_v35 }
  0x5b   : > { %858 = vmatmul.mubr.bf16.gmra.mrb[24].mxu0 %v2032_v36  ;;  %954 = vmatmul.mubr.bf16.gmra.mrb[24].mxu1 %v2033_v37 }
  0x5c   : > { %1680 = vmatprep.mubr.msk.bf16.mxu0 %vm704_vm0, %v2034_v38  ;;  %1692 = vmatprep.mubr.msk.bf16.mxu1 %vm704_vm0, %v2036_v39 }
  0x63   : > { %866 = vmatmul.mubr.bf16.gmra.mrb[28].mxu0 %v2038_v40  ;;  %962 = vmatmul.mubr.bf16.gmra.mrb[28].mxu1 %v2039_v41 }
  0x64   : > { %1681 = vmatprep.mubr.msk.bf16.mxu0 %vm704_vm0, %v2040_v42  ;;  %1693 = vmatprep.mubr.msk.bf16.mxu1 %vm704_vm0, %v2042_v43 }
  0x6b   : > { %874 = vmatmul.mubr.bf16.gmra.mrb[32].mxu0 %v2044_v44  ;;  %970 = vmatmul.mubr.bf16.gmra.mrb[32].mxu1 %v2045_v45 }
  0x6c   : > { %1682 = vmatprep.mubr.msk.bf16.mxu0 %vm704_vm0, %v2046_v46  ;;  %1694 = vmatprep.mubr.msk.bf16.mxu1 %vm704_vm0, %v2048_v47 }
  0x73   : > { %882 = vmatmul.mubr.bf16.gmra.mrb[36].mxu0 %v2050_v48  ;;  %978 = vmatmul.mubr.bf16.gmra.mrb[36].mxu1 %v2051_v49 }
  0x74   : > { %1683 = vmatprep.mubr.msk.bf16.mxu0 %vm704_vm0, %v2052_v50  ;;  %1695 = vmatprep.mubr.msk.bf16.mxu1 %vm704_vm0, %v2054_v51 }
  0x7b   : > { %890 = vmatmul.mubr.bf16.gmra.mrb[40].mxu0 %v2056_v52  ;;  %986 = vmatmul.mubr.bf16.gmra.mrb[40].mxu1 %v2057_v53 }
  0x7c   : > { %1684 = vmatprep.mubr.msk.bf16.mxu0 %vm704_vm0, %v2058_v54  ;;  %1696 = vmatprep.mubr.msk.bf16.mxu1 %vm704_vm0, %v2060_v55 }
  0x83   : > { %898 = vmatmul.mubr.bf16.gmra.mrb[44].mxu0 %v2062_v56  ;;  %994 = vmatmul.mubr.bf16.gmra.mrb[44].mxu1 %v2063_v57 }
  0xfe   : > { %v811_v59 = vpop.f32.mrb[0].mxu0  ;;  %v907_v60 = vpop.f32.mrb[0].mxu1 }
  0xff   : > { %v1156_v61 = vadd.f32 %v2237_v58, %v811_v59  ;;  %v1180_v62 = vadd.f32 %v2237_v58, %v907_v60  ;;  %v813_v63 = vpop.f32.mrb[1].mxu0  ;;  %v909_v0 = vpop.f32.mrb[1].mxu1 }
 0x100   : > { %v814_v1 = vpop.f32.mrb[2].mxu0  ;;  %v910_v2 = vpop.f32.mrb[2].mxu1 }
 0x101   : > { %v1157_v3 = vadd.f32 %v2237_v58, %v814_v1  ;;  %v1181_v4 = vadd.f32 %v2237_v58, %v910_v2  ;;  %v816_v5 = vpop.f32.mrb[3].mxu0  ;;  %v912_v6 = vpop.f32.mrb[3].mxu1  ;;  %v1204_v7 = vmax.f32 %v1156_v61, 0.0  ;;  %v1228_v8 = vmax.f32 %v1180_v62, 0.0 }
 0x103   : > { %v1205_v9 = vmax.f32 %v1157_v3, 0.0  ;;  %v1229_v10 = vmax.f32 %v1181_v4, 0.0 }
 0x105   : > { %v1800_v11 = vpack.c.bf16 %v1205_v9, %v1204_v7  ;;  %v1860_v12 = vpack.c.bf16 %v1229_v10, %v1228_v8 }
 0x106   : > { %v819_v13 = vpop.f32.mrb[4].mxu0  ;;  %v915_v14 = vpop.f32.mrb[4].mxu1 }
 0x107   : > { %1801 = vst [vmem:[%s2247_s21] sm:$0xff] %v1800_v11   ;;  %1928 = vst [vmem:[%s2247_s21 + $0x60] sm:$0xff] %v1860_v12   ;;  %v1158_v15 = vadd.f32 %v2237_v58, %v819_v13  ;;  %v1182_v16 = vadd.f32 %v2237_v58, %v915_v14  ;;  %v821_v17 = vpop.f32.mrb[5].mxu0  ;;  %v917_v18 = vpop.f32.mrb[5].mxu1 }
 0x108   : > { %v822_v19 = vpop.f32.mrb[6].mxu0  ;;  %v918_v20 = vpop.f32.mrb[6].mxu1 }
 0x109   : > { %v1159_v21 = vadd.f32 %v2237_v58, %v822_v19  ;;  %v1183_v22 = vadd.f32 %v2237_v58, %v918_v20  ;;  %v824_v23 = vpop.f32.mrb[7].mxu0  ;;  %v920_v24 = vpop.f32.mrb[7].mxu1  ;;  %v1206_v25 = vmax.f32 %v1158_v15, 0.0  ;;  %v1230_v26 = vmax.f32 %v1182_v16, 0.0 }
 0x10b   : > { %v1207_v27 = vmax.f32 %v1159_v21, 0.0  ;;  %v1231_v28 = vmax.f32 %v1183_v22, 0.0 }
 0x10d   : > { %v1805_v29 = vpack.c.bf16 %v1207_v27, %v1206_v25  ;;  %v1865_v30 = vpack.c.bf16 %v1231_v28, %v1230_v26 }
 0x10e   : > { %v827_v31 = vpop.f32.mrb[8].mxu0  ;;  %v923_v32 = vpop.f32.mrb[8].mxu1 }
 0x10f   : > { %1917 = vst [vmem:[%s2247_s21 + $0x8] sm:$0xff] %v1805_v29   ;;  %1929 = vst [vmem:[%s2247_s21 + $0x68] sm:$0xff] %v1865_v30   ;;  %v1160_v33 = vadd.f32 %v2237_v58, %v827_v31  ;;  %v1184_v34 = vadd.f32 %v2237_v58, %v923_v32  ;;  %v829_v35 = vpop.f32.mrb[9].mxu0  ;;  %v925_v36 = vpop.f32.mrb[9].mxu1 }
 0x110   : > { %v830_v37 = vpop.f32.mrb[10].mxu0  ;;  %v926_v38 = vpop.f32.mrb[10].mxu1 }
 0x111   : > { %v1161_v39 = vadd.f32 %v2237_v58, %v830_v37  ;;  %v1185_v40 = vadd.f32 %v2237_v58, %v926_v38  ;;  %v832_v41 = vpop.f32.mrb[11].mxu0  ;;  %v928_v42 = vpop.f32.mrb[11].mxu1  ;;  %v1208_v43 = vmax.f32 %v1160_v33, 0.0  ;;  %v1232_v44 = vmax.f32 %v1184_v34, 0.0 }
 0x113   : > { %v1209_v45 = vmax.f32 %v1161_v39, 0.0  ;;  %v1233_v46 = vmax.f32 %v1185_v40, 0.0 }
 0x115   : > { %v1810_v47 = vpack.c.bf16 %v1209_v45, %v1208_v43  ;;  %v1870_v48 = vpack.c.bf16 %v1233_v46, %v1232_v44 }
 0x116   : > { %v835_v49 = vpop.f32.mrb[12].mxu0  ;;  %v931_v50 = vpop.f32.mrb[12].mxu1 }
 0x117   : > { %1918 = vst [vmem:[%s2247_s21 + $0x10] sm:$0xff] %v1810_v47   ;;  %1930 = vst [vmem:[%s2247_s21 + $0x70] sm:$0xff] %v1870_v48   ;;  %v1162_v51 = vadd.f32 %v2237_v58, %v835_v49  ;;  %v1186_v52 = vadd.f32 %v2237_v58, %v931_v50  ;;  %v837_v53 = vpop.f32.mrb[13].mxu0  ;;  %v933_v54 = vpop.f32.mrb[13].mxu1 }
 0x118   : > { %v838_v55 = vpop.f32.mrb[14].mxu0  ;;  %v934_v56 = vpop.f32.mrb[14].mxu1 }
 0x119   : > { %v1163_v57 = vadd.f32 %v2237_v58, %v838_v55  ;;  %v1187_v59 = vadd.f32 %v2237_v58, %v934_v56  ;;  %v840_v60 = vpop.f32.mrb[15].mxu0  ;;  %v936_v61 = vpop.f32.mrb[15].mxu1  ;;  %v1210_v62 = vmax.f32 %v1162_v51, 0.0  ;;  %v1234_v63 = vmax.f32 %v1186_v52, 0.0 }
 0x11b   : > { %v1211_v0 = vmax.f32 %v1163_v57, 0.0  ;;  %v1235_v1 = vmax.f32 %v1187_v59, 0.0 }
 0x11d   : > { %v1815_v2 = vpack.c.bf16 %v1211_v0, %v1210_v62  ;;  %v1875_v3 = vpack.c.bf16 %v1235_v1, %v1234_v63 }
 0x11e   : > { %v843_v4 = vpop.f32.mrb[16].mxu0  ;;  %v939_v5 = vpop.f32.mrb[16].mxu1 }
 0x11f   : > { %1919 = vst [vmem:[%s2247_s21 + $0x18] sm:$0xff] %v1815_v2   ;;  %1931 = vst [vmem:[%s2247_s21 + $0x78] sm:$0xff] %v1875_v3   ;;  %v1164_v6 = vadd.f32 %v2237_v58, %v843_v4  ;;  %v1188_v7 = vadd.f32 %v2237_v58, %v939_v5  ;;  %v845_v8 = vpop.f32.mrb[17].mxu0  ;;  %v941_v9 = vpop.f32.mrb[17].mxu1 }
 0x120   : > { %v846_v10 = vpop.f32.mrb[18].mxu0  ;;  %v942_v11 = vpop.f32.mrb[18].mxu1 }
 0x121   : > { %v1165_v12 = vadd.f32 %v2237_v58, %v846_v10  ;;  %v1189_v13 = vadd.f32 %v2237_v58, %v942_v11  ;;  %v848_v14 = vpop.f32.mrb[19].mxu0  ;;  %v944_v15 = vpop.f32.mrb[19].mxu1  ;;  %v1212_v16 = vmax.f32 %v1164_v6, 0.0  ;;  %v1236_v17 = vmax.f32 %v1188_v7, 0.0 }
 0x123   : > { %v1213_v18 = vmax.f32 %v1165_v12, 0.0  ;;  %v1237_v19 = vmax.f32 %v1189_v13, 0.0 }
 0x125   : > { %v1820_v20 = vpack.c.bf16 %v1213_v18, %v1212_v16  ;;  %v1880_v21 = vpack.c.bf16 %v1237_v19, %v1236_v17 }
 0x126   : > { %v851_v22 = vpop.f32.mrb[20].mxu0  ;;  %v947_v23 = vpop.f32.mrb[20].mxu1 }
 0x127   : > { %1920 = vst [vmem:[%s2247_s21 + $0x20] sm:$0xff] %v1820_v20   ;;  %1932 = vst [vmem:[%s2247_s21 + $0x80] sm:$0xff] %v1880_v21   ;;  %v1166_v24 = vadd.f32 %v2237_v58, %v851_v22  ;;  %v1190_v25 = vadd.f32 %v2237_v58, %v947_v23  ;;  %v853_v26 = vpop.f32.mrb[21].mxu0  ;;  %v949_v27 = vpop.f32.mrb[21].mxu1 }
 0x128   : > { %v854_v28 = vpop.f32.mrb[22].mxu0  ;;  %v950_v29 = vpop.f32.mrb[22].mxu1 }
 0x129   : > { %v1167_v30 = vadd.f32 %v2237_v58, %v854_v28  ;;  %v1191_v31 = vadd.f32 %v2237_v58, %v950_v29  ;;  %v856_v32 = vpop.f32.mrb[23].mxu0  ;;  %v952_v33 = vpop.f32.mrb[23].mxu1  ;;  %v1214_v34 = vmax.f32 %v1166_v24, 0.0  ;;  %v1238_v35 = vmax.f32 %v1190_v25, 0.0 }
 0x12b   : > { %v1215_v36 = vmax.f32 %v1167_v30, 0.0  ;;  %v1239_v37 = vmax.f32 %v1191_v31, 0.0 }
 0x12d   : > { %v1825_v38 = vpack.c.bf16 %v1215_v36, %v1214_v34  ;;  %v1885_v39 = vpack.c.bf16 %v1239_v37, %v1238_v35 }
 0x12e   : > { %v859_v40 = vpop.f32.mrb[24].mxu0  ;;  %v955_v41 = vpop.f32.mrb[24].mxu1 }
 0x12f   : > { %1921 = vst [vmem:[%s2247_s21 + $0x28] sm:$0xff] %v1825_v38   ;;  %1933 = vst [vmem:[%s2247_s21 + $0x88] sm:$0xff] %v1885_v39   ;;  %v1168_v42 = vadd.f32 %v2237_v58, %v859_v40  ;;  %v1192_v43 = vadd.f32 %v2237_v58, %v955_v41  ;;  %v861_v44 = vpop.f32.mrb[25].mxu0  ;;  %v957_v45 = vpop.f32.mrb[25].mxu1 }
 0x130   : > { %v862_v46 = vpop.f32.mrb[26].mxu0  ;;  %v958_v47 = vpop.f32.mrb[26].mxu1 }
 0x131   : > { %v1169_v48 = vadd.f32 %v2237_v58, %v862_v46  ;;  %v1193_v49 = vadd.f32 %v2237_v58, %v958_v47  ;;  %v864_v50 = vpop.f32.mrb[27].mxu0  ;;  %v960_v51 = vpop.f32.mrb[27].mxu1  ;;  %v1216_v52 = vmax.f32 %v1168_v42, 0.0  ;;  %v1240_v53 = vmax.f32 %v1192_v43, 0.0 }
 0x133   : > { %v1217_v54 = vmax.f32 %v1169_v48, 0.0  ;;  %v1241_v55 = vmax.f32 %v1193_v49, 0.0 }
 0x135   : > { %v1830_v56 = vpack.c.bf16 %v1217_v54, %v1216_v52  ;;  %v1890_v57 = vpack.c.bf16 %v1241_v55, %v1240_v53 }
 0x136   : > { %v867_v59 = vpop.f32.mrb[28].mxu0  ;;  %v963_v60 = vpop.f32.mrb[28].mxu1 }
 0x137   : > { %1922 = vst [vmem:[%s2247_s21 + $0x30] sm:$0xff] %v1830_v56   ;;  %1934 = vst [vmem:[%s2247_s21 + $0x90] sm:$0xff] %v1890_v57   ;;  %v1170_v61 = vadd.f32 %v2237_v58, %v867_v59  ;;  %v1194_v62 = vadd.f32 %v2237_v58, %v963_v60  ;;  %v869_v63 = vpop.f32.mrb[29].mxu0  ;;  %v965_v0 = vpop.f32.mrb[29].mxu1 }
 0x138   : > { %v870_v1 = vpop.f32.mrb[30].mxu0  ;;  %v966_v2 = vpop.f32.mrb[30].mxu1 }
 0x139   : > { %v1171_v3 = vadd.f32 %v2237_v58, %v870_v1  ;;  %v1195_v4 = vadd.f32 %v2237_v58, %v966_v2  ;;  %v872_v5 = vpop.f32.mrb[31].mxu0  ;;  %v968_v6 = vpop.f32.mrb[31].mxu1  ;;  %v1218_v7 = vmax.f32 %v1170_v61, 0.0  ;;  %v1242_v8 = vmax.f32 %v1194_v62, 0.0 }
 0x13b   : > { %v1219_v9 = vmax.f32 %v1171_v3, 0.0  ;;  %v1243_v10 = vmax.f32 %v1195_v4, 0.0 }
 0x13d   : > { %v1835_v11 = vpack.c.bf16 %v1219_v9, %v1218_v7  ;;  %v1895_v12 = vpack.c.bf16 %v1243_v10, %v1242_v8 }
 0x13e   : > { %v875_v13 = vpop.f32.mrb[32].mxu0  ;;  %v971_v14 = vpop.f32.mrb[32].mxu1 }
 0x13f   : > { %1923 = vst [vmem:[%s2247_s21 + $0x38] sm:$0xff] %v1835_v11   ;;  %1935 = vst [vmem:[%s2247_s21 + $0x98] sm:$0xff] %v1895_v12   ;;  %v1172_v15 = vadd.f32 %v2237_v58, %v875_v13  ;;  %v1196_v16 = vadd.f32 %v2237_v58, %v971_v14  ;;  %v877_v17 = vpop.f32.mrb[33].mxu0  ;;  %v973_v18 = vpop.f32.mrb[33].mxu1 }
 0x140   : > { %v878_v19 = vpop.f32.mrb[34].mxu0  ;;  %v974_v20 = vpop.f32.mrb[34].mxu1 }
 0x141   : > { %v1173_v21 = vadd.f32 %v2237_v58, %v878_v19  ;;  %v1197_v22 = vadd.f32 %v2237_v58, %v974_v20  ;;  %v880_v23 = vpop.f32.mrb[35].mxu0  ;;  %v976_v24 = vpop.f32.mrb[35].mxu1  ;;  %v1220_v25 = vmax.f32 %v1172_v15, 0.0  ;;  %v1244_v26 = vmax.f32 %v1196_v16, 0.0 }
 0x143   : > { %v1221_v27 = vmax.f32 %v1173_v21, 0.0  ;;  %v1245_v28 = vmax.f32 %v1197_v22, 0.0 }
 0x145   : > { %v1840_v29 = vpack.c.bf16 %v1221_v27, %v1220_v25  ;;  %v1900_v30 = vpack.c.bf16 %v1245_v28, %v1244_v26 }
 0x146   : > { %v883_v31 = vpop.f32.mrb[36].mxu0  ;;  %v979_v32 = vpop.f32.mrb[36].mxu1 }
 0x147   : > { %1924 = vst [vmem:[%s2247_s21 + $0x40] sm:$0xff] %v1840_v29   ;;  %1936 = vst [vmem:[%s2247_s21 + $0xa0] sm:$0xff] %v1900_v30   ;;  %v1174_v33 = vadd.f32 %v2237_v58, %v883_v31  ;;  %v1198_v34 = vadd.f32 %v2237_v58, %v979_v32  ;;  %v885_v35 = vpop.f32.mrb[37].mxu0  ;;  %v981_v36 = vpop.f32.mrb[37].mxu1 }
 0x148   : > { %v886_v37 = vpop.f32.mrb[38].mxu0  ;;  %v982_v38 = vpop.f32.mrb[38].mxu1 }
 0x149   : > { %v1175_v39 = vadd.f32 %v2237_v58, %v886_v37  ;;  %v1199_v40 = vadd.f32 %v2237_v58, %v982_v38  ;;  %v888_v41 = vpop.f32.mrb[39].mxu0  ;;  %v984_v42 = vpop.f32.mrb[39].mxu1  ;;  %v1222_v43 = vmax.f32 %v1174_v33, 0.0  ;;  %v1246_v44 = vmax.f32 %v1198_v34, 0.0 }
 0x14b   : > { %v1223_v45 = vmax.f32 %v1175_v39, 0.0  ;;  %v1247_v46 = vmax.f32 %v1199_v40, 0.0 }
 0x14d   : > { %v1845_v47 = vpack.c.bf16 %v1223_v45, %v1222_v43  ;;  %v1905_v48 = vpack.c.bf16 %v1247_v46, %v1246_v44 }
 0x14e   : > { %v891_v49 = vpop.f32.mrb[40].mxu0  ;;  %v987_v50 = vpop.f32.mrb[40].mxu1 }
 0x14f   : > { %1925 = vst [vmem:[%s2247_s21 + $0x48] sm:$0xff] %v1845_v47   ;;  %1937 = vst [vmem:[%s2247_s21 + $0xa8] sm:$0xff] %v1905_v48   ;;  %v1176_v51 = vadd.f32 %v2237_v58, %v891_v49  ;;  %v1200_v52 = vadd.f32 %v2237_v58, %v987_v50  ;;  %v893_v53 = vpop.f32.mrb[41].mxu0  ;;  %v989_v54 = vpop.f32.mrb[41].mxu1 }
 0x150   : > { %v894_v55 = vpop.f32.mrb[42].mxu0  ;;  %v990_v56 = vpop.f32.mrb[42].mxu1 }
 0x151   : > { %v1177_v57 = vadd.f32 %v2237_v58, %v894_v55  ;;  %v1201_v59 = vadd.f32 %v2237_v58, %v990_v56  ;;  %v896_v60 = vpop.f32.mrb[43].mxu0  ;;  %v992_v61 = vpop.f32.mrb[43].mxu1  ;;  %v1224_v62 = vmax.f32 %v1176_v51, 0.0  ;;  %v1248_v63 = vmax.f32 %v1200_v52, 0.0 }
 0x153   : > { %v1225_v0 = vmax.f32 %v1177_v57, 0.0  ;;  %v1249_v1 = vmax.f32 %v1201_v59, 0.0 }
 0x155   : > { %v1850_v2 = vpack.c.bf16 %v1225_v0, %v1224_v62  ;;  %v1910_v3 = vpack.c.bf16 %v1249_v1, %v1248_v63 }
 0x156   : > { %v899_v4 = vpop.f32.mrb[44].mxu0  ;;  %v995_v5 = vpop.f32.mrb[44].mxu1 }
 0x157   : > { %1926 = vst [vmem:[%s2247_s21 + $0x50] sm:$0xff] %v1850_v2   ;;  %1938 = vst [vmem:[%s2247_s21 + $0xb0] sm:$0xff] %v1910_v3   ;;  %v1178_v6 = vadd.f32 %v2237_v58, %v899_v4  ;;  %v1202_v7 = vadd.f32 %v2237_v58, %v995_v5  ;;  %v901_v8 = vpop.f32.mrb[45].mxu0  ;;  %v997_v9 = vpop.f32.mrb[45].mxu1 }
 0x158   : > { %v902_v10 = vpop.f32.mrb[46].mxu0  ;;  %v998_v11 = vpop.f32.mrb[46].mxu1 }
 0x159   : > { %v1179_v12 = vadd.f32 %v2237_v58, %v902_v10  ;;  %v1203_v13 = vadd.f32 %v2237_v58, %v998_v11  ;;  %v904_v14 = vpop.f32.mrb[47].mxu0  ;;  %v1000_v15 = vpop.f32.mrb[47].mxu1  ;;  %v1226_v16 = vmax.f32 %v1178_v6, 0.0  ;;  %v1250_v17 = vmax.f32 %v1202_v7, 0.0 }
 0x15b   : > { %v1227_v18 = vmax.f32 %v1179_v12, 0.0  ;;  %v1251_v19 = vmax.f32 %v1203_v13, 0.0 }
 0x15d   : > { %v1855_v20 = vpack.c.bf16 %v1227_v18, %v1226_v16  ;;  %v1915_v21 = vpack.c.bf16 %v1251_v19, %v1250_v17 }
 0x15f   : > { %1927 = vst [vmem:[%s2247_s21 + $0x58] sm:$0xff] %v1855_v20   ;;  %1939 = vst [vmem:[%s2247_s21 + $0xb8] sm:$0xff] %v1915_v21  }
 0x160 PF: > { %s13_s14 = sadd.s32 1, %s2086_s14   ;;  %s2330_s12 = smov %s2082_s13 }
 0x161   : > { %p10_p5 = scmp.ge.s32.totalorder %s13_s14, 4   ;;  %s2331_s13 = smov %s2333_s15 }
 0x163   :  { %12 = sbr.rel (!%p10_p5) target bundleno = 2 (0x2), region = 76 }

// kernel: retinanet_forward.24
= control target key start
LH: loop header
LB: loop body
LE: loop exit
PB: predicated region body
PF: predicated region fallthrough
CT: control target
= control target key end

     0   :  { %s1630_s12 = smov 0   ;;  %s1632_s13 = smov 0   ;;  %s1874_s0 = inlined_call_operand.vmem [shape: bf16[768,144], index: 0, kind: input, shape index: {}]   ;;  %s1875_s1 = inlined_call_operand.vmem [shape: bf16[144,128], index: 1, kind: input, shape index: {}]   ;;  %s1876_s2 = inlined_call_operand.vmem [shape: f32[1,128], index: 2, kind: input, shape index: {}]   ;;  %s1877_s3 = inlined_call_operand.vmem [shape: f32[768,128], index: 3, kind: output, shape index: {}]  }
   0x1   :  { %s1634_s14 = smov 0  }
   0x2 LB: > { %s32_s15 = sadd.s32 1, %s1603_s13  ;;  %p1372_p0 = scmp.ge.s32.totalorder %s1607_s14, 1  ;;  %s1607_s14 = sphi %s1634_s14, %s13_s14   ;;  %s1603_s13 = sphi %s1632_s13, %s1879_s13   ;;  %s1599_s12 = sphi %s1630_s12, %s1878_s12  }
   0x3   : > { %p34_p1 = scmp.ge.s32.totalorder %s32_s15, 2  ;;  %p191_p2 = scmp.lt.s32.totalorder %s1607_s14, 3 }
   0x5   : > { %s1881_s15 = smov (%p34_p1, %s32_s15), 0  ;;  %p192_p3 = pnand %p1372_p0, %p191_p2 }
   0x6   : > { %v1504_v0 = vld [vmem:[%s1875_s1] sm:$0xff] (!%p192_p3)   ;;  %v1609_v1 = vmov (!%p192_p3), 0   ;;  %s234_s18 = smul.u32 (!%p192_p3), 48, %s1599_s12  ;;  %v1505_v2 = vld [vmem:[%s1875_s1 + $0x8] sm:$0xff] (!%p192_p3)   ;;  %v1506_v3 = vld [vmem:[%s1875_s1 + $0x10] sm:$0xff] (!%p192_p3)   ;;  %vm704_vm0 = vcmask (!%p192_p3), 130048  }
   0x7   : > { %195 = sbr.rel (%p192_p3) target bundleno = 348 (0x15c), region = 32  ;;  %777 = vmatprep.subr.bf16.mxu0 (!%p192_p3), %v1609_v1  ;;  %1461 = vmatprep.subr.bf16.mxu1 (!%p192_p3), %v1609_v1  ;;  %v1507_v4 = vld [vmem:[%s1875_s1 + $0x18] sm:$0xff] (!%p192_p3)   ;;  %v1508_v7 = vld [vmem:[%s1875_s1 + $0x20] sm:$0xff] (!%p192_p3)   ;;  %v1509_v8 = vld [vmem:[%s1875_s1 + $0x28] sm:$0xff] (!%p192_p3)  }
   0x8   : > { %778 = vmatpush1.bf16.msra.mxu0 (!%p192_p3), %v1504_v0  ;;  %1470 = vmatpush1.bf16.msra.mxu1 (!%p192_p3), %v1504_v0  ;;  %p236_p4 = scmp.lt.s32.totalorder (!%p192_p3), %s234_s18, 95  ;;  %v1510_v9 = vld [vmem:[%s1875_s1 + $0x30] sm:$0xff] (!%p192_p3)   ;;  %v1511_v10 = vld [vmem:[%s1875_s1 + $0x38] sm:$0xff] (!%p192_p3)   ;;  %v1512_v11 = vld [vmem:[%s1875_s1 + $0x40] sm:$0xff] (!%p192_p3)  }
   0x9   : > { %779 = vmatprep.subr.bf16.mxu0 (!%p192_p3), %v1609_v1  ;;  %1462 = vmatprep.subr.bf16.mxu1 (!%p192_p3), %v1609_v1  ;;  %v1760_v58 = vld [vmem:[%s1876_s2] ss:$0 sm:$0xff] (!%p192_p3) }
   0xc   : > { %780 = vmatpush1.bf16.msra.mxu0 (!%p192_p3), %v1505_v2  ;;  %1471 = vmatpush1.bf16.msra.mxu1 (!%p192_p3), %v1505_v2 }
   0xd   : > { %781 = vmatprep.subr.bf16.mxu0 (!%p192_p3), %v1609_v1  ;;  %1463 = vmatprep.subr.bf16.mxu1 (!%p192_p3), %v1609_v1 }
   0xe   : > { %s1883_s18 = smov (!%p236_p4, %s234_s18), 95 }
   0xf   : > { %s1460_s23 = sshll.u32 %s1883_s18, 3 }
  0x10   : > { %s1665_s26 = scalar_lea.vmem %s1874_s0, %s1460_s23  ;;  %782 = vmatpush1.bf16.msra.mxu0 %v1506_v3  ;;  %1472 = vmatpush1.bf16.msra.mxu1 %v1506_v3  ;;  %s1767_s20 = scalar_lea.vmem %s1877_s3, %s1460_s23 }
  0x11   : > { %v1515_v5 = vld [vmem:[%s1665_s26 + $0x4] ss:$8 sps:$4 sm:$0xff]   ;;  %783 = vmatprep.subr.bf16.mxu0 %v1609_v1  ;;  %1464 = vmatprep.subr.bf16.mxu1 %v1609_v1  ;;  %v1513_v12 = vld [vmem:[%s1665_s26] ss:$8 sps:$4 sm:$0xff]   ;;  %v1519_v14 = vld [vmem:[%s1665_s26 + $0x14] ss:$8 sps:$4 sm:$0xff]  }
  0x12   : > { %v1518_v6 = vld [vmem:[%s1665_s26 + $0xc4] ss:$8 sps:$4 sm:$0xff]   ;;  %1433 = vmatprep.mubr.msk.bf16.mxu0 %vm704_vm0, %v1515_v5  ;;  %v1516_v13 = vld [vmem:[%s1665_s26 + $0xc0] ss:$8 sps:$4 sm:$0xff]   ;;  %v1521_v15 = vld [vmem:[%s1665_s26 + $0xd4] ss:$8 sps:$4 sm:$0xff]  }
  0x13   : > { %1445 = vmatprep.mubr.msk.bf16.mxu1 %vm704_vm0, %v1518_v6  ;;  %v1523_v16 = vld [vmem:[%s1665_s26 + $0x10] ss:$8 sps:$4 sm:$0xff]   ;;  %v1525_v18 = vld [vmem:[%s1665_s26 + $0x24] ss:$8 sps:$4 sm:$0xff]   ;;  %v1529_v20 = vld [vmem:[%s1665_s26 + $0x20] ss:$8 sps:$4 sm:$0xff]  }
  0x14   : > { %784 = vmatpush1.bf16.msra.mxu0 %v1507_v4  ;;  %1473 = vmatpush1.bf16.msra.mxu1 %v1507_v4  ;;  %v1524_v17 = vld [vmem:[%s1665_s26 + $0xd0] ss:$8 sps:$4 sm:$0xff]   ;;  %v1527_v19 = vld [vmem:[%s1665_s26 + $0xe4] ss:$8 sps:$4 sm:$0xff]   ;;  %v1530_v21 = vld [vmem:[%s1665_s26 + $0xe0] ss:$8 sps:$4 sm:$0xff]  }
  0x15   : > { %785 = vmatprep.subr.bf16.mxu0 %v1609_v1  ;;  %1465 = vmatprep.subr.bf16.mxu1 %v1609_v1  ;;  %v1531_v22 = vld [vmem:[%s1665_s26 + $0x34] ss:$8 sps:$4 sm:$0xff]   ;;  %v1535_v24 = vld [vmem:[%s1665_s26 + $0x30] ss:$8 sps:$4 sm:$0xff]   ;;  %v1537_v26 = vld [vmem:[%s1665_s26 + $0x44] ss:$8 sps:$4 sm:$0xff]  }
  0x16   : > { %v1533_v23 = vld [vmem:[%s1665_s26 + $0xf4] ss:$8 sps:$4 sm:$0xff]   ;;  %v1536_v25 = vld [vmem:[%s1665_s26 + $0xf0] ss:$8 sps:$4 sm:$0xff]   ;;  %v1539_v27 = vld [vmem:[%s1665_s26 + $0x104] ss:$8 sps:$4 sm:$0xff]  }
  0x17   : > { %v1541_v28 = vld [vmem:[%s1665_s26 + $0x40] ss:$8 sps:$4 sm:$0xff]   ;;  %v1543_v30 = vld [vmem:[%s1665_s26 + $0x54] ss:$8 sps:$4 sm:$0xff]   ;;  %v1547_v32 = vld [vmem:[%s1665_s26 + $0x50] ss:$8 sps:$4 sm:$0xff]  }
  0x18   : > { %786 = vmatpush1.bf16.msra.mxu0 %v1508_v7  ;;  %1474 = vmatpush1.bf16.msra.mxu1 %v1508_v7  ;;  %v1542_v29 = vld [vmem:[%s1665_s26 + $0x100] ss:$8 sps:$4 sm:$0xff]   ;;  %v1545_v31 = vld [vmem:[%s1665_s26 + $0x114] ss:$8 sps:$4 sm:$0xff]   ;;  %v1548_v33 = vld [vmem:[%s1665_s26 + $0x110] ss:$8 sps:$4 sm:$0xff]  }
  0x19   : > { %787 = vmatprep.subr.bf16.mxu0 %v1609_v1  ;;  %1466 = vmatprep.subr.bf16.mxu1 %v1609_v1  ;;  %v1549_v34 = vld [vmem:[%s1665_s26 + $0x64] ss:$8 sps:$4 sm:$0xff]   ;;  %v1553_v36 = vld [vmem:[%s1665_s26 + $0x60] ss:$8 sps:$4 sm:$0xff]   ;;  %v1555_v38 = vld [vmem:[%s1665_s26 + $0x74] ss:$8 sps:$4 sm:$0xff]  }
  0x1a   : > { %v1551_v35 = vld [vmem:[%s1665_s26 + $0x124] ss:$8 sps:$4 sm:$0xff]   ;;  %v1554_v37 = vld [vmem:[%s1665_s26 + $0x120] ss:$8 sps:$4 sm:$0xff]   ;;  %v1557_v39 = vld [vmem:[%s1665_s26 + $0x134] ss:$8 sps:$4 sm:$0xff]  }
  0x1b   : > { %v1559_v40 = vld [vmem:[%s1665_s26 + $0x70] ss:$8 sps:$4 sm:$0xff]   ;;  %v1561_v42 = vld [vmem:[%s1665_s26 + $0x84] ss:$8 sps:$4 sm:$0xff]   ;;  %v1565_v44 = vld [vmem:[%s1665_s26 + $0x80] ss:$8 sps:$4 sm:$0xff]  }
  0x1c   : > { %788 = vmatpush1.bf16.msra.mxu0 %v1509_v8  ;;  %1475 = vmatpush1.bf16.msra.mxu1 %v1509_v8  ;;  %v1560_v41 = vld [vmem:[%s1665_s26 + $0x130] ss:$8 sps:$4 sm:$0xff]   ;;  %v1563_v43 = vld [vmem:[%s1665_s26 + $0x144] ss:$8 sps:$4 sm:$0xff]   ;;  %v1566_v45 = vld [vmem:[%s1665_s26 + $0x140] ss:$8 sps:$4 sm:$0xff]  }
  0x1d   : > { %789 = vmatprep.subr.bf16.mxu0 %v1609_v1  ;;  %1467 = vmatprep.subr.bf16.mxu1 %v1609_v1  ;;  %v1567_v46 = vld [vmem:[%s1665_s26 + $0x94] ss:$8 sps:$4 sm:$0xff]   ;;  %v1571_v48 = vld [vmem:[%s1665_s26 + $0x90] ss:$8 sps:$4 sm:$0xff]   ;;  %v1573_v50 = vld [vmem:[%s1665_s26 + $0xa4] ss:$8 sps:$4 sm:$0xff]  }
  0x1e   : > { %v1569_v47 = vld [vmem:[%s1665_s26 + $0x154] ss:$8 sps:$4 sm:$0xff]   ;;  %v1572_v49 = vld [vmem:[%s1665_s26 + $0x150] ss:$8 sps:$4 sm:$0xff]   ;;  %v1575_v51 = vld [vmem:[%s1665_s26 + $0x164] ss:$8 sps:$4 sm:$0xff]  }
  0x1f   : > { %v1577_v52 = vld [vmem:[%s1665_s26 + $0xa0] ss:$8 sps:$4 sm:$0xff]   ;;  %v1579_v54 = vld [vmem:[%s1665_s26 + $0xb4] ss:$8 sps:$4 sm:$0xff]   ;;  %v1583_v56 = vld [vmem:[%s1665_s26 + $0xb0] ss:$8 sps:$4 sm:$0xff]  }
  0x20   : > { %790 = vmatpush1.bf16.msra.mxu0 %v1510_v9  ;;  %1476 = vmatpush1.bf16.msra.mxu1 %v1510_v9  ;;  %v1578_v53 = vld [vmem:[%s1665_s26 + $0x160] ss:$8 sps:$4 sm:$0xff]   ;;  %v1581_v55 = vld [vmem:[%s1665_s26 + $0x174] ss:$8 sps:$4 sm:$0xff]   ;;  %v1584_v57 = vld [vmem:[%s1665_s26 + $0x170] ss:$8 sps:$4 sm:$0xff]  }
  0x21   : > { %791 = vmatprep.subr.bf16.mxu0 %v1609_v1  ;;  %1468 = vmatprep.subr.bf16.mxu1 %v1609_v1 }
  0x24   : > { %792 = vmatpush1.bf16.msra.mxu0 %v1511_v10  ;;  %1477 = vmatpush1.bf16.msra.mxu1 %v1511_v10 }
  0x25   : > { %793 = vmatprep.subr.bf16.mxu0 %v1609_v1  ;;  %1469 = vmatprep.subr.bf16.mxu1 %v1609_v1 }
  0x28   : > { %794 = vmatpush1.bf16.msra.mxu0 %v1512_v11  ;;  %1478 = vmatpush1.bf16.msra.mxu1 %v1512_v11 }
  0x2b   : > { %810 = vmatmul.mubr.bf16.vlgmr.msra.gmra.mrb[0].mxu0 %v1513_v12  ;;  %906 = vmatmul.mubr.bf16.vlgmr.msra.gmra.mrb[0].mxu1 %v1516_v13 }
  0x2c   : > { %1434 = vmatprep.mubr.msk.bf16.mxu0 %vm704_vm0, %v1519_v14  ;;  %1446 = vmatprep.mubr.msk.bf16.mxu1 %vm704_vm0, %v1521_v15 }
  0x33   : > { %818 = vmatmul.mubr.bf16.gmra.mrb[4].mxu0 %v1523_v16  ;;  %914 = vmatmul.mubr.bf16.gmra.mrb[4].mxu1 %v1524_v17 }
  0x34   : > { %1435 = vmatprep.mubr.msk.bf16.mxu0 %vm704_vm0, %v1525_v18  ;;  %1447 = vmatprep.mubr.msk.bf16.mxu1 %vm704_vm0, %v1527_v19 }
  0x3b   : > { %826 = vmatmul.mubr.bf16.gmra.mrb[8].mxu0 %v1529_v20  ;;  %922 = vmatmul.mubr.bf16.gmra.mrb[8].mxu1 %v1530_v21 }
  0x3c   : > { %1436 = vmatprep.mubr.msk.bf16.mxu0 %vm704_vm0, %v1531_v22  ;;  %1448 = vmatprep.mubr.msk.bf16.mxu1 %vm704_vm0, %v1533_v23 }
  0x43   : > { %834 = vmatmul.mubr.bf16.gmra.mrb[12].mxu0 %v1535_v24  ;;  %930 = vmatmul.mubr.bf16.gmra.mrb[12].mxu1 %v1536_v25 }
  0x44   : > { %1437 = vmatprep.mubr.msk.bf16.mxu0 %vm704_vm0, %v1537_v26  ;;  %1449 = vmatprep.mubr.msk.bf16.mxu1 %vm704_vm0, %v1539_v27 }
  0x4b   : > { %842 = vmatmul.mubr.bf16.gmra.mrb[16].mxu0 %v1541_v28  ;;  %938 = vmatmul.mubr.bf16.gmra.mrb[16].mxu1 %v1542_v29 }
  0x4c   : > { %1438 = vmatprep.mubr.msk.bf16.mxu0 %vm704_vm0, %v1543_v30  ;;  %1450 = vmatprep.mubr.msk.bf16.mxu1 %vm704_vm0, %v1545_v31 }
  0x53   : > { %850 = vmatmul.mubr.bf16.gmra.mrb[20].mxu0 %v1547_v32  ;;  %946 = vmatmul.mubr.bf16.gmra.mrb[20].mxu1 %v1548_v33 }
  0x54   : > { %1439 = vmatprep.mubr.msk.bf16.mxu0 %vm704_vm0, %v1549_v34  ;;  %1451 = vmatprep.mubr.msk.bf16.mxu1 %vm704_vm0, %v1551_v35 }
  0x5b   : > { %858 = vmatmul.mubr.bf16.gmra.mrb[24].mxu0 %v1553_v36  ;;  %954 = vmatmul.mubr.bf16.gmra.mrb[24].mxu1 %v1554_v37 }
  0x5c   : > { %1440 = vmatprep.mubr.msk.bf16.mxu0 %vm704_vm0, %v1555_v38  ;;  %1452 = vmatprep.mubr.msk.bf16.mxu1 %vm704_vm0, %v1557_v39 }
  0x63   : > { %866 = vmatmul.mubr.bf16.gmra.mrb[28].mxu0 %v1559_v40  ;;  %962 = vmatmul.mubr.bf16.gmra.mrb[28].mxu1 %v1560_v41 }
  0x64   : > { %1441 = vmatprep.mubr.msk.bf16.mxu0 %vm704_vm0, %v1561_v42  ;;  %1453 = vmatprep.mubr.msk.bf16.mxu1 %vm704_vm0, %v1563_v43 }
  0x6b   : > { %874 = vmatmul.mubr.bf16.gmra.mrb[32].mxu0 %v1565_v44  ;;  %970 = vmatmul.mubr.bf16.gmra.mrb[32].mxu1 %v1566_v45 }
  0x6c   : > { %1442 = vmatprep.mubr.msk.bf16.mxu0 %vm704_vm0, %v1567_v46  ;;  %1454 = vmatprep.mubr.msk.bf16.mxu1 %vm704_vm0, %v1569_v47 }
  0x73   : > { %882 = vmatmul.mubr.bf16.gmra.mrb[36].mxu0 %v1571_v48  ;;  %978 = vmatmul.mubr.bf16.gmra.mrb[36].mxu1 %v1572_v49 }
  0x74   : > { %1443 = vmatprep.mubr.msk.bf16.mxu0 %vm704_vm0, %v1573_v50  ;;  %1455 = vmatprep.mubr.msk.bf16.mxu1 %vm704_vm0, %v1575_v51 }
  0x7b   : > { %890 = vmatmul.mubr.bf16.gmra.mrb[40].mxu0 %v1577_v52  ;;  %986 = vmatmul.mubr.bf16.gmra.mrb[40].mxu1 %v1578_v53 }
  0x7c   : > { %1444 = vmatprep.mubr.msk.bf16.mxu0 %vm704_vm0, %v1579_v54  ;;  %1456 = vmatprep.mubr.msk.bf16.mxu1 %vm704_vm0, %v1581_v55 }
  0x83   : > { %898 = vmatmul.mubr.bf16.gmra.mrb[44].mxu0 %v1583_v56  ;;  %994 = vmatmul.mubr.bf16.gmra.mrb[44].mxu1 %v1584_v57 }
  0xfe   : > { %v811_v59 = vpop.f32.mrb[0].mxu0  ;;  %v907_v60 = vpop.f32.mrb[0].mxu1 }
  0xff   : > { %v1156_v61 = vadd.f32 %v1760_v58, %v811_v59  ;;  %v1180_v62 = vadd.f32 %v1760_v58, %v907_v60  ;;  %v813_v63 = vpop.f32.mrb[1].mxu0  ;;  %v909_v0 = vpop.f32.mrb[1].mxu1 }
 0x100   : > { %v814_v1 = vpop.f32.mrb[2].mxu0  ;;  %v910_v2 = vpop.f32.mrb[2].mxu1 }
 0x101   : > { %1204 = vst [vmem:[%s1767_s20] sm:$0xff] %v1156_v61  ;;  %1228 = vst [vmem:[%s1767_s20 + $0xc0] sm:$0xff] %v1180_v62  ;;  %v1157_v3 = vadd.f32 %v1760_v58, %v814_v1  ;;  %v1181_v4 = vadd.f32 %v1760_v58, %v910_v2  ;;  %v816_v5 = vpop.f32.mrb[3].mxu0  ;;  %v912_v6 = vpop.f32.mrb[3].mxu1 }
 0x103   : > { %1205 = vst [vmem:[%s1767_s20 + $0x8] sm:$0xff] %v1157_v3  ;;  %1229 = vst [vmem:[%s1767_s20 + $0xc8] sm:$0xff] %v1181_v4 }
 0x106   : > { %v819_v7 = vpop.f32.mrb[4].mxu0  ;;  %v915_v8 = vpop.f32.mrb[4].mxu1 }
 0x107   : > { %v1158_v9 = vadd.f32 %v1760_v58, %v819_v7  ;;  %v1182_v10 = vadd.f32 %v1760_v58, %v915_v8  ;;  %v821_v11 = vpop.f32.mrb[5].mxu0  ;;  %v917_v12 = vpop.f32.mrb[5].mxu1 }
 0x108   : > { %v822_v13 = vpop.f32.mrb[6].mxu0  ;;  %v918_v14 = vpop.f32.mrb[6].mxu1 }
 0x109   : > { %1206 = vst [vmem:[%s1767_s20 + $0x10] sm:$0xff] %v1158_v9  ;;  %1230 = vst [vmem:[%s1767_s20 + $0xd0] sm:$0xff] %v1182_v10  ;;  %v1159_v15 = vadd.f32 %v1760_v58, %v822_v13  ;;  %v1183_v16 = vadd.f32 %v1760_v58, %v918_v14  ;;  %v824_v17 = vpop.f32.mrb[7].mxu0  ;;  %v920_v18 = vpop.f32.mrb[7].mxu1 }
 0x10b   : > { %1207 = vst [vmem:[%s1767_s20 + $0x18] sm:$0xff] %v1159_v15  ;;  %1231 = vst [vmem:[%s1767_s20 + $0xd8] sm:$0xff] %v1183_v16 }
 0x10e   : > { %v827_v19 = vpop.f32.mrb[8].mxu0  ;;  %v923_v20 = vpop.f32.mrb[8].mxu1 }
 0x10f   : > { %v1160_v21 = vadd.f32 %v1760_v58, %v827_v19  ;;  %v1184_v22 = vadd.f32 %v1760_v58, %v923_v20  ;;  %v829_v23 = vpop.f32.mrb[9].mxu0  ;;  %v925_v24 = vpop.f32.mrb[9].mxu1 }
 0x110   : > { %v830_v25 = vpop.f32.mrb[10].mxu0  ;;  %v926_v26 = vpop.f32.mrb[10].mxu1 }
 0x111   : > { %1208 = vst [vmem:[%s1767_s20 + $0x20] sm:$0xff] %v1160_v21  ;;  %1232 = vst [vmem:[%s1767_s20 + $0xe0] sm:$0xff] %v1184_v22  ;;  %v1161_v27 = vadd.f32 %v1760_v58, %v830_v25  ;;  %v1185_v28 = vadd.f32 %v1760_v58, %v926_v26  ;;  %v832_v29 = vpop.f32.mrb[11].mxu0  ;;  %v928_v30 = vpop.f32.mrb[11].mxu1 }
 0x113   : > { %1209 = vst [vmem:[%s1767_s20 + $0x28] sm:$0xff] %v1161_v27  ;;  %1233 = vst [vmem:[%s1767_s20 + $0xe8] sm:$0xff] %v1185_v28 }
 0x116   : > { %v835_v31 = vpop.f32.mrb[12].mxu0  ;;  %v931_v32 = vpop.f32.mrb[12].mxu1 }
 0x117   : > { %v1162_v33 = vadd.f32 %v1760_v58, %v835_v31  ;;  %v1186_v34 = vadd.f32 %v1760_v58, %v931_v32  ;;  %v837_v35 = vpop.f32.mrb[13].mxu0  ;;  %v933_v36 = vpop.f32.mrb[13].mxu1 }
 0x118   : > { %v838_v37 = vpop.f32.mrb[14].mxu0  ;;  %v934_v38 = vpop.f32.mrb[14].mxu1 }
 0x119   : > { %1210 = vst [vmem:[%s1767_s20 + $0x30] sm:$0xff] %v1162_v33  ;;  %1234 = vst [vmem:[%s1767_s20 + $0xf0] sm:$0xff] %v1186_v34  ;;  %v1163_v39 = vadd.f32 %v1760_v58, %v838_v37  ;;  %v1187_v40 = vadd.f32 %v1760_v58, %v934_v38  ;;  %v840_v41 = vpop.f32.mrb[15].mxu0  ;;  %v936_v42 = vpop.f32.mrb[15].mxu1 }
 0x11b   : > { %1211 = vst [vmem:[%s1767_s20 + $0x38] sm:$0xff] %v1163_v39  ;;  %1235 = vst [vmem:[%s1767_s20 + $0xf8] sm:$0xff] %v1187_v40 }
 0x11e   : > { %v843_v43 = vpop.f32.mrb[16].mxu0  ;;  %v939_v44 = vpop.f32.mrb[16].mxu1 }
 0x11f   : > { %v1164_v45 = vadd.f32 %v1760_v58, %v843_v43  ;;  %v1188_v46 = vadd.f32 %v1760_v58, %v939_v44  ;;  %v845_v47 = vpop.f32.mrb[17].mxu0  ;;  %v941_v48 = vpop.f32.mrb[17].mxu1 }
 0x120   : > { %v846_v49 = vpop.f32.mrb[18].mxu0  ;;  %v942_v50 = vpop.f32.mrb[18].mxu1 }
 0x121   : > { %1212 = vst [vmem:[%s1767_s20 + $0x40] sm:$0xff] %v1164_v45  ;;  %1236 = vst [vmem:[%s1767_s20 + $0x100] sm:$0xff] %v1188_v46  ;;  %v1165_v51 = vadd.f32 %v1760_v58, %v846_v49  ;;  %v1189_v52 = vadd.f32 %v1760_v58, %v942_v50  ;;  %v848_v53 = vpop.f32.mrb[19].mxu0  ;;  %v944_v54 = vpop.f32.mrb[19].mxu1 }
 0x123   : > { %1213 = vst [vmem:[%s1767_s20 + $0x48] sm:$0xff] %v1165_v51  ;;  %1237 = vst [vmem:[%s1767_s20 + $0x108] sm:$0xff] %v1189_v52 }
 0x126   : > { %v851_v55 = vpop.f32.mrb[20].mxu0  ;;  %v947_v56 = vpop.f32.mrb[20].mxu1 }
 0x127   : > { %v1166_v57 = vadd.f32 %v1760_v58, %v851_v55  ;;  %v1190_v59 = vadd.f32 %v1760_v58, %v947_v56  ;;  %v853_v60 = vpop.f32.mrb[21].mxu0  ;;  %v949_v61 = vpop.f32.mrb[21].mxu1 }
 0x128   : > { %v854_v62 = vpop.f32.mrb[22].mxu0  ;;  %v950_v63 = vpop.f32.mrb[22].mxu1 }
 0x129   : > { %1214 = vst [vmem:[%s1767_s20 + $0x50] sm:$0xff] %v1166_v57  ;;  %1238 = vst [vmem:[%s1767_s20 + $0x110] sm:$0xff] %v1190_v59  ;;  %v1167_v0 = vadd.f32 %v1760_v58, %v854_v62  ;;  %v1191_v1 = vadd.f32 %v1760_v58, %v950_v63  ;;  %v856_v2 = vpop.f32.mrb[23].mxu0  ;;  %v952_v3 = vpop.f32.mrb[23].mxu1 }
 0x12b   : > { %1215 = vst [vmem:[%s1767_s20 + $0x58] sm:$0xff] %v1167_v0  ;;  %1239 = vst [vmem:[%s1767_s20 + $0x118] sm:$0xff] %v1191_v1 }
 0x12e   : > { %v859_v4 = vpop.f32.mrb[24].mxu0  ;;  %v955_v5 = vpop.f32.mrb[24].mxu1 }
 0x12f   : > { %v1168_v6 = vadd.f32 %v1760_v58, %v859_v4  ;;  %v1192_v7 = vadd.f32 %v1760_v58, %v955_v5  ;;  %v861_v8 = vpop.f32.mrb[25].mxu0  ;;  %v957_v9 = vpop.f32.mrb[25].mxu1 }
 0x130   : > { %v862_v10 = vpop.f32.mrb[26].mxu0  ;;  %v958_v11 = vpop.f32.mrb[26].mxu1 }
 0x131   : > { %1216 = vst [vmem:[%s1767_s20 + $0x60] sm:$0xff] %v1168_v6  ;;  %1240 = vst [vmem:[%s1767_s20 + $0x120] sm:$0xff] %v1192_v7  ;;  %v1169_v12 = vadd.f32 %v1760_v58, %v862_v10  ;;  %v1193_v13 = vadd.f32 %v1760_v58, %v958_v11  ;;  %v864_v14 = vpop.f32.mrb[27].mxu0  ;;  %v960_v15 = vpop.f32.mrb[27].mxu1 }
 0x133   : > { %1217 = vst [vmem:[%s1767_s20 + $0x68] sm:$0xff] %v1169_v12  ;;  %1241 = vst [vmem:[%s1767_s20 + $0x128] sm:$0xff] %v1193_v13 }
 0x136   : > { %v867_v16 = vpop.f32.mrb[28].mxu0  ;;  %v963_v17 = vpop.f32.mrb[28].mxu1 }
 0x137   : > { %v1170_v18 = vadd.f32 %v1760_v58, %v867_v16  ;;  %v1194_v19 = vadd.f32 %v1760_v58, %v963_v17  ;;  %v869_v20 = vpop.f32.mrb[29].mxu0  ;;  %v965_v21 = vpop.f32.mrb[29].mxu1 }
 0x138   : > { %v870_v22 = vpop.f32.mrb[30].mxu0  ;;  %v966_v23 = vpop.f32.mrb[30].mxu1 }
 0x139   : > { %1218 = vst [vmem:[%s1767_s20 + $0x70] sm:$0xff] %v1170_v18  ;;  %1242 = vst [vmem:[%s1767_s20 + $0x130] sm:$0xff] %v1194_v19  ;;  %v1171_v24 = vadd.f32 %v1760_v58, %v870_v22  ;;  %v1195_v25 = vadd.f32 %v1760_v58, %v966_v23  ;;  %v872_v26 = vpop.f32.mrb[31].mxu0  ;;  %v968_v27 = vpop.f32.mrb[31].mxu1 }
 0x13b   : > { %1219 = vst [vmem:[%s1767_s20 + $0x78] sm:$0xff] %v1171_v24  ;;  %1243 = vst [vmem:[%s1767_s20 + $0x138] sm:$0xff] %v1195_v25 }
 0x13e   : > { %v875_v28 = vpop.f32.mrb[32].mxu0  ;;  %v971_v29 = vpop.f32.mrb[32].mxu1 }
 0x13f   : > { %v1172_v30 = vadd.f32 %v1760_v58, %v875_v28  ;;  %v1196_v31 = vadd.f32 %v1760_v58, %v971_v29  ;;  %v877_v32 = vpop.f32.mrb[33].mxu0  ;;  %v973_v33 = vpop.f32.mrb[33].mxu1 }
 0x140   : > { %v878_v34 = vpop.f32.mrb[34].mxu0  ;;  %v974_v35 = vpop.f32.mrb[34].mxu1 }
 0x141   : > { %1220 = vst [vmem:[%s1767_s20 + $0x80] sm:$0xff] %v1172_v30  ;;  %1244 = vst [vmem:[%s1767_s20 + $0x140] sm:$0xff] %v1196_v31  ;;  %v1173_v36 = vadd.f32 %v1760_v58, %v878_v34  ;;  %v1197_v37 = vadd.f32 %v1760_v58, %v974_v35  ;;  %v880_v38 = vpop.f32.mrb[35].mxu0  ;;  %v976_v39 = vpop.f32.mrb[35].mxu1 }
 0x143   : > { %1221 = vst [vmem:[%s1767_s20 + $0x88] sm:$0xff] %v1173_v36  ;;  %1245 = vst [vmem:[%s1767_s20 + $0x148] sm:$0xff] %v1197_v37 }
 0x146   : > { %v883_v40 = vpop.f32.mrb[36].mxu0  ;;  %v979_v41 = vpop.f32.mrb[36].mxu1 }
 0x147   : > { %v1174_v42 = vadd.f32 %v1760_v58, %v883_v40  ;;  %v1198_v43 = vadd.f32 %v1760_v58, %v979_v41  ;;  %v885_v44 = vpop.f32.mrb[37].mxu0  ;;  %v981_v45 = vpop.f32.mrb[37].mxu1 }
 0x148   : > { %v886_v46 = vpop.f32.mrb[38].mxu0  ;;  %v982_v47 = vpop.f32.mrb[38].mxu1 }
 0x149   : > { %1222 = vst [vmem:[%s1767_s20 + $0x90] sm:$0xff] %v1174_v42  ;;  %1246 = vst [vmem:[%s1767_s20 + $0x150] sm:$0xff] %v1198_v43  ;;  %v1175_v48 = vadd.f32 %v1760_v58, %v886_v46  ;;  %v1199_v49 = vadd.f32 %v1760_v58, %v982_v47  ;;  %v888_v50 = vpop.f32.mrb[39].mxu0  ;;  %v984_v51 = vpop.f32.mrb[39].mxu1 }
 0x14b   : > { %1223 = vst [vmem:[%s1767_s20 + $0x98] sm:$0xff] %v1175_v48  ;;  %1247 = vst [vmem:[%s1767_s20 + $0x158] sm:$0xff] %v1199_v49 }
 0x14e   : > { %v891_v52 = vpop.f32.mrb[40].mxu0  ;;  %v987_v53 = vpop.f32.mrb[40].mxu1 }
 0x14f   : > { %v1176_v54 = vadd.f32 %v1760_v58, %v891_v52  ;;  %v1200_v55 = vadd.f32 %v1760_v58, %v987_v53  ;;  %v893_v56 = vpop.f32.mrb[41].mxu0  ;;  %v989_v57 = vpop.f32.mrb[41].mxu1 }
 0x150   : > { %v894_v59 = vpop.f32.mrb[42].mxu0  ;;  %v990_v60 = vpop.f32.mrb[42].mxu1 }
 0x151   : > { %1224 = vst [vmem:[%s1767_s20 + $0xa0] sm:$0xff] %v1176_v54  ;;  %1248 = vst [vmem:[%s1767_s20 + $0x160] sm:$0xff] %v1200_v55  ;;  %v1177_v61 = vadd.f32 %v1760_v58, %v894_v59  ;;  %v1201_v62 = vadd.f32 %v1760_v58, %v990_v60  ;;  %v896_v63 = vpop.f32.mrb[43].mxu0  ;;  %v992_v0 = vpop.f32.mrb[43].mxu1 }
 0x153   : > { %1225 = vst [vmem:[%s1767_s20 + $0xa8] sm:$0xff] %v1177_v61  ;;  %1249 = vst [vmem:[%s1767_s20 + $0x168] sm:$0xff] %v1201_v62 }
 0x156   : > { %v899_v1 = vpop.f32.mrb[44].mxu0  ;;  %v995_v2 = vpop.f32.mrb[44].mxu1 }
 0x157   : > { %v1178_v3 = vadd.f32 %v1760_v58, %v899_v1  ;;  %v1202_v4 = vadd.f32 %v1760_v58, %v995_v2  ;;  %v901_v5 = vpop.f32.mrb[45].mxu0  ;;  %v997_v6 = vpop.f32.mrb[45].mxu1 }
 0x158   : > { %v902_v7 = vpop.f32.mrb[46].mxu0  ;;  %v998_v8 = vpop.f32.mrb[46].mxu1 }
 0x159   : > { %1226 = vst [vmem:[%s1767_s20 + $0xb0] sm:$0xff] %v1178_v3  ;;  %1250 = vst [vmem:[%s1767_s20 + $0x170] sm:$0xff] %v1202_v4  ;;  %v1179_v9 = vadd.f32 %v1760_v58, %v902_v7  ;;  %v1203_v10 = vadd.f32 %v1760_v58, %v998_v8  ;;  %v904_v11 = vpop.f32.mrb[47].mxu0  ;;  %v1000_v12 = vpop.f32.mrb[47].mxu1 }
 0x15b   : > { %1227 = vst [vmem:[%s1767_s20 + $0xb8] sm:$0xff] %v1179_v9  ;;  %1251 = vst [vmem:[%s1767_s20 + $0x178] sm:$0xff] %v1203_v10 }
 0x15c PF: > { %s13_s14 = sadd.s32 1, %s1607_s14   ;;  %s1878_s12 = smov %s1603_s13 }
 0x15d   : > { %p10_p5 = scmp.ge.s32.totalorder %s13_s14, 4   ;;  %s1879_s13 = smov %s1881_s15 }
 0x15f   :  { %12 = sbr.rel (!%p10_p5) target bundleno = 2 (0x2), region = 76 }

</bundles_post_ra>
